<compile_context>
chip_gen: v5e
topology: v5e:2x2
jax: 0.10.0
libtpu: 0.0.40
codegen_flags: <defaults>
</compile_context>

<pallas_src>
import functools

import jax
import jax.numpy as jnp
from jax.experimental import pallas as pl
from jax.experimental.pallas import tpu as pltpu


# --------------------------------------------------------------------------
# Fused forward kernel.
# --------------------------------------------------------------------------

def _token_mae_kernel(x_ref, ea_ref, gm_ref, sm_ref,
                      wemb_ref, bemb_ref,
                      we_ref, be_ref, w1_ref, b1_ref, w2_ref, b2_ref,
                      wproj_ref, bproj_ref, lnin_g_ref, lnin_b_ref,
                      wqkv_ref, bqkv_ref, wo_ref, bo_ref,
                      ln1g_ref, ln1b_ref,
                      wff1_ref, bff1_ref, wff2_ref, bff2_ref,
                      ln2g_ref, ln2b_ref,
                      o_ref, *, n_gnn_layers, n_trans_layers, nhead,
                      n_graphs, seq_len, gin_eps, ln_eps):
    f32 = jnp.float32
    bf16 = jnp.bfloat16

    # ---------------- GNN path: embed -> GIN x L -> proj -> LayerNorm ----------------
    x = x_ref[...].astype(bf16)          # [N, in_dim]
    ea = ea_ref[...].astype(bf16)        # [E, edge_dim]
    gm = gm_ref[...]                     # [E, N] bf16 one-hot(src):  h[src] = gm @ h
    sm = sm_ref[...]                     # [N, E] bf16 one-hot(dst)T: agg    = sm @ msg

    # node-feature embedding (stand-in for the atom embedding table)
    h = jnp.dot(x, wemb_ref[...], preferred_element_type=f32) + bemb_ref[...]

    def gin_body(l, hh):
        # dense message passing: gather by src, relu(msg), scatter-add by dst, GIN MLP
        e = jnp.dot(ea, we_ref[l], preferred_element_type=f32) + be_ref[l]
        h_src = jnp.dot(gm, hh.astype(bf16), preferred_element_type=f32)
        msg = jnp.maximum(h_src + e, 0.0)
        agg = jnp.dot(sm, msg.astype(bf16), preferred_element_type=f32)
        pre = (1.0 + gin_eps) * hh + agg
        z = jnp.maximum(
            jnp.dot(pre.astype(bf16), w1_ref[l], preferred_element_type=f32) + b1_ref[l],
            0.0)
        return jnp.dot(z.astype(bf16), w2_ref[l], preferred_element_type=f32) + b2_ref[l]

    # layer 0 = tokenizer GIN, layers 1..L-1 = encoder GIN stack; relu after every
    # layer except the last (tokenizer gets gnn_act=relu, encoder relu between layers).
    h = jax.lax.fori_loop(0, n_gnn_layers - 1,
                          lambda l, hh: jnp.maximum(gin_body(l, hh), 0.0), h)
    h = gin_body(n_gnn_layers - 1, h)

    # emb_dim -> d_model projection, then transformer_norm_input LayerNorm
    h = jnp.dot(h.astype(bf16), wproj_ref[...], preferred_element_type=f32) + bproj_ref[...]

    def layer_norm(v, g, b):
        mu = jnp.mean(v, axis=-1, keepdims=True)
        var = jnp.mean(jnp.square(v - mu), axis=-1, keepdims=True)
        return (v - mu) * jax.lax.rsqrt(var + ln_eps) * g + b

    xf = layer_norm(h, lnin_g_ref[...], lnin_b_ref[...])     # [N, d], N = B*S

    # ---------------- Transformer path (post-norm, ReLU FFN, eval dropout) ----------
    d = xf.shape[1]
    dh = d // nhead
    scale = 1.0 / float(dh) ** 0.5

    def trans_layer(l, xt):
        wqkv_l = wqkv_ref[l]                 # [d, 3d] bf16
        wo_l = wo_ref[l]                     # [d, d]  bf16
        # fused QKV projection on the flattened [B*S, d] slab (lane-dense 3d output)
        qkv = jnp.dot(xt.astype(bf16), wqkv_l, preferred_element_type=f32) + bqkv_ref[l]

        # block-diagonal attention: per-graph S x S scores, per-head P@V folded
        # directly into the output projection (no head concat, no [N,N] waste).
        graph_outs = []
        for g in range(n_graphs):
            r0 = g * seq_len
            qkv_g = qkv[r0:r0 + seq_len, :]                  # [S, 3d] static row slice
            out_g = None
            for hd in range(nhead):
                c = hd * dh
                qh = (qkv_g[:, c:c + dh] * scale).astype(bf16)
                kh = qkv_g[:, d + c:d + c + dh].astype(bf16)
                vh = qkv_g[:, 2 * d + c:2 * d + c + dh].astype(bf16)
                s = jax.lax.dot_general(qh, kh, (((1,), (1,)), ((), ())),
                                        preferred_element_type=f32)   # [S, S]
                # key-padding mask all-valid in this config -> no bias add
                s = s - jnp.max(s, axis=-1, keepdims=True)
                p = jnp.exp(s)
                p = p * pl.reciprocal(jnp.sum(p, axis=-1, keepdims=True), approx=True)
                pv = jnp.dot(p.astype(bf16), vh, preferred_element_type=f32)  # [S, dh]
                head_out = jnp.dot(pv.astype(bf16), wo_l[c:c + dh, :],
                                   preferred_element_type=f32)        # [S, d]
                out_g = head_out if out_g is None else out_g + head_out
            graph_outs.append(out_g)
        attn = jnp.concatenate(graph_outs, axis=0) + bo_ref[l]         # [N, d]

        x1 = layer_norm(xt + attn, ln1g_ref[l], ln1b_ref[l])
        ff = jnp.maximum(
            jnp.dot(x1.astype(bf16), wff1_ref[l], preferred_element_type=f32) + bff1_ref[l],
            0.0)
        ff = jnp.dot(ff.astype(bf16), wff2_ref[l], preferred_element_type=f32) + bff2_ref[l]
        return layer_norm(x1 + ff, ln2g_ref[l], ln2b_ref[l])

    xf = jax.lax.fori_loop(0, n_trans_layers, trans_layer, xf)
    o_ref[...] = xf


# --------------------------------------------------------------------------
# Wrapper: one pallas_call for the whole forward.
# --------------------------------------------------------------------------

def token_mae_clf_forward(params, x, edge_attr, gather_mat, scatter_mat, B, S,
                          *, gin_eps=0.0, ln_eps=1e-5):
    g = params["gnn"]
    t = params["trans"]
    N = x.shape[0]
    d_model = g["w_proj"].shape[1]
    n_gnn_layers = g["we"].shape[0]
    n_trans_layers = t["wqkv"].shape[0]

    args = (x, edge_attr, gather_mat, scatter_mat,
            g["w_embed"], g["b_embed"],
            g["we"], g["be"], g["w1"], g["b1"], g["w2"], g["b2"],
            g["w_proj"], g["b_proj"], g["ln_in_g"], g["ln_in_b"],
            t["wqkv"], t["bqkv"], t["wo"], t["bo"],
            t["ln1_g"], t["ln1_b"],
            t["wff1"], t["bff1"], t["wff2"], t["bff2"],
            t["ln2_g"], t["ln2_b"])

    in_specs = [pl.BlockSpec(a.shape, lambda i, n=a.ndim: (0,) * n) for a in args]

    kernel = functools.partial(
        _token_mae_kernel,
        n_gnn_layers=n_gnn_layers, n_trans_layers=n_trans_layers,
        nhead=params["nhead"], n_graphs=B, seq_len=S,
        gin_eps=gin_eps, ln_eps=ln_eps)

    # trans_pooling='none' -> node-level representations [N_total, d_model]
    return pl.pallas_call(
        kernel,
        out_shape=jax.ShapeDtypeStruct((N, d_model), jnp.float32),
        grid=(1,),
        in_specs=in_specs,
        out_specs=pl.BlockSpec((N, d_model), lambda i: (0, 0)),
        compiler_params=pltpu.CompilerParams(
            dimension_semantics=("arbitrary",),
            vmem_limit_bytes=48 * 1024 * 1024),
    )(*args)


# --------------------------------------------------------------------------
# Parameter init: matmul weights stored bf16, biases / LN params f32.
# --------------------------------------------------------------------------

def init_params(key, in_dim, edge_dim, emb_dim, d_model, nhead, dim_ff,
                n_gin_enc, n_trans):
    keys = iter(jax.random.split(key, 64))

    def dense(shape):
        fan_in = shape[-2]
        w = (1.0 / jnp.sqrt(jnp.float32(fan_in))) * \
            jax.random.normal(next(keys), shape, jnp.float32)
        return w.astype(jnp.bfloat16)

    def zeros(shape):
        return jnp.zeros(shape, jnp.float32)

    def ones(shape):
        return jnp.ones(shape, jnp.float32)

    L = 1 + n_gin_enc   # tokenizer GIN + encoder GIN layers, stacked along axis 0
    D = emb_dim
    gnn = dict(
        w_embed=dense((in_dim, D)), b_embed=zeros((1, D)),
        we=dense((L, edge_dim, D)), be=zeros((L, 1, D)),
        w1=dense((L, D, 2 * D)), b1=zeros((L, 1, 2 * D)),
        w2=dense((L, 2 * D, D)), b2=zeros((L, 1, D)),
        w_proj=dense((D, d_model)), b_proj=zeros((1, d_model)),
        ln_in_g=ones((1, d_model)), ln_in_b=zeros((1, d_model)),
    )
    trans = dict(
        wqkv=dense((n_trans, d_model, 3 * d_model)), bqkv=zeros((n_trans, 1, 3 * d_model)),
        wo=dense((n_trans, d_model, d_model)), bo=zeros((n_trans, 1, d_model)),
        ln1_g=ones((n_trans, 1, d_model)), ln1_b=zeros((n_trans, 1, d_model)),
        wff1=dense((n_trans, d_model, dim_ff)), bff1=zeros((n_trans, 1, dim_ff)),
        wff2=dense((n_trans, dim_ff, d_model)), bff2=zeros((n_trans, 1, d_model)),
        ln2_g=ones((n_trans, 1, d_model)), ln2_b=zeros((n_trans, 1, d_model)),
    )
    return dict(nhead=nhead, gnn=gnn, trans=trans)


if __name__ == "__main__":
    key = jax.random.PRNGKey(0)

    # small shapes consistent with the module's forward (lane-dense hidden dims)
    B, S = 2, 8                 # 2 graphs, 8 nodes each
    N = B * S                   # 16 nodes total
    in_dim, edge_dim = 8, 8
    emb_dim = 128               # gnn_emb_dim (lane-dense; module default 300)
    d_model, nhead, dim_ff = 128, 4, 256
    n_gin_enc = 4               # gnn_encoder_layer(5) - 1
    n_trans = 4                 # trans_encoder_layer default

    # bidirectional ring graph per molecule
    src_list, dst_list = [], []
    for gi in range(B):
        for i in range(S):
            a = gi * S + i
            b2 = gi * S + (i + 1) % S
            src_list += [a, b2]
            dst_list += [b2, a]
    src = jnp.array(src_list, jnp.int32)
    dst = jnp.array(dst_list, jnp.int32)
    E = int(src.shape[0])

    # message passing as dense one-hot matmuls, bf16 operands (portable across
    # v5e/v6e/v7x).  TODO(synk): int8 one-hots on v5e/v6e (native int8 MXU).
    gather_mat = jax.nn.one_hot(src, N, dtype=jnp.bfloat16)       # [E, N]
    scatter_mat = jax.nn.one_hot(dst, N, dtype=jnp.bfloat16).T    # [N, E]

    kx, ke, kp = jax.random.split(key, 3)
    x = jax.random.normal(kx, (N, in_dim), jnp.float32)
    edge_attr = jax.random.normal(ke, (E, edge_dim), jnp.float32)

    params = init_params(kp, in_dim, edge_dim, emb_dim, d_model, nhead, dim_ff,
                         n_gin_enc, n_trans)

    out = token_mae_clf_forward(params, x, edge_attr, gather_mat, scatter_mat, B, S)
    out = jax.block_until_ready(out)
    assert out.shape == (N, d_model) and out.dtype == jnp.float32
    assert bool(jnp.all(jnp.isfinite(out)))
    print("KERNEL_OK")
</pallas_src>

<mosaic_0001>
module attributes {stable_mosaic.version = 11 : i64} {
  func.func @_token_mae_kernel(%arg0: i32, %arg1: memref<16x8xf32, #tpu.memory_space<vmem>>, %arg2: memref<32x8xf32, #tpu.memory_space<vmem>>, %arg3: memref<32x16xbf16, #tpu.memory_space<vmem>>, %arg4: memref<16x32xbf16, #tpu.memory_space<vmem>>, %arg5: memref<8x128xbf16, #tpu.memory_space<vmem>>, %arg6: memref<1x128xf32, #tpu.memory_space<vmem>>, %arg7: memref<5x8x128xbf16, #tpu.memory_space<vmem>>, %arg8: memref<5x1x128xf32, #tpu.memory_space<vmem>>, %arg9: memref<5x128x256xbf16, #tpu.memory_space<vmem>>, %arg10: memref<5x1x256xf32, #tpu.memory_space<vmem>>, %arg11: memref<5x256x128xbf16, #tpu.memory_space<vmem>>, %arg12: memref<5x1x128xf32, #tpu.memory_space<vmem>>, %arg13: memref<128x128xbf16, #tpu.memory_space<vmem>>, %arg14: memref<1x128xf32, #tpu.memory_space<vmem>>, %arg15: memref<1x128xf32, #tpu.memory_space<vmem>>, %arg16: memref<1x128xf32, #tpu.memory_space<vmem>>, %arg17: memref<4x128x384xbf16, #tpu.memory_space<vmem>>, %arg18: memref<4x1x384xf32, #tpu.memory_space<vmem>>, %arg19: memref<4x128x128xbf16, #tpu.memory_space<vmem>>, %arg20: memref<4x1x128xf32, #tpu.memory_space<vmem>>, %arg21: memref<4x1x128xf32, #tpu.memory_space<vmem>>, %arg22: memref<4x1x128xf32, #tpu.memory_space<vmem>>, %arg23: memref<4x128x256xbf16, #tpu.memory_space<vmem>>, %arg24: memref<4x1x256xf32, #tpu.memory_space<vmem>>, %arg25: memref<4x256x128xbf16, #tpu.memory_space<vmem>>, %arg26: memref<4x1x128xf32, #tpu.memory_space<vmem>>, %arg27: memref<4x1x128xf32, #tpu.memory_space<vmem>>, %arg28: memref<4x1x128xf32, #tpu.memory_space<vmem>>, %arg29: memref<16x128xf32, #tpu.memory_space<vmem>>) attributes {dimension_semantics = [#tpu.dimension_semantics<arbitrary>], iteration_bounds = array<i64: 1>, scalar_prefetch = 0 : i64, scratch_operands = 0 : i64, tpu.core_type = #tpu.core_type<tc>, window_params = [{pipeline_mode = #tpu.pipeline_mode<synchronous>, transform_indices = @transform_0, window_bounds = array<i64: 16, 8>}, {pipeline_mode = #tpu.pipeline_mode<synchronous>, transform_indices = @transform_1, window_bounds = array<i64: 32, 8>}, {pipeline_mode = #tpu.pipeline_mode<synchronous>, transform_indices = @transform_2, window_bounds = array<i64: 32, 16>}, {pipeline_mode = #tpu.pipeline_mode<synchronous>, transform_indices = @transform_3, window_bounds = array<i64: 16, 32>}, {pipeline_mode = #tpu.pipeline_mode<synchronous>, transform_indices = @transform_4, window_bounds = array<i64: 8, 128>}, {pipeline_mode = #tpu.pipeline_mode<synchronous>, transform_indices = @transform_5, window_bounds = array<i64: 1, 128>}, {pipeline_mode = #tpu.pipeline_mode<synchronous>, transform_indices = @transform_6, window_bounds = array<i64: 5, 8, 128>}, {pipeline_mode = #tpu.pipeline_mode<synchronous>, transform_indices = @transform_7, window_bounds = array<i64: 5, 1, 128>}, {pipeline_mode = #tpu.pipeline_mode<synchronous>, transform_indices = @transform_8, window_bounds = array<i64: 5, 128, 256>}, {pipeline_mode = #tpu.pipeline_mode<synchronous>, transform_indices = @transform_9, window_bounds = array<i64: 5, 1, 256>}, {pipeline_mode = #tpu.pipeline_mode<synchronous>, transform_indices = @transform_10, window_bounds = array<i64: 5, 256, 128>}, {pipeline_mode = #tpu.pipeline_mode<synchronous>, transform_indices = @transform_11, window_bounds = array<i64: 5, 1, 128>}, {pipeline_mode = #tpu.pipeline_mode<synchronous>, transform_indices = @transform_12, window_bounds = array<i64: 128, 128>}, {pipeline_mode = #tpu.pipeline_mode<synchronous>, transform_indices = @transform_13, window_bounds = array<i64: 1, 128>}, {pipeline_mode = #tpu.pipeline_mode<synchronous>, transform_indices = @transform_14, window_bounds = array<i64: 1, 128>}, {pipeline_mode = #tpu.pipeline_mode<synchronous>, transform_indices = @transform_15, window_bounds = array<i64: 1, 128>}, {pipeline_mode = #tpu.pipeline_mode<synchronous>, transform_indices = @transform_16, window_bounds = array<i64: 4, 128, 384>}, {pipeline_mode = #tpu.pipeline_mode<synchronous>, transform_indices = @transform_17, window_bounds = array<i64: 4, 1, 384>}, {pipeline_mode = #tpu.pipeline_mode<synchronous>, transform_indices = @transform_18, window_bounds = array<i64: 4, 128, 128>}, {pipeline_mode = #tpu.pipeline_mode<synchronous>, transform_indices = @transform_19, window_bounds = array<i64: 4, 1, 128>}, {pipeline_mode = #tpu.pipeline_mode<synchronous>, transform_indices = @transform_20, window_bounds = array<i64: 4, 1, 128>}, {pipeline_mode = #tpu.pipeline_mode<synchronous>, transform_indices = @transform_21, window_bounds = array<i64: 4, 1, 128>}, {pipeline_mode = #tpu.pipeline_mode<synchronous>, transform_indices = @transform_22, window_bounds = array<i64: 4, 128, 256>}, {pipeline_mode = #tpu.pipeline_mode<synchronous>, transform_indices = @transform_23, window_bounds = array<i64: 4, 1, 256>}, {pipeline_mode = #tpu.pipeline_mode<synchronous>, transform_indices = @transform_24, window_bounds = array<i64: 4, 256, 128>}, {pipeline_mode = #tpu.pipeline_mode<synchronous>, transform_indices = @transform_25, window_bounds = array<i64: 4, 1, 128>}, {pipeline_mode = #tpu.pipeline_mode<synchronous>, transform_indices = @transform_26, window_bounds = array<i64: 4, 1, 128>}, {pipeline_mode = #tpu.pipeline_mode<synchronous>, transform_indices = @transform_27, window_bounds = array<i64: 4, 1, 128>}, {pipeline_mode = #tpu.pipeline_mode<synchronous>, transform_indices = @transform_28, window_bounds = array<i64: 16, 128>}]} {
    %c0 = arith.constant 0 : index
    %c0_0 = arith.constant 0 : index
    %0 = vector.load %arg1[%c0, %c0_0] : memref<16x8xf32, #tpu.memory_space<vmem>>, vector<16x8xf32>
    %1 = arith.truncf %0 : vector<16x8xf32> to vector<16x8xbf16>
    %c0_1 = arith.constant 0 : index
    %c0_2 = arith.constant 0 : index
    %2 = vector.load %arg2[%c0_1, %c0_2] : memref<32x8xf32, #tpu.memory_space<vmem>>, vector<32x8xf32>
    %3 = arith.truncf %2 : vector<32x8xf32> to vector<32x8xbf16>
    %c0_3 = arith.constant 0 : index
    %c0_4 = arith.constant 0 : index
    %4 = vector.load %arg3[%c0_3, %c0_4] : memref<32x16xbf16, #tpu.memory_space<vmem>>, vector<32x16xbf16>
    %c0_5 = arith.constant 0 : index
    %c0_6 = arith.constant 0 : index
    %5 = vector.load %arg4[%c0_5, %c0_6] : memref<16x32xbf16, #tpu.memory_space<vmem>>, vector<16x32xbf16>
    %c0_7 = arith.constant 0 : index
    %c0_8 = arith.constant 0 : index
    %6 = vector.load %arg5[%c0_7, %c0_8] : memref<8x128xbf16, #tpu.memory_space<vmem>>, vector<8x128xbf16>
    %cst = arith.constant dense<0.000000e+00> : vector<16x128xf32>
    %7 = tpu.matmul %1, %6, %cst {dimension_numbers = #tpu.dot_dimension_numbers<[1], [0], [0], [1], [0, 0, 1, 1], [], []>} : vector<16x8xbf16>, vector<8x128xbf16>, vector<16x128xf32> -> vector<16x128xf32>
    %c0_9 = arith.constant 0 : index
    %c0_10 = arith.constant 0 : index
    %8 = vector.load %arg6[%c0_9, %c0_10] : memref<1x128xf32, #tpu.memory_space<vmem>>, vector<1x128xf32>
    %9 = vector.broadcast %8 : vector<1x128xf32> to vector<16x128xf32>
    %10 = arith.addf %7, %9 : vector<16x128xf32>
    %c0_i32 = arith.constant 0 : i32
    %c4_i32 = arith.constant 4 : i32
    %11 = arith.addi %c0_i32, %c4_i32 : i32
    %c1_i32 = arith.constant 1 : i32
    %12 = scf.for %arg30 = %c0_i32 to %11 step %c1_i32 iter_args(%arg31 = %10) -> (vector<16x128xf32>)  : i32 {
      %81 = arith.index_cast %arg30 : i32 to index
      %c0_57 = arith.constant 0 : index
      %c0_58 = arith.constant 0 : index
      %82 = vector.load %arg7[%81, %c0_57, %c0_58] : memref<5x8x128xbf16, #tpu.memory_space<vmem>>, vector<1x8x128xbf16>
      %83 = vector.shape_cast %82 : vector<1x8x128xbf16> to vector<8x128xbf16>
      %cst_59 = arith.constant dense<0.000000e+00> : vector<32x128xf32>
      %84 = tpu.matmul %3, %83, %cst_59 {dimension_numbers = #tpu.dot_dimension_numbers<[1], [0], [0], [1], [0, 0, 1, 1], [], []>} : vector<32x8xbf16>, vector<8x128xbf16>, vector<32x128xf32> -> vector<32x128xf32>
      %85 = arith.index_cast %arg30 : i32 to index
      %c0_60 = arith.constant 0 : index
      %c0_61 = arith.constant 0 : index
      %86 = vector.load %arg8[%85, %c0_60, %c0_61] : memref<5x1x128xf32, #tpu.memory_space<vmem>>, vector<1x1x128xf32>
      %87 = vector.shape_cast %86 : vector<1x1x128xf32> to vector<1x128xf32>
      %88 = vector.broadcast %87 : vector<1x128xf32> to vector<32x128xf32>
      %89 = arith.addf %84, %88 : vector<32x128xf32>
      %90 = arith.truncf %arg31 : vector<16x128xf32> to vector<16x128xbf16>
      %cst_62 = arith.constant dense<0.000000e+00> : vector<32x128xf32>
      %91 = tpu.matmul %4, %90, %cst_62 {dimension_numbers = #tpu.dot_dimension_numbers<[1], [0], [0], [1], [0, 0, 1, 1], [], []>} : vector<32x16xbf16>, vector<16x128xbf16>, vector<32x128xf32> -> vector<32x128xf32>
      %92 = arith.addf %91, %89 : vector<32x128xf32>
      %cst_63 = arith.constant 0.000000e+00 : f32
      %93 = vector.broadcast %cst_63 : f32 to vector<32x128xf32>
      %94 = arith.maximumf %92, %93 : vector<32x128xf32>
      %95 = arith.truncf %94 : vector<32x128xf32> to vector<32x128xbf16>
      %cst_64 = arith.constant dense<0.000000e+00> : vector<16x128xf32>
      %96 = tpu.matmul %5, %95, %cst_64 {dimension_numbers = #tpu.dot_dimension_numbers<[1], [0], [0], [1], [0, 0, 1, 1], [], []>} : vector<16x32xbf16>, vector<32x128xbf16>, vector<16x128xf32> -> vector<16x128xf32>
      %cst_65 = arith.constant 1.000000e+00 : f32
      %97 = vector.broadcast %cst_65 : f32 to vector<16x128xf32>
      %98 = arith.mulf %97, %arg31 : vector<16x128xf32>
      %99 = arith.addf %98, %96 : vector<16x128xf32>
      %100 = arith.truncf %99 : vector<16x128xf32> to vector<16x128xbf16>
      %101 = arith.index_cast %arg30 : i32 to index
      %c0_66 = arith.constant 0 : index
      %c0_67 = arith.constant 0 : index
      %102 = vector.load %arg9[%101, %c0_66, %c0_67] : memref<5x128x256xbf16, #tpu.memory_space<vmem>>, vector<1x128x256xbf16>
      %103 = vector.shape_cast %102 : vector<1x128x256xbf16> to vector<128x256xbf16>
      %cst_68 = arith.constant dense<0.000000e+00> : vector<16x256xf32>
      %104 = tpu.matmul %100, %103, %cst_68 {dimension_numbers = #tpu.dot_dimension_numbers<[1], [0], [0], [1], [0, 0, 1, 1], [], []>} : vector<16x128xbf16>, vector<128x256xbf16>, vector<16x256xf32> -> vector<16x256xf32>
      %105 = arith.index_cast %arg30 : i32 to index
      %c0_69 = arith.constant 0 : index
      %c0_70 = arith.constant 0 : index
      %106 = vector.load %arg10[%105, %c0_69, %c0_70] : memref<5x1x256xf32, #tpu.memory_space<vmem>>, vector<1x1x256xf32>
      %107 = vector.shape_cast %106 : vector<1x1x256xf32> to vector<1x256xf32>
      %108 = vector.broadcast %107 : vector<1x256xf32> to vector<16x256xf32>
      %109 = arith.addf %104, %108 : vector<16x256xf32>
      %cst_71 = arith.constant 0.000000e+00 : f32
      %110 = vector.broadcast %cst_71 : f32 to vector<16x256xf32>
      %111 = arith.maximumf %109, %110 : vector<16x256xf32>
      %112 = arith.truncf %111 : vector<16x256xf32> to vector<16x256xbf16>
      %113 = arith.index_cast %arg30 : i32 to index
      %c0_72 = arith.constant 0 : index
      %c0_73 = arith.constant 0 : index
      %114 = vector.load %arg11[%113, %c0_72, %c0_73] : memref<5x256x128xbf16, #tpu.memory_space<vmem>>, vector<1x256x128xbf16>
      %115 = vector.shape_cast %114 : vector<1x256x128xbf16> to vector<256x128xbf16>
      %cst_74 = arith.constant dense<0.000000e+00> : vector<16x128xf32>
      %116 = tpu.matmul %112, %115, %cst_74 {dimension_numbers = #tpu.dot_dimension_numbers<[1], [0], [0], [1], [0, 0, 1, 1], [], []>} : vector<16x256xbf16>, vector<256x128xbf16>, vector<16x128xf32> -> vector<16x128xf32>
      %117 = arith.index_cast %arg30 : i32 to index
      %c0_75 = arith.constant 0 : index
      %c0_76 = arith.constant 0 : index
      %118 = vector.load %arg12[%117, %c0_75, %c0_76] : memref<5x1x128xf32, #tpu.memory_space<vmem>>, vector<1x1x128xf32>
      %119 = vector.shape_cast %118 : vector<1x1x128xf32> to vector<1x128xf32>
      %120 = vector.broadcast %119 : vector<1x128xf32> to vector<16x128xf32>
      %121 = arith.addf %116, %120 : vector<16x128xf32>
      %cst_77 = arith.constant 0.000000e+00 : f32
      %122 = vector.broadcast %cst_77 : f32 to vector<16x128xf32>
      %123 = arith.maximumf %121, %122 : vector<16x128xf32>
      scf.yield %123 : vector<16x128xf32>
    }
    %c4_i32_11 = arith.constant 4 : i32
    %c4 = arith.constant 4 : index
    %c0_12 = arith.constant 0 : index
    %c0_13 = arith.constant 0 : index
    %13 = vector.load %arg7[%c4, %c0_12, %c0_13] : memref<5x8x128xbf16, #tpu.memory_space<vmem>>, vector<1x8x128xbf16>
    %14 = vector.shape_cast %13 : vector<1x8x128xbf16> to vector<8x128xbf16>
    %cst_14 = arith.constant dense<0.000000e+00> : vector<32x128xf32>
    %15 = tpu.matmul %3, %14, %cst_14 {dimension_numbers = #tpu.dot_dimension_numbers<[1], [0], [0], [1], [0, 0, 1, 1], [], []>} : vector<32x8xbf16>, vector<8x128xbf16>, vector<32x128xf32> -> vector<32x128xf32>
    %c4_15 = arith.constant 4 : index
    %c0_16 = arith.constant 0 : index
    %c0_17 = arith.constant 0 : index
    %16 = vector.load %arg8[%c4_15, %c0_16, %c0_17] : memref<5x1x128xf32, #tpu.memory_space<vmem>>, vector<1x1x128xf32>
    %17 = vector.shape_cast %16 : vector<1x1x128xf32> to vector<1x128xf32>
    %18 = vector.broadcast %17 : vector<1x128xf32> to vector<32x128xf32>
    %19 = arith.addf %15, %18 : vector<32x128xf32>
    %20 = arith.truncf %12 : vector<16x128xf32> to vector<16x128xbf16>
    %cst_18 = arith.constant dense<0.000000e+00> : vector<32x128xf32>
    %21 = tpu.matmul %4, %20, %cst_18 {dimension_numbers = #tpu.dot_dimension_numbers<[1], [0], [0], [1], [0, 0, 1, 1], [], []>} : vector<32x16xbf16>, vector<16x128xbf16>, vector<32x128xf32> -> vector<32x128xf32>
    %22 = arith.addf %21, %19 : vector<32x128xf32>
    %cst_19 = arith.constant 0.000000e+00 : f32
    %23 = vector.broadcast %cst_19 : f32 to vector<32x128xf32>
    %24 = arith.maximumf %22, %23 : vector<32x128xf32>
    %25 = arith.truncf %24 : vector<32x128xf32> to vector<32x128xbf16>
    %cst_20 = arith.constant dense<0.000000e+00> : vector<16x128xf32>
    %26 = tpu.matmul %5, %25, %cst_20 {dimension_numbers = #tpu.dot_dimension_numbers<[1], [0], [0], [1], [0, 0, 1, 1], [], []>} : vector<16x32xbf16>, vector<32x128xbf16>, vector<16x128xf32> -> vector<16x128xf32>
    %cst_21 = arith.constant 1.000000e+00 : f32
    %27 = vector.broadcast %cst_21 : f32 to vector<16x128xf32>
    %28 = arith.mulf %27, %12 : vector<16x128xf32>
    %29 = arith.addf %28, %26 : vector<16x128xf32>
    %30 = arith.truncf %29 : vector<16x128xf32> to vector<16x128xbf16>
    %c4_22 = arith.constant 4 : index
    %c0_23 = arith.constant 0 : index
    %c0_24 = arith.constant 0 : index
    %31 = vector.load %arg9[%c4_22, %c0_23, %c0_24] : memref<5x128x256xbf16, #tpu.memory_space<vmem>>, vector<1x128x256xbf16>
    %32 = vector.shape_cast %31 : vector<1x128x256xbf16> to vector<128x256xbf16>
    %cst_25 = arith.constant dense<0.000000e+00> : vector<16x256xf32>
    %33 = tpu.matmul %30, %32, %cst_25 {dimension_numbers = #tpu.dot_dimension_numbers<[1], [0], [0], [1], [0, 0, 1, 1], [], []>} : vector<16x128xbf16>, vector<128x256xbf16>, vector<16x256xf32> -> vector<16x256xf32>
    %c4_26 = arith.constant 4 : index
    %c0_27 = arith.constant 0 : index
    %c0_28 = arith.constant 0 : index
    %34 = vector.load %arg10[%c4_26, %c0_27, %c0_28] : memref<5x1x256xf32, #tpu.memory_space<vmem>>, vector<1x1x256xf32>
    %35 = vector.shape_cast %34 : vector<1x1x256xf32> to vector<1x256xf32>
    %36 = vector.broadcast %35 : vector<1x256xf32> to vector<16x256xf32>
    %37 = arith.addf %33, %36 : vector<16x256xf32>
    %cst_29 = arith.constant 0.000000e+00 : f32
    %38 = vector.broadcast %cst_29 : f32 to vector<16x256xf32>
    %39 = arith.maximumf %37, %38 : vector<16x256xf32>
    %40 = arith.truncf %39 : vector<16x256xf32> to vector<16x256xbf16>
    %c4_30 = arith.constant 4 : index
    %c0_31 = arith.constant 0 : index
    %c0_32 = arith.constant 0 : index
    %41 = vector.load %arg11[%c4_30, %c0_31, %c0_32] : memref<5x256x128xbf16, #tpu.memory_space<vmem>>, vector<1x256x128xbf16>
    %42 = vector.shape_cast %41 : vector<1x256x128xbf16> to vector<256x128xbf16>
    %cst_33 = arith.constant dense<0.000000e+00> : vector<16x128xf32>
    %43 = tpu.matmul %40, %42, %cst_33 {dimension_numbers = #tpu.dot_dimension_numbers<[1], [0], [0], [1], [0, 0, 1, 1], [], []>} : vector<16x256xbf16>, vector<256x128xbf16>, vector<16x128xf32> -> vector<16x128xf32>
    %c4_34 = arith.constant 4 : index
    %c0_35 = arith.constant 0 : index
    %c0_36 = arith.constant 0 : index
    %44 = vector.load %arg12[%c4_34, %c0_35, %c0_36] : memref<5x1x128xf32, #tpu.memory_space<vmem>>, vector<1x1x128xf32>
    %45 = vector.shape_cast %44 : vector<1x1x128xf32> to vector<1x128xf32>
    %46 = vector.broadcast %45 : vector<1x128xf32> to vector<16x128xf32>
    %47 = arith.addf %43, %46 : vector<16x128xf32>
    %48 = arith.truncf %47 : vector<16x128xf32> to vector<16x128xbf16>
    %c0_37 = arith.constant 0 : index
    %c0_38 = arith.constant 0 : index
    %49 = vector.load %arg13[%c0_37, %c0_38] : memref<128x128xbf16, #tpu.memory_space<vmem>>, vector<128x128xbf16>
    %cst_39 = arith.constant dense<0.000000e+00> : vector<16x128xf32>
    %50 = tpu.matmul %48, %49, %cst_39 {dimension_numbers = #tpu.dot_dimension_numbers<[1], [0], [0], [1], [0, 0, 1, 1], [], []>} : vector<16x128xbf16>, vector<128x128xbf16>, vector<16x128xf32> -> vector<16x128xf32>
    %c0_40 = arith.constant 0 : index
    %c0_41 = arith.constant 0 : index
    %51 = vector.load %arg14[%c0_40, %c0_41] : memref<1x128xf32, #tpu.memory_space<vmem>>, vector<1x128xf32>
    %52 = vector.broadcast %51 : vector<1x128xf32> to vector<16x128xf32>
    %53 = arith.addf %50, %52 : vector<16x128xf32>
    %c0_42 = arith.constant 0 : index
    %c0_43 = arith.constant 0 : index
    %54 = vector.load %arg15[%c0_42, %c0_43] : memref<1x128xf32, #tpu.memory_space<vmem>>, vector<1x128xf32>
    %c0_44 = arith.constant 0 : index
    %c0_45 = arith.constant 0 : index
    %55 = vector.load %arg16[%c0_44, %c0_45] : memref<1x128xf32, #tpu.memory_space<vmem>>, vector<1x128xf32>
    %cst_46 = arith.constant dense<0.000000e+00> : vector<16xf32>
    %56 = vector.multi_reduction <add>, %53, %cst_46 [1] : vector<16x128xf32> to vector<16xf32>
    %57 = vector.shape_cast %56 : vector<16xf32> to vector<16x1xf32>
    %cst_47 = arith.constant 1.280000e+02 : f32
    %58 = vector.broadcast %cst_47 : f32 to vector<16x1xf32>
    %59 = arith.divf %57, %58 : vector<16x1xf32>
    %60 = vector.broadcast %59 : vector<16x1xf32> to vector<16x128xf32>
    %61 = arith.subf %53, %60 : vector<16x128xf32>
    %62 = arith.mulf %61, %61 : vector<16x128xf32>
    %cst_48 = arith.constant dense<0.000000e+00> : vector<16xf32>
    %63 = vector.multi_reduction <add>, %62, %cst_48 [1] : vector<16x128xf32> to vector<16xf32>
    %64 = vector.shape_cast %63 : vector<16xf32> to vector<16x1xf32>
    %cst_49 = arith.constant 1.280000e+02 : f32
    %65 = vector.broadcast %cst_49 : f32 to vector<16x1xf32>
    %66 = arith.divf %64, %65 : vector<16x1xf32>
    %67 = vector.broadcast %59 : vector<16x1xf32> to vector<16x128xf32>
    %68 = arith.subf %53, %67 : vector<16x128xf32>
    %cst_50 = arith.constant 9.99999974E-6 : f32
    %69 = vector.broadcast %cst_50 : f32 to vector<16x1xf32>
    %70 = arith.addf %66, %69 : vector<16x1xf32>
    %71 = math.rsqrt %70 : vector<16x1xf32>
    %72 = vector.broadcast %71 : vector<16x1xf32> to vector<16x128xf32>
    %73 = arith.mulf %68, %72 : vector<16x128xf32>
    %74 = vector.broadcast %54 : vector<1x128xf32> to vector<16x128xf32>
    %75 = arith.mulf %73, %74 : vector<16x128xf32>
    %76 = vector.broadcast %55 : vector<1x128xf32> to vector<16x128xf32>
    %77 = arith.addf %75, %76 : vector<16x128xf32>
    %c0_i32_51 = arith.constant 0 : i32
    %c4_i32_52 = arith.constant 4 : i32
    %78 = arith.addi %c0_i32_51, %c4_i32_52 : i32
    %c1_i32_53 = arith.constant 1 : i32
    %79 = scf.for %arg30 = %c0_i32_51 to %78 step %c1_i32_53 iter_args(%arg31 = %77) -> (vector<16x128xf32>)  : i32 {
      %81 = arith.index_cast %arg30 : i32 to index
      %c0_57 = arith.constant 0 : index
      %c0_58 = arith.constant 0 : index
      %82 = vector.load %arg17[%81, %c0_57, %c0_58] : memref<4x128x384xbf16, #tpu.memory_space<vmem>>, vector<1x128x384xbf16>
      %83 = vector.shape_cast %82 : vector<1x128x384xbf16> to vector<128x384xbf16>
      %84 = arith.index_cast %arg30 : i32 to index
      %c0_59 = arith.constant 0 : index
      %c0_60 = arith.constant 0 : index
      %85 = vector.load %arg19[%84, %c0_59, %c0_60] : memref<4x128x128xbf16, #tpu.memory_space<vmem>>, vector<1x128x128xbf16>
      %86 = vector.shape_cast %85 : vector<1x128x128xbf16> to vector<128x128xbf16>
      %87 = arith.truncf %arg31 : vector<16x128xf32> to vector<16x128xbf16>
      %cst_61 = arith.constant dense<0.000000e+00> : vector<16x384xf32>
      %88 = tpu.matmul %87, %83, %cst_61 {dimension_numbers = #tpu.dot_dimension_numbers<[1], [0], [0], [1], [0, 0, 1, 1], [], []>} : vector<16x128xbf16>, vector<128x384xbf16>, vector<16x384xf32> -> vector<16x384xf32>
      %89 = arith.index_cast %arg30 : i32 to index
      %c0_62 = arith.constant 0 : index
      %c0_63 = arith.constant 0 : index
      %90 = vector.load %arg18[%89, %c0_62, %c0_63] : memref<4x1x384xf32, #tpu.memory_space<vmem>>, vector<1x1x384xf32>
      %91 = vector.shape_cast %90 : vector<1x1x384xf32> to vector<1x384xf32>
      %92 = vector.broadcast %91 : vector<1x384xf32> to vector<16x384xf32>
      %93 = arith.addf %88, %92 : vector<16x384xf32>
      %94 = vector.extract_strided_slice %93 {offsets = [0, 0], sizes = [8, 384], strides = [1, 1]} : vector<16x384xf32> to vector<8x384xf32>
      %95 = vector.extract_strided_slice %94 {offsets = [0, 0], sizes = [8, 32], strides = [1, 1]} : vector<8x384xf32> to vector<8x32xf32>
      %cst_64 = arith.constant 0.176776692 : f32
      %96 = vector.broadcast %cst_64 : f32 to vector<8x32xf32>
      %97 = arith.mulf %95, %96 : vector<8x32xf32>
      %98 = arith.truncf %97 : vector<8x32xf32> to vector<8x32xbf16>
      %99 = vector.extract_strided_slice %94 {offsets = [0, 128], sizes = [8, 32], strides = [1, 1]} : vector<8x384xf32> to vector<8x32xf32>
      %100 = arith.truncf %99 : vector<8x32xf32> to vector<8x32xbf16>
      %101 = vector.extract_strided_slice %94 {offsets = [0, 256], sizes = [8, 32], strides = [1, 1]} : vector<8x384xf32> to vector<8x32xf32>
      %102 = arith.truncf %101 : vector<8x32xf32> to vector<8x32xbf16>
      %cst_65 = arith.constant dense<0.000000e+00> : vector<8x8xf32>
      %103 = tpu.matmul %98, %100, %cst_65 {dimension_numbers = #tpu.dot_dimension_numbers<[1], [1], [0], [0], [0, 0, 1, 0], [], []>} : vector<8x32xbf16>, vector<8x32xbf16>, vector<8x8xf32> -> vector<8x8xf32>
      %cst_66 = arith.constant dense<0xFF800000> : vector<8xf32>
      %104 = vector.multi_reduction <maximumf>, %103, %cst_66 [1] : vector<8x8xf32> to vector<8xf32>
      %105 = vector.shape_cast %104 : vector<8xf32> to vector<8x1xf32>
      %106 = vector.broadcast %105 : vector<8x1xf32> to vector<8x8xf32>
      %107 = arith.subf %103, %106 : vector<8x8xf32>
      %108 = math.exp %107 : vector<8x8xf32>
      %cst_67 = arith.constant dense<0.000000e+00> : vector<8xf32>
      %109 = vector.multi_reduction <add>, %108, %cst_67 [1] : vector<8x8xf32> to vector<8xf32>
      %110 = vector.shape_cast %109 : vector<8xf32> to vector<8x1xf32>
      %111 = tpu.reciprocal %110 {approx = true} : vector<8x1xf32> -> vector<8x1xf32>
      %112 = vector.broadcast %111 : vector<8x1xf32> to vector<8x8xf32>
      %113 = arith.mulf %108, %112 : vector<8x8xf32>
      %114 = arith.truncf %113 : vector<8x8xf32> to vector<8x8xbf16>
      %cst_68 = arith.constant dense<0.000000e+00> : vector<8x32xf32>
      %115 = tpu.matmul %114, %102, %cst_68 {dimension_numbers = #tpu.dot_dimension_numbers<[1], [0], [0], [1], [0, 0, 1, 1], [], []>} : vector<8x8xbf16>, vector<8x32xbf16>, vector<8x32xf32> -> vector<8x32xf32>
      %116 = arith.truncf %115 : vector<8x32xf32> to vector<8x32xbf16>
      %117 = vector.extract_strided_slice %86 {offsets = [0, 0], sizes = [32, 128], strides = [1, 1]} : vector<128x128xbf16> to vector<32x128xbf16>
      %cst_69 = arith.constant dense<0.000000e+00> : vector<8x128xf32>
      %118 = tpu.matmul %116, %117, %cst_69 {dimension_numbers = #tpu.dot_dimension_numbers<[1], [0], [0], [1], [0, 0, 1, 1], [], []>} : vector<8x32xbf16>, vector<32x128xbf16>, vector<8x128xf32> -> vector<8x128xf32>
      %119 = vector.extract_strided_slice %94 {offsets = [0, 32], sizes = [8, 32], strides = [1, 1]} : vector<8x384xf32> to vector<8x32xf32>
      %cst_70 = arith.constant 0.176776692 : f32
      %120 = vector.broadcast %cst_70 : f32 to vector<8x32xf32>
      %121 = arith.mulf %119, %120 : vector<8x32xf32>
      %122 = arith.truncf %121 : vector<8x32xf32> to vector<8x32xbf16>
      %123 = vector.extract_strided_slice %94 {offsets = [0, 160], sizes = [8, 32], strides = [1, 1]} : vector<8x384xf32> to vector<8x32xf32>
      %124 = arith.truncf %123 : vector<8x32xf32> to vector<8x32xbf16>
      %125 = vector.extract_strided_slice %94 {offsets = [0, 288], sizes = [8, 32], strides = [1, 1]} : vector<8x384xf32> to vector<8x32xf32>
      %126 = arith.truncf %125 : vector<8x32xf32> to vector<8x32xbf16>
      %cst_71 = arith.constant dense<0.000000e+00> : vector<8x8xf32>
      %127 = tpu.matmul %122, %124, %cst_71 {dimension_numbers = #tpu.dot_dimension_numbers<[1], [1], [0], [0], [0, 0, 1, 0], [], []>} : vector<8x32xbf16>, vector<8x32xbf16>, vector<8x8xf32> -> vector<8x8xf32>
      %cst_72 = arith.constant dense<0xFF800000> : vector<8xf32>
      %128 = vector.multi_reduction <maximumf>, %127, %cst_72 [1] : vector<8x8xf32> to vector<8xf32>
      %129 = vector.shape_cast %128 : vector<8xf32> to vector<8x1xf32>
      %130 = vector.broadcast %129 : vector<8x1xf32> to vector<8x8xf32>
      %131 = arith.subf %127, %130 : vector<8x8xf32>
      %132 = math.exp %131 : vector<8x8xf32>
      %cst_73 = arith.constant dense<0.000000e+00> : vector<8xf32>
      %133 = vector.multi_reduction <add>, %132, %cst_73 [1] : vector<8x8xf32> to vector<8xf32>
      %134 = vector.shape_cast %133 : vector<8xf32> to vector<8x1xf32>
      %135 = tpu.reciprocal %134 {approx = true} : vector<8x1xf32> -> vector<8x1xf32>
      %136 = vector.broadcast %135 : vector<8x1xf32> to vector<8x8xf32>
      %137 = arith.mulf %132, %136 : vector<8x8xf32>
      %138 = arith.truncf %137 : vector<8x8xf32> to vector<8x8xbf16>
      %cst_74 = arith.constant dense<0.000000e+00> : vector<8x32xf32>
      %139 = tpu.matmul %138, %126, %cst_74 {dimension_numbers = #tpu.dot_dimension_numbers<[1], [0], [0], [1], [0, 0, 1, 1], [], []>} : vector<8x8xbf16>, vector<8x32xbf16>, vector<8x32xf32> -> vector<8x32xf32>
      %140 = arith.truncf %139 : vector<8x32xf32> to vector<8x32xbf16>
      %141 = vector.extract_strided_slice %86 {offsets = [32, 0], sizes = [32, 128], strides = [1, 1]} : vector<128x128xbf16> to vector<32x128xbf16>
      %cst_75 = arith.constant dense<0.000000e+00> : vector<8x128xf32>
      %142 = tpu.matmul %140, %141, %cst_75 {dimension_numbers = #tpu.dot_dimension_numbers<[1], [0], [0], [1], [0, 0, 1, 1], [], []>} : vector<8x32xbf16>, vector<32x128xbf16>, vector<8x128xf32> -> vector<8x128xf32>
      %143 = arith.addf %118, %142 : vector<8x128xf32>
      %144 = vector.extract_strided_slice %94 {offsets = [0, 64], sizes = [8, 32], strides = [1, 1]} : vector<8x384xf32> to vector<8x32xf32>
      %cst_76 = arith.constant 0.176776692 : f32
      %145 = vector.broadcast %cst_76 : f32 to vector<8x32xf32>
      %146 = arith.mulf %144, %145 : vector<8x32xf32>
      %147 = arith.truncf %146 : vector<8x32xf32> to vector<8x32xbf16>
      %148 = vector.extract_strided_slice %94 {offsets = [0, 192], sizes = [8, 32], strides = [1, 1]} : vector<8x384xf32> to vector<8x32xf32>
      %149 = arith.truncf %148 : vector<8x32xf32> to vector<8x32xbf16>
      %150 = vector.extract_strided_slice %94 {offsets = [0, 320], sizes = [8, 32], strides = [1, 1]} : vector<8x384xf32> to vector<8x32xf32>
      %151 = arith.truncf %150 : vector<8x32xf32> to vector<8x32xbf16>
      %cst_77 = arith.constant dense<0.000000e+00> : vector<8x8xf32>
      %152 = tpu.matmul %147, %149, %cst_77 {dimension_numbers = #tpu.dot_dimension_numbers<[1], [1], [0], [0], [0, 0, 1, 0], [], []>} : vector<8x32xbf16>, vector<8x32xbf16>, vector<8x8xf32> -> vector<8x8xf32>
      %cst_78 = arith.constant dense<0xFF800000> : vector<8xf32>
      %153 = vector.multi_reduction <maximumf>, %152, %cst_78 [1] : vector<8x8xf32> to vector<8xf32>
      %154 = vector.shape_cast %153 : vector<8xf32> to vector<8x1xf32>
      %155 = vector.broadcast %154 : vector<8x1xf32> to vector<8x8xf32>
      %156 = arith.subf %152, %155 : vector<8x8xf32>
      %157 = math.exp %156 : vector<8x8xf32>
      %cst_79 = arith.constant dense<0.000000e+00> : vector<8xf32>
      %158 = vector.multi_reduction <add>, %157, %cst_79 [1] : vector<8x8xf32> to vector<8xf32>
      %159 = vector.shape_cast %158 : vector<8xf32> to vector<8x1xf32>
      %160 = tpu.reciprocal %159 {approx = true} : vector<8x1xf32> -> vector<8x1xf32>
      %161 = vector.broadcast %160 : vector<8x1xf32> to vector<8x8xf32>
      %162 = arith.mulf %157, %161 : vector<8x8xf32>
      %163 = arith.truncf %162 : vector<8x8xf32> to vector<8x8xbf16>
      %cst_80 = arith.constant dense<0.000000e+00> : vector<8x32xf32>
      %164 = tpu.matmul %163, %151, %cst_80 {dimension_numbers = #tpu.dot_dimension_numbers<[1], [0], [0], [1], [0, 0, 1, 1], [], []>} : vector<8x8xbf16>, vector<8x32xbf16>, vector<8x32xf32> -> vector<8x32xf32>
      %165 = arith.truncf %164 : vector<8x32xf32> to vector<8x32xbf16>
      %166 = vector.extract_strided_slice %86 {offsets = [64, 0], sizes = [32, 128], strides = [1, 1]} : vector<128x128xbf16> to vector<32x128xbf16>
      %cst_81 = arith.constant dense<0.000000e+00> : vector<8x128xf32>
      %167 = tpu.matmul %165, %166, %cst_81 {dimension_numbers = #tpu.dot_dimension_numbers<[1], [0], [0], [1], [0, 0, 1, 1], [], []>} : vector<8x32xbf16>, vector<32x128xbf16>, vector<8x128xf32> -> vector<8x128xf32>
      %168 = arith.addf %143, %167 : vector<8x128xf32>
      %169 = vector.extract_strided_slice %94 {offsets = [0, 96], sizes = [8, 32], strides = [1, 1]} : vector<8x384xf32> to vector<8x32xf32>
      %cst_82 = arith.constant 0.176776692 : f32
      %170 = vector.broadcast %cst_82 : f32 to vector<8x32xf32>
      %171 = arith.mulf %169, %170 : vector<8x32xf32>
      %172 = arith.truncf %171 : vector<8x32xf32> to vector<8x32xbf16>
      %173 = vector.extract_strided_slice %94 {offsets = [0, 224], sizes = [8, 32], strides = [1, 1]} : vector<8x384xf32> to vector<8x32xf32>
      %174 = arith.truncf %173 : vector<8x32xf32> to vector<8x32xbf16>
      %175 = vector.extract_strided_slice %94 {offsets = [0, 352], sizes = [8, 32], strides = [1, 1]} : vector<8x384xf32> to vector<8x32xf32>
      %176 = arith.truncf %175 : vector<8x32xf32> to vector<8x32xbf16>
      %cst_83 = arith.constant dense<0.000000e+00> : vector<8x8xf32>
      %177 = tpu.matmul %172, %174, %cst_83 {dimension_numbers = #tpu.dot_dimension_numbers<[1], [1], [0], [0], [0, 0, 1, 0], [], []>} : vector<8x32xbf16>, vector<8x32xbf16>, vector<8x8xf32> -> vector<8x8xf32>
      %cst_84 = arith.constant dense<0xFF800000> : vector<8xf32>
      %178 = vector.multi_reduction <maximumf>, %177, %cst_84 [1] : vector<8x8xf32> to vector<8xf32>
      %179 = vector.shape_cast %178 : vector<8xf32> to vector<8x1xf32>
      %180 = vector.broadcast %179 : vector<8x1xf32> to vector<8x8xf32>
      %181 = arith.subf %177, %180 : vector<8x8xf32>
      %182 = math.exp %181 : vector<8x8xf32>
      %cst_85 = arith.constant dense<0.000000e+00> : vector<8xf32>
      %183 = vector.multi_reduction <add>, %182, %cst_85 [1] : vector<8x8xf32> to vector<8xf32>
      %184 = vector.shape_cast %183 : vector<8xf32> to vector<8x1xf32>
      %185 = tpu.reciprocal %184 {approx = true} : vector<8x1xf32> -> vector<8x1xf32>
      %186 = vector.broadcast %185 : vector<8x1xf32> to vector<8x8xf32>
      %187 = arith.mulf %182, %186 : vector<8x8xf32>
      %188 = arith.truncf %187 : vector<8x8xf32> to vector<8x8xbf16>
      %cst_86 = arith.constant dense<0.000000e+00> : vector<8x32xf32>
      %189 = tpu.matmul %188, %176, %cst_86 {dimension_numbers = #tpu.dot_dimension_numbers<[1], [0], [0], [1], [0, 0, 1, 1], [], []>} : vector<8x8xbf16>, vector<8x32xbf16>, vector<8x32xf32> -> vector<8x32xf32>
      %190 = arith.truncf %189 : vector<8x32xf32> to vector<8x32xbf16>
      %191 = vector.extract_strided_slice %86 {offsets = [96, 0], sizes = [32, 128], strides = [1, 1]} : vector<128x128xbf16> to vector<32x128xbf16>
      %cst_87 = arith.constant dense<0.000000e+00> : vector<8x128xf32>
      %192 = tpu.matmul %190, %191, %cst_87 {dimension_numbers = #tpu.dot_dimension_numbers<[1], [0], [0], [1], [0, 0, 1, 1], [], []>} : vector<8x32xbf16>, vector<32x128xbf16>, vector<8x128xf32> -> vector<8x128xf32>
      %193 = arith.addf %168, %192 : vector<8x128xf32>
      %194 = vector.extract_strided_slice %93 {offsets = [8, 0], sizes = [8, 384], strides = [1, 1]} : vector<16x384xf32> to vector<8x384xf32>
      %195 = vector.extract_strided_slice %194 {offsets = [0, 0], sizes = [8, 32], strides = [1, 1]} : vector<8x384xf32> to vector<8x32xf32>
      %cst_88 = arith.constant 0.176776692 : f32
      %196 = vector.broadcast %cst_88 : f32 to vector<8x32xf32>
      %197 = arith.mulf %195, %196 : vector<8x32xf32>
      %198 = arith.truncf %197 : vector<8x32xf32> to vector<8x32xbf16>
      %199 = vector.extract_strided_slice %194 {offsets = [0, 128], sizes = [8, 32], strides = [1, 1]} : vector<8x384xf32> to vector<8x32xf32>
      %200 = arith.truncf %199 : vector<8x32xf32> to vector<8x32xbf16>
      %201 = vector.extract_strided_slice %194 {offsets = [0, 256], sizes = [8, 32], strides = [1, 1]} : vector<8x384xf32> to vector<8x32xf32>
      %202 = arith.truncf %201 : vector<8x32xf32> to vector<8x32xbf16>
      %cst_89 = arith.constant dense<0.000000e+00> : vector<8x8xf32>
      %203 = tpu.matmul %198, %200, %cst_89 {dimension_numbers = #tpu.dot_dimension_numbers<[1], [1], [0], [0], [0, 0, 1, 0], [], []>} : vector<8x32xbf16>, vector<8x32xbf16>, vector<8x8xf32> -> vector<8x8xf32>
      %cst_90 = arith.constant dense<0xFF800000> : vector<8xf32>
      %204 = vector.multi_reduction <maximumf>, %203, %cst_90 [1] : vector<8x8xf32> to vector<8xf32>
      %205 = vector.shape_cast %204 : vector<8xf32> to vector<8x1xf32>
      %206 = vector.broadcast %205 : vector<8x1xf32> to vector<8x8xf32>
      %207 = arith.subf %203, %206 : vector<8x8xf32>
      %208 = math.exp %207 : vector<8x8xf32>
      %cst_91 = arith.constant dense<0.000000e+00> : vector<8xf32>
      %209 = vector.multi_reduction <add>, %208, %cst_91 [1] : vector<8x8xf32> to vector<8xf32>
      %210 = vector.shape_cast %209 : vector<8xf32> to vector<8x1xf32>
      %211 = tpu.reciprocal %210 {approx = true} : vector<8x1xf32> -> vector<8x1xf32>
      %212 = vector.broadcast %211 : vector<8x1xf32> to vector<8x8xf32>
      %213 = arith.mulf %208, %212 : vector<8x8xf32>
      %214 = arith.truncf %213 : vector<8x8xf32> to vector<8x8xbf16>
      %cst_92 = arith.constant dense<0.000000e+00> : vector<8x32xf32>
      %215 = tpu.matmul %214, %202, %cst_92 {dimension_numbers = #tpu.dot_dimension_numbers<[1], [0], [0], [1], [0, 0, 1, 1], [], []>} : vector<8x8xbf16>, vector<8x32xbf16>, vector<8x32xf32> -> vector<8x32xf32>
      %216 = arith.truncf %215 : vector<8x32xf32> to vector<8x32xbf16>
      %217 = vector.extract_strided_slice %86 {offsets = [0, 0], sizes = [32, 128], strides = [1, 1]} : vector<128x128xbf16> to vector<32x128xbf16>
      %cst_93 = arith.constant dense<0.000000e+00> : vector<8x128xf32>
      %218 = tpu.matmul %216, %217, %cst_93 {dimension_numbers = #tpu.dot_dimension_numbers<[1], [0], [0], [1], [0, 0, 1, 1], [], []>} : vector<8x32xbf16>, vector<32x128xbf16>, vector<8x128xf32> -> vector<8x128xf32>
      %219 = vector.extract_strided_slice %194 {offsets = [0, 32], sizes = [8, 32], strides = [1, 1]} : vector<8x384xf32> to vector<8x32xf32>
      %cst_94 = arith.constant 0.176776692 : f32
      %220 = vector.broadcast %cst_94 : f32 to vector<8x32xf32>
      %221 = arith.mulf %219, %220 : vector<8x32xf32>
      %222 = arith.truncf %221 : vector<8x32xf32> to vector<8x32xbf16>
      %223 = vector.extract_strided_slice %194 {offsets = [0, 160], sizes = [8, 32], strides = [1, 1]} : vector<8x384xf32> to vector<8x32xf32>
      %224 = arith.truncf %223 : vector<8x32xf32> to vector<8x32xbf16>
      %225 = vector.extract_strided_slice %194 {offsets = [0, 288], sizes = [8, 32], strides = [1, 1]} : vector<8x384xf32> to vector<8x32xf32>
      %226 = arith.truncf %225 : vector<8x32xf32> to vector<8x32xbf16>
      %cst_95 = arith.constant dense<0.000000e+00> : vector<8x8xf32>
      %227 = tpu.matmul %222, %224, %cst_95 {dimension_numbers = #tpu.dot_dimension_numbers<[1], [1], [0], [0], [0, 0, 1, 0], [], []>} : vector<8x32xbf16>, vector<8x32xbf16>, vector<8x8xf32> -> vector<8x8xf32>
      %cst_96 = arith.constant dense<0xFF800000> : vector<8xf32>
      %228 = vector.multi_reduction <maximumf>, %227, %cst_96 [1] : vector<8x8xf32> to vector<8xf32>
      %229 = vector.shape_cast %228 : vector<8xf32> to vector<8x1xf32>
      %230 = vector.broadcast %229 : vector<8x1xf32> to vector<8x8xf32>
      %231 = arith.subf %227, %230 : vector<8x8xf32>
      %232 = math.exp %231 : vector<8x8xf32>
      %cst_97 = arith.constant dense<0.000000e+00> : vector<8xf32>
      %233 = vector.multi_reduction <add>, %232, %cst_97 [1] : vector<8x8xf32> to vector<8xf32>
      %234 = vector.shape_cast %233 : vector<8xf32> to vector<8x1xf32>
      %235 = tpu.reciprocal %234 {approx = true} : vector<8x1xf32> -> vector<8x1xf32>
      %236 = vector.broadcast %235 : vector<8x1xf32> to vector<8x8xf32>
      %237 = arith.mulf %232, %236 : vector<8x8xf32>
      %238 = arith.truncf %237 : vector<8x8xf32> to vector<8x8xbf16>
      %cst_98 = arith.constant dense<0.000000e+00> : vector<8x32xf32>
      %239 = tpu.matmul %238, %226, %cst_98 {dimension_numbers = #tpu.dot_dimension_numbers<[1], [0], [0], [1], [0, 0, 1, 1], [], []>} : vector<8x8xbf16>, vector<8x32xbf16>, vector<8x32xf32> -> vector<8x32xf32>
      %240 = arith.truncf %239 : vector<8x32xf32> to vector<8x32xbf16>
      %241 = vector.extract_strided_slice %86 {offsets = [32, 0], sizes = [32, 128], strides = [1, 1]} : vector<128x128xbf16> to vector<32x128xbf16>
      %cst_99 = arith.constant dense<0.000000e+00> : vector<8x128xf32>
      %242 = tpu.matmul %240, %241, %cst_99 {dimension_numbers = #tpu.dot_dimension_numbers<[1], [0], [0], [1], [0, 0, 1, 1], [], []>} : vector<8x32xbf16>, vector<32x128xbf16>, vector<8x128xf32> -> vector<8x128xf32>
      %243 = arith.addf %218, %242 : vector<8x128xf32>
      %244 = vector.extract_strided_slice %194 {offsets = [0, 64], sizes = [8, 32], strides = [1, 1]} : vector<8x384xf32> to vector<8x32xf32>
      %cst_100 = arith.constant 0.176776692 : f32
      %245 = vector.broadcast %cst_100 : f32 to vector<8x32xf32>
      %246 = arith.mulf %244, %245 : vector<8x32xf32>
      %247 = arith.truncf %246 : vector<8x32xf32> to vector<8x32xbf16>
      %248 = vector.extract_strided_slice %194 {offsets = [0, 192], sizes = [8, 32], strides = [1, 1]} : vector<8x384xf32> to vector<8x32xf32>
      %249 = arith.truncf %248 : vector<8x32xf32> to vector<8x32xbf16>
      %250 = vector.extract_strided_slice %194 {offsets = [0, 320], sizes = [8, 32], strides = [1, 1]} : vector<8x384xf32> to vector<8x32xf32>
      %251 = arith.truncf %250 : vector<8x32xf32> to vector<8x32xbf16>
      %cst_101 = arith.constant dense<0.000000e+00> : vector<8x8xf32>
      %252 = tpu.matmul %247, %249, %cst_101 {dimension_numbers = #tpu.dot_dimension_numbers<[1], [1], [0], [0], [0, 0, 1, 0], [], []>} : vector<8x32xbf16>, vector<8x32xbf16>, vector<8x8xf32> -> vector<8x8xf32>
      %cst_102 = arith.constant dense<0xFF800000> : vector<8xf32>
      %253 = vector.multi_reduction <maximumf>, %252, %cst_102 [1] : vector<8x8xf32> to vector<8xf32>
      %254 = vector.shape_cast %253 : vector<8xf32> to vector<8x1xf32>
      %255 = vector.broadcast %254 : vector<8x1xf32> to vector<8x8xf32>
      %256 = arith.subf %252, %255 : vector<8x8xf32>
      %257 = math.exp %256 : vector<8x8xf32>
      %cst_103 = arith.constant dense<0.000000e+00> : vector<8xf32>
      %258 = vector.multi_reduction <add>, %257, %cst_103 [1] : vector<8x8xf32> to vector<8xf32>
      %259 = vector.shape_cast %258 : vector<8xf32> to vector<8x1xf32>
      %260 = tpu.reciprocal %259 {approx = true} : vector<8x1xf32> -> vector<8x1xf32>
      %261 = vector.broadcast %260 : vector<8x1xf32> to vector<8x8xf32>
      %262 = arith.mulf %257, %261 : vector<8x8xf32>
      %263 = arith.truncf %262 : vector<8x8xf32> to vector<8x8xbf16>
      %cst_104 = arith.constant dense<0.000000e+00> : vector<8x32xf32>
      %264 = tpu.matmul %263, %251, %cst_104 {dimension_numbers = #tpu.dot_dimension_numbers<[1], [0], [0], [1], [0, 0, 1, 1], [], []>} : vector<8x8xbf16>, vector<8x32xbf16>, vector<8x32xf32> -> vector<8x32xf32>
      %265 = arith.truncf %264 : vector<8x32xf32> to vector<8x32xbf16>
      %266 = vector.extract_strided_slice %86 {offsets = [64, 0], sizes = [32, 128], strides = [1, 1]} : vector<128x128xbf16> to vector<32x128xbf16>
      %cst_105 = arith.constant dense<0.000000e+00> : vector<8x128xf32>
      %267 = tpu.matmul %265, %266, %cst_105 {dimension_numbers = #tpu.dot_dimension_numbers<[1], [0], [0], [1], [0, 0, 1, 1], [], []>} : vector<8x32xbf16>, vector<32x128xbf16>, vector<8x128xf32> -> vector<8x128xf32>
      %268 = arith.addf %243, %267 : vector<8x128xf32>
      %269 = vector.extract_strided_slice %194 {offsets = [0, 96], sizes = [8, 32], strides = [1, 1]} : vector<8x384xf32> to vector<8x32xf32>
      %cst_106 = arith.constant 0.176776692 : f32
      %270 = vector.broadcast %cst_106 : f32 to vector<8x32xf32>
      %271 = arith.mulf %269, %270 : vector<8x32xf32>
      %272 = arith.truncf %271 : vector<8x32xf32> to vector<8x32xbf16>
      %273 = vector.extract_strided_slice %194 {offsets = [0, 224], sizes = [8, 32], strides = [1, 1]} : vector<8x384xf32> to vector<8x32xf32>
      %274 = arith.truncf %273 : vector<8x32xf32> to vector<8x32xbf16>
      %275 = vector.extract_strided_slice %194 {offsets = [0, 352], sizes = [8, 32], strides = [1, 1]} : vector<8x384xf32> to vector<8x32xf32>
      %276 = arith.truncf %275 : vector<8x32xf32> to vector<8x32xbf16>
      %cst_107 = arith.constant dense<0.000000e+00> : vector<8x8xf32>
      %277 = tpu.matmul %272, %274, %cst_107 {dimension_numbers = #tpu.dot_dimension_numbers<[1], [1], [0], [0], [0, 0, 1, 0], [], []>} : vector<8x32xbf16>, vector<8x32xbf16>, vector<8x8xf32> -> vector<8x8xf32>
      %cst_108 = arith.constant dense<0xFF800000> : vector<8xf32>
      %278 = vector.multi_reduction <maximumf>, %277, %cst_108 [1] : vector<8x8xf32> to vector<8xf32>
      %279 = vector.shape_cast %278 : vector<8xf32> to vector<8x1xf32>
      %280 = vector.broadcast %279 : vector<8x1xf32> to vector<8x8xf32>
      %281 = arith.subf %277, %280 : vector<8x8xf32>
      %282 = math.exp %281 : vector<8x8xf32>
      %cst_109 = arith.constant dense<0.000000e+00> : vector<8xf32>
      %283 = vector.multi_reduction <add>, %282, %cst_109 [1] : vector<8x8xf32> to vector<8xf32>
      %284 = vector.shape_cast %283 : vector<8xf32> to vector<8x1xf32>
      %285 = tpu.reciprocal %284 {approx = true} : vector<8x1xf32> -> vector<8x1xf32>
      %286 = vector.broadcast %285 : vector<8x1xf32> to vector<8x8xf32>
      %287 = arith.mulf %282, %286 : vector<8x8xf32>
      %288 = arith.truncf %287 : vector<8x8xf32> to vector<8x8xbf16>
      %cst_110 = arith.constant dense<0.000000e+00> : vector<8x32xf32>
      %289 = tpu.matmul %288, %276, %cst_110 {dimension_numbers = #tpu.dot_dimension_numbers<[1], [0], [0], [1], [0, 0, 1, 1], [], []>} : vector<8x8xbf16>, vector<8x32xbf16>, vector<8x32xf32> -> vector<8x32xf32>
      %290 = arith.truncf %289 : vector<8x32xf32> to vector<8x32xbf16>
      %291 = vector.extract_strided_slice %86 {offsets = [96, 0], sizes = [32, 128], strides = [1, 1]} : vector<128x128xbf16> to vector<32x128xbf16>
      %cst_111 = arith.constant dense<0.000000e+00> : vector<8x128xf32>
      %292 = tpu.matmul %290, %291, %cst_111 {dimension_numbers = #tpu.dot_dimension_numbers<[1], [0], [0], [1], [0, 0, 1, 1], [], []>} : vector<8x32xbf16>, vector<32x128xbf16>, vector<8x128xf32> -> vector<8x128xf32>
      %293 = arith.addf %268, %292 : vector<8x128xf32>
      %294 = tpu.concatenate %193, %293 in 0 : vector<8x128xf32>, vector<8x128xf32> -> vector<16x128xf32>
      %295 = arith.index_cast %arg30 : i32 to index
      %c0_112 = arith.constant 0 : index
      %c0_113 = arith.constant 0 : index
      %296 = vector.load %arg20[%295, %c0_112, %c0_113] : memref<4x1x128xf32, #tpu.memory_space<vmem>>, vector<1x1x128xf32>
      %297 = vector.shape_cast %296 : vector<1x1x128xf32> to vector<1x128xf32>
      %298 = vector.broadcast %297 : vector<1x128xf32> to vector<16x128xf32>
      %299 = arith.addf %294, %298 : vector<16x128xf32>
      %300 = arith.addf %arg31, %299 : vector<16x128xf32>
      %301 = arith.index_cast %arg30 : i32 to index
      %c0_114 = arith.constant 0 : index
      %c0_115 = arith.constant 0 : index
      %302 = vector.load %arg21[%301, %c0_114, %c0_115] : memref<4x1x128xf32, #tpu.memory_space<vmem>>, vector<1x1x128xf32>
      %303 = vector.shape_cast %302 : vector<1x1x128xf32> to vector<1x128xf32>
      %304 = arith.index_cast %arg30 : i32 to index
      %c0_116 = arith.constant 0 : index
      %c0_117 = arith.constant 0 : index
      %305 = vector.load %arg22[%304, %c0_116, %c0_117] : memref<4x1x128xf32, #tpu.memory_space<vmem>>, vector<1x1x128xf32>
      %306 = vector.shape_cast %305 : vector<1x1x128xf32> to vector<1x128xf32>
      %cst_118 = arith.constant dense<0.000000e+00> : vector<16xf32>
      %307 = vector.multi_reduction <add>, %300, %cst_118 [1] : vector<16x128xf32> to vector<16xf32>
      %308 = vector.shape_cast %307 : vector<16xf32> to vector<16x1xf32>
      %cst_119 = arith.constant 1.280000e+02 : f32
      %309 = vector.broadcast %cst_119 : f32 to vector<16x1xf32>
      %310 = arith.divf %308, %309 : vector<16x1xf32>
      %311 = vector.broadcast %310 : vector<16x1xf32> to vector<16x128xf32>
      %312 = arith.subf %300, %311 : vector<16x128xf32>
      %313 = arith.mulf %312, %312 : vector<16x128xf32>
      %cst_120 = arith.constant dense<0.000000e+00> : vector<16xf32>
      %314 = vector.multi_reduction <add>, %313, %cst_120 [1] : vector<16x128xf32> to vector<16xf32>
      %315 = vector.shape_cast %314 : vector<16xf32> to vector<16x1xf32>
      %cst_121 = arith.constant 1.280000e+02 : f32
      %316 = vector.broadcast %cst_121 : f32 to vector<16x1xf32>
      %317 = arith.divf %315, %316 : vector<16x1xf32>
      %318 = vector.broadcast %310 : vector<16x1xf32> to vector<16x128xf32>
      %319 = arith.subf %300, %318 : vector<16x128xf32>
      %cst_122 = arith.constant 9.99999974E-6 : f32
      %320 = vector.broadcast %cst_122 : f32 to vector<16x1xf32>
      %321 = arith.addf %317, %320 : vector<16x1xf32>
      %322 = math.rsqrt %321 : vector<16x1xf32>
      %323 = vector.broadcast %322 : vector<16x1xf32> to vector<16x128xf32>
      %324 = arith.mulf %319, %323 : vector<16x128xf32>
      %325 = vector.broadcast %303 : vector<1x128xf32> to vector<16x128xf32>
      %326 = arith.mulf %324, %325 : vector<16x128xf32>
      %327 = vector.broadcast %306 : vector<1x128xf32> to vector<16x128xf32>
      %328 = arith.addf %326, %327 : vector<16x128xf32>
      %329 = arith.truncf %328 : vector<16x128xf32> to vector<16x128xbf16>
      %330 = arith.index_cast %arg30 : i32 to index
      %c0_123 = arith.constant 0 : index
      %c0_124 = arith.constant 0 : index
      %331 = vector.load %arg23[%330, %c0_123, %c0_124] : memref<4x128x256xbf16, #tpu.memory_space<vmem>>, vector<1x128x256xbf16>
      %332 = vector.shape_cast %331 : vector<1x128x256xbf16> to vector<128x256xbf16>
      %cst_125 = arith.constant dense<0.000000e+00> : vector<16x256xf32>
      %333 = tpu.matmul %329, %332, %cst_125 {dimension_numbers = #tpu.dot_dimension_numbers<[1], [0], [0], [1], [0, 0, 1, 1], [], []>} : vector<16x128xbf16>, vector<128x256xbf16>, vector<16x256xf32> -> vector<16x256xf32>
      %334 = arith.index_cast %arg30 : i32 to index
      %c0_126 = arith.constant 0 : index
      %c0_127 = arith.constant 0 : index
      %335 = vector.load %arg24[%334, %c0_126, %c0_127] : memref<4x1x256xf32, #tpu.memory_space<vmem>>, vector<1x1x256xf32>
      %336 = vector.shape_cast %335 : vector<1x1x256xf32> to vector<1x256xf32>
      %337 = vector.broadcast %336 : vector<1x256xf32> to vector<16x256xf32>
      %338 = arith.addf %333, %337 : vector<16x256xf32>
      %cst_128 = arith.constant 0.000000e+00 : f32
      %339 = vector.broadcast %cst_128 : f32 to vector<16x256xf32>
      %340 = arith.maximumf %338, %339 : vector<16x256xf32>
      %341 = arith.truncf %340 : vector<16x256xf32> to vector<16x256xbf16>
      %342 = arith.index_cast %arg30 : i32 to index
      %c0_129 = arith.constant 0 : index
      %c0_130 = arith.constant 0 : index
      %343 = vector.load %arg25[%342, %c0_129, %c0_130] : memref<4x256x128xbf16, #tpu.memory_space<vmem>>, vector<1x256x128xbf16>
      %344 = vector.shape_cast %343 : vector<1x256x128xbf16> to vector<256x128xbf16>
      %cst_131 = arith.constant dense<0.000000e+00> : vector<16x128xf32>
      %345 = tpu.matmul %341, %344, %cst_131 {dimension_numbers = #tpu.dot_dimension_numbers<[1], [0], [0], [1], [0, 0, 1, 1], [], []>} : vector<16x256xbf16>, vector<256x128xbf16>, vector<16x128xf32> -> vector<16x128xf32>
      %346 = arith.index_cast %arg30 : i32 to index
      %c0_132 = arith.constant 0 : index
      %c0_133 = arith.constant 0 : index
      %347 = vector.load %arg26[%346, %c0_132, %c0_133] : memref<4x1x128xf32, #tpu.memory_space<vmem>>, vector<1x1x128xf32>
      %348 = vector.shape_cast %347 : vector<1x1x128xf32> to vector<1x128xf32>
      %349 = vector.broadcast %348 : vector<1x128xf32> to vector<16x128xf32>
      %350 = arith.addf %345, %349 : vector<16x128xf32>
      %351 = arith.addf %328, %350 : vector<16x128xf32>
      %352 = arith.index_cast %arg30 : i32 to index
      %c0_134 = arith.constant 0 : index
      %c0_135 = arith.constant 0 : index
      %353 = vector.load %arg27[%352, %c0_134, %c0_135] : memref<4x1x128xf32, #tpu.memory_space<vmem>>, vector<1x1x128xf32>
      %354 = vector.shape_cast %353 : vector<1x1x128xf32> to vector<1x128xf32>
      %355 = arith.index_cast %arg30 : i32 to index
      %c0_136 = arith.constant 0 : index
      %c0_137 = arith.constant 0 : index
      %356 = vector.load %arg28[%355, %c0_136, %c0_137] : memref<4x1x128xf32, #tpu.memory_space<vmem>>, vector<1x1x128xf32>
      %357 = vector.shape_cast %356 : vector<1x1x128xf32> to vector<1x128xf32>
      %cst_138 = arith.constant dense<0.000000e+00> : vector<16xf32>
      %358 = vector.multi_reduction <add>, %351, %cst_138 [1] : vector<16x128xf32> to vector<16xf32>
      %359 = vector.shape_cast %358 : vector<16xf32> to vector<16x1xf32>
      %cst_139 = arith.constant 1.280000e+02 : f32
      %360 = vector.broadcast %cst_139 : f32 to vector<16x1xf32>
      %361 = arith.divf %359, %360 : vector<16x1xf32>
      %362 = vector.broadcast %361 : vector<16x1xf32> to vector<16x128xf32>
      %363 = arith.subf %351, %362 : vector<16x128xf32>
      %364 = arith.mulf %363, %363 : vector<16x128xf32>
      %cst_140 = arith.constant dense<0.000000e+00> : vector<16xf32>
      %365 = vector.multi_reduction <add>, %364, %cst_140 [1] : vector<16x128xf32> to vector<16xf32>
      %366 = vector.shape_cast %365 : vector<16xf32> to vector<16x1xf32>
      %cst_141 = arith.constant 1.280000e+02 : f32
      %367 = vector.broadcast %cst_141 : f32 to vector<16x1xf32>
      %368 = arith.divf %366, %367 : vector<16x1xf32>
      %369 = vector.broadcast %361 : vector<16x1xf32> to vector<16x128xf32>
      %370 = arith.subf %351, %369 : vector<16x128xf32>
      %cst_142 = arith.constant 9.99999974E-6 : f32
      %371 = vector.broadcast %cst_142 : f32 to vector<16x1xf32>
      %372 = arith.addf %368, %371 : vector<16x1xf32>
      %373 = math.rsqrt %372 : vector<16x1xf32>
      %374 = vector.broadcast %373 : vector<16x1xf32> to vector<16x128xf32>
      %375 = arith.mulf %370, %374 : vector<16x128xf32>
      %376 = vector.broadcast %354 : vector<1x128xf32> to vector<16x128xf32>
      %377 = arith.mulf %375, %376 : vector<16x128xf32>
      %378 = vector.broadcast %357 : vector<1x128xf32> to vector<16x128xf32>
      %379 = arith.addf %377, %378 : vector<16x128xf32>
      scf.yield %379 : vector<16x128xf32>
    }
    %c4_i32_54 = arith.constant 4 : i32
    %c0_55 = arith.constant 0 : index
    %c0_56 = arith.constant 0 : index
    %80 = vector.load %arg29[%c0_55, %c0_56] : memref<16x128xf32, #tpu.memory_space<vmem>>, vector<16x128xf32>
    tpu.vector_store %arg29[%c0_55, %c0_56], %79 {strides = array<i32>} : memref<16x128xf32, #tpu.memory_space<vmem>>, vector<16x128xf32>,
    return
  }
  func.func @transform_0(%arg0: i32) -> (i32, i32) {
    %c0_i32 = arith.constant 0 : i32
    %c0_i32_0 = arith.constant 0 : i32
    %c0_i32_1 = arith.constant 0 : i32
    return %c0_i32, %c0_i32_0 : i32, i32
  }
  func.func @transform_1(%arg0: i32) -> (i32, i32) {
    %c0_i32 = arith.constant 0 : i32
    %c0_i32_0 = arith.constant 0 : i32
    %c0_i32_1 = arith.constant 0 : i32
    return %c0_i32, %c0_i32_0 : i32, i32
  }
  func.func @transform_2(%arg0: i32) -> (i32, i32) {
    %c0_i32 = arith.constant 0 : i32
    %c0_i32_0 = arith.constant 0 : i32
    %c0_i32_1 = arith.constant 0 : i32
    return %c0_i32, %c0_i32_0 : i32, i32
  }
  func.func @transform_3(%arg0: i32) -> (i32, i32) {
    %c0_i32 = arith.constant 0 : i32
    %c0_i32_0 = arith.constant 0 : i32
    %c0_i32_1 = arith.constant 0 : i32
    return %c0_i32, %c0_i32_0 : i32, i32
  }
  func.func @transform_4(%arg0: i32) -> (i32, i32) {
    %c0_i32 = arith.constant 0 : i32
    %c0_i32_0 = arith.constant 0 : i32
    %c0_i32_1 = arith.constant 0 : i32
    return %c0_i32, %c0_i32_0 : i32, i32
  }
  func.func @transform_5(%arg0: i32) -> (i32, i32) {
    %c0_i32 = arith.constant 0 : i32
    %c0_i32_0 = arith.constant 0 : i32
    %c0_i32_1 = arith.constant 0 : i32
    return %c0_i32, %c0_i32_0 : i32, i32
  }
  func.func @transform_6(%arg0: i32) -> (i32, i32, i32) {
    %c0_i32 = arith.constant 0 : i32
    %c0_i32_0 = arith.constant 0 : i32
    %c0_i32_1 = arith.constant 0 : i32
    %c0_i32_2 = arith.constant 0 : i32
    return %c0_i32, %c0_i32_0, %c0_i32_1 : i32, i32, i32
  }
  func.func @transform_7(%arg0: i32) -> (i32, i32, i32) {
    %c0_i32 = arith.constant 0 : i32
    %c0_i32_0 = arith.constant 0 : i32
    %c0_i32_1 = arith.constant 0 : i32
    %c0_i32_2 = arith.constant 0 : i32
    return %c0_i32, %c0_i32_0, %c0_i32_1 : i32, i32, i32
  }
  func.func @transform_8(%arg0: i32) -> (i32, i32, i32) {
    %c0_i32 = arith.constant 0 : i32
    %c0_i32_0 = arith.constant 0 : i32
    %c0_i32_1 = arith.constant 0 : i32
    %c0_i32_2 = arith.constant 0 : i32
    return %c0_i32, %c0_i32_0, %c0_i32_1 : i32, i32, i32
  }
  func.func @transform_9(%arg0: i32) -> (i32, i32, i32) {
    %c0_i32 = arith.constant 0 : i32
    %c0_i32_0 = arith.constant 0 : i32
    %c0_i32_1 = arith.constant 0 : i32
    %c0_i32_2 = arith.constant 0 : i32
    return %c0_i32, %c0_i32_0, %c0_i32_1 : i32, i32, i32
  }
  func.func @transform_10(%arg0: i32) -> (i32, i32, i32) {
    %c0_i32 = arith.constant 0 : i32
    %c0_i32_0 = arith.constant 0 : i32
    %c0_i32_1 = arith.constant 0 : i32
    %c0_i32_2 = arith.constant 0 : i32
    return %c0_i32, %c0_i32_0, %c0_i32_1 : i32, i32, i32
  }
  func.func @transform_11(%arg0: i32) -> (i32, i32, i32) {
    %c0_i32 = arith.constant 0 : i32
    %c0_i32_0 = arith.constant 0 : i32
    %c0_i32_1 = arith.constant 0 : i32
    %c0_i32_2 = arith.constant 0 : i32
    return %c0_i32, %c0_i32_0, %c0_i32_1 : i32, i32, i32
  }
  func.func @transform_12(%arg0: i32) -> (i32, i32) {
    %c0_i32 = arith.constant 0 : i32
    %c0_i32_0 = arith.constant 0 : i32
    %c0_i32_1 = arith.constant 0 : i32
    return %c0_i32, %c0_i32_0 : i32, i32
  }
  func.func @transform_13(%arg0: i32) -> (i32, i32) {
    %c0_i32 = arith.constant 0 : i32
    %c0_i32_0 = arith.constant 0 : i32
    %c0_i32_1 = arith.constant 0 : i32
    return %c0_i32, %c0_i32_0 : i32, i32
  }
  func.func @transform_14(%arg0: i32) -> (i32, i32) {
    %c0_i32 = arith.constant 0 : i32
    %c0_i32_0 = arith.constant 0 : i32
    %c0_i32_1 = arith.constant 0 : i32
    return %c0_i32, %c0_i32_0 : i32, i32
  }
  func.func @transform_15(%arg0: i32) -> (i32, i32) {
    %c0_i32 = arith.constant 0 : i32
    %c0_i32_0 = arith.constant 0 : i32
    %c0_i32_1 = arith.constant 0 : i32
    return %c0_i32, %c0_i32_0 : i32, i32
  }
  func.func @transform_16(%arg0: i32) -> (i32, i32, i32) {
    %c0_i32 = arith.constant 0 : i32
    %c0_i32_0 = arith.constant 0 : i32
    %c0_i32_1 = arith.constant 0 : i32
    %c0_i32_2 = arith.constant 0 : i32
    return %c0_i32, %c0_i32_0, %c0_i32_1 : i32, i32, i32
  }
  func.func @transform_17(%arg0: i32) -> (i32, i32, i32) {
    %c0_i32 = arith.constant 0 : i32
    %c0_i32_0 = arith.constant 0 : i32
    %c0_i32_1 = arith.constant 0 : i32
    %c0_i32_2 = arith.constant 0 : i32
    return %c0_i32, %c0_i32_0, %c0_i32_1 : i32, i32, i32
  }
  func.func @transform_18(%arg0: i32) -> (i32, i32, i32) {
    %c0_i32 = arith.constant 0 : i32
    %c0_i32_0 = arith.constant 0 : i32
    %c0_i32_1 = arith.constant 0 : i32
    %c0_i32_2 = arith.constant 0 : i32
    return %c0_i32, %c0_i32_0, %c0_i32_1 : i32, i32, i32
  }
  func.func @transform_19(%arg0: i32) -> (i32, i32, i32) {
    %c0_i32 = arith.constant 0 : i32
    %c0_i32_0 = arith.constant 0 : i32
    %c0_i32_1 = arith.constant 0 : i32
    %c0_i32_2 = arith.constant 0 : i32
    return %c0_i32, %c0_i32_0, %c0_i32_1 : i32, i32, i32
  }
  func.func @transform_20(%arg0: i32) -> (i32, i32, i32) {
    %c0_i32 = arith.constant 0 : i32
    %c0_i32_0 = arith.constant 0 : i32
    %c0_i32_1 = arith.constant 0 : i32
    %c0_i32_2 = arith.constant 0 : i32
    return %c0_i32, %c0_i32_0, %c0_i32_1 : i32, i32, i32
  }
  func.func @transform_21(%arg0: i32) -> (i32, i32, i32) {
    %c0_i32 = arith.constant 0 : i32
    %c0_i32_0 = arith.constant 0 : i32
    %c0_i32_1 = arith.constant 0 : i32
    %c0_i32_2 = arith.constant 0 : i32
    return %c0_i32, %c0_i32_0, %c0_i32_1 : i32, i32, i32
  }
  func.func @transform_22(%arg0: i32) -> (i32, i32, i32) {
    %c0_i32 = arith.constant 0 : i32
    %c0_i32_0 = arith.constant 0 : i32
    %c0_i32_1 = arith.constant 0 : i32
    %c0_i32_2 = arith.constant 0 : i32
    return %c0_i32, %c0_i32_0, %c0_i32_1 : i32, i32, i32
  }
  func.func @transform_23(%arg0: i32) -> (i32, i32, i32) {
    %c0_i32 = arith.constant 0 : i32
    %c0_i32_0 = arith.constant 0 : i32
    %c0_i32_1 = arith.constant 0 : i32
    %c0_i32_2 = arith.constant 0 : i32
    return %c0_i32, %c0_i32_0, %c0_i32_1 : i32, i32, i32
  }
  func.func @transform_24(%arg0: i32) -> (i32, i32, i32) {
    %c0_i32 = arith.constant 0 : i32
    %c0_i32_0 = arith.constant 0 : i32
    %c0_i32_1 = arith.constant 0 : i32
    %c0_i32_2 = arith.constant 0 : i32
    return %c0_i32, %c0_i32_0, %c0_i32_1 : i32, i32, i32
  }
  func.func @transform_25(%arg0: i32) -> (i32, i32, i32) {
    %c0_i32 = arith.constant 0 : i32
    %c0_i32_0 = arith.constant 0 : i32
    %c0_i32_1 = arith.constant 0 : i32
    %c0_i32_2 = arith.constant 0 : i32
    return %c0_i32, %c0_i32_0, %c0_i32_1 : i32, i32, i32
  }
  func.func @transform_26(%arg0: i32) -> (i32, i32, i32) {
    %c0_i32 = arith.constant 0 : i32
    %c0_i32_0 = arith.constant 0 : i32
    %c0_i32_1 = arith.constant 0 : i32
    %c0_i32_2 = arith.constant 0 : i32
    return %c0_i32, %c0_i32_0, %c0_i32_1 : i32, i32, i32
  }
  func.func @transform_27(%arg0: i32) -> (i32, i32, i32) {
    %c0_i32 = arith.constant 0 : i32
    %c0_i32_0 = arith.constant 0 : i32
    %c0_i32_1 = arith.constant 0 : i32
    %c0_i32_2 = arith.constant 0 : i32
    return %c0_i32, %c0_i32_0, %c0_i32_1 : i32, i32, i32
  }
  func.func @transform_28(%arg0: i32) -> (i32, i32) {
    %c0_i32 = arith.constant 0 : i32
    %c0_i32_0 = arith.constant 0 : i32
    %c0_i32_1 = arith.constant 0 : i32
    return %c0_i32, %c0_i32_0 : i32, i32
  }
}

</mosaic_0001>

<bundles_post_ra>
// kernel: tpu_custom_call.1
= control target key start
LH: loop header
LB: loop body
LE: loop exit
PB: predicated region body
PF: predicated region fallthrough
CT: control target
= control target key end

     0   :  { %s4729_s0 = inlined_call_operand.vmem [shape: f32[16,8], index: 0, kind: input, shape index: {}]   ;;  %s4730_s1 = inlined_call_operand.vmem [shape: f32[32,8], index: 1, kind: input, shape index: {}]   ;;  %s4731_s2 = inlined_call_operand.vmem [shape: bf16[32,16], index: 2, kind: input, shape index: {}]   ;;  %s4732_s3 = inlined_call_operand.vmem [shape: bf16[16,32], index: 3, kind: input, shape index: {}]   ;;  %s4733_s4 = inlined_call_operand.vmem [shape: bf16[8,128], index: 4, kind: input, shape index: {}]   ;;  %s4734_s5 = inlined_call_operand.hbm [shape: f32[1,128], index: 5, kind: input, shape index: {}]   ;;  %s4735_s6 = inlined_call_operand.vmem [shape: bf16[5,8,128], index: 6, kind: input, shape index: {}]   ;;  %s4736_s7 = inlined_call_operand.vmem [shape: f32[5,1,128], index: 7, kind: input, shape index: {}]   ;;  %s4737_s8 = inlined_call_operand.hbm [shape: bf16[5,128,256], index: 8, kind: input, shape index: {}]   ;;  %s4738_s9 = inlined_call_operand.vmem [shape: f32[5,1,256], index: 9, kind: input, shape index: {}]   ;;  %s4739_s10 = inlined_call_operand.hbm [shape: bf16[5,256,128], index: 10, kind: input, shape index: {}]   ;;  %s4740_s11 = inlined_call_operand.vmem [shape: f32[5,1,128], index: 11, kind: input, shape index: {}]   ;;  %s4741_s12 = inlined_call_operand.hbm [shape: bf16[128,128], index: 12, kind: input, shape index: {}]   ;;  %s4742_s13 = inlined_call_operand.hbm [shape: f32[1,128], index: 13, kind: input, shape index: {}]   ;;  %s4743_s14 = inlined_call_operand.hbm [shape: f32[1,128], index: 14, kind: input, shape index: {}]   ;;  %s4744_s15 = inlined_call_operand.hbm [shape: f32[1,128], index: 15, kind: input, shape index: {}]   ;;  %s4745_s16 = inlined_call_operand.hbm [shape: bf16[4,128,384], index: 16, kind: input, shape index: {}]   ;;  %s4746_s17 = inlined_call_operand.vmem [shape: f32[4,1,384], index: 17, kind: input, shape index: {}]   ;;  %s4747_s18 = inlined_call_operand.hbm [shape: bf16[4,128,128], index: 18, kind: input, shape index: {}]   ;;  %s4748_s19 = inlined_call_operand.vmem [shape: f32[4,1,128], index: 19, kind: input, shape index: {}]   ;;  %s4749_s20 = inlined_call_operand.vmem [shape: f32[4,1,128], index: 20, kind: input, shape index: {}]   ;;  %s4750_s21 = inlined_call_operand.vmem [shape: f32[4,1,128], index: 21, kind: input, shape index: {}]   ;;  %s4751_s22 = inlined_call_operand.hbm [shape: bf16[4,128,256], index: 22, kind: input, shape index: {}]   ;;  %s4752_s23 = inlined_call_operand.vmem [shape: f32[4,1,256], index: 23, kind: input, shape index: {}]   ;;  %s4753_s24 = inlined_call_operand.hbm [shape: bf16[4,256,128], index: 24, kind: input, shape index: {}]   ;;  %s4754_s25 = inlined_call_operand.vmem [shape: f32[4,1,128], index: 25, kind: input, shape index: {}]   ;;  %s4755_s26 = inlined_call_operand.vmem [shape: f32[4,1,128], index: 26, kind: input, shape index: {}]   ;;  %s4756_s27 = inlined_call_operand.vmem [shape: f32[4,1,128], index: 27, kind: input, shape index: {}]   ;;  %s4757_s28 = inlined_call_operand.hbm [shape: f32[16,128], index: 28, kind: output, shape index: {}]  }
   0x1   :  { %4768 = sst [smem:[#allocation28_spill]] %s4729_s0 }
   0x2   :  { %4769 = sst [smem:[#allocation29_spill]] %s4730_s1 }
   0x3   :  { %4770 = sst [smem:[#allocation30_spill]] %s4731_s2 }
   0x4   :  { %4771 = sst [smem:[#allocation31_spill]] %s4732_s3 }
   0x5   :  { %4772 = sst [smem:[#allocation32_spill]] %s4733_s4 }
   0x6   :  { %4773 = sst [smem:[#allocation33_spill]] %s4734_s5 }
   0x7   :  { %4774 = sst [smem:[#allocation34_spill]] %s4735_s6 }
   0x8   :  { %4775 = sst [smem:[#allocation35_spill]] %s4736_s7 }
   0x9   :  { %4776 = sst [smem:[#allocation36_spill]] %s4737_s8 }
   0xa   :  { %4777 = sst [smem:[#allocation37_spill]] %s4738_s9 }
   0xb   :  { %4778 = sst [smem:[#allocation38_spill]] %s4739_s10 }
   0xc   :  { %4779 = sst [smem:[#allocation39_spill]] %s4740_s11 }
   0xd   :  { %4780 = sst [smem:[#allocation40_spill]] %s4741_s12 }
   0xe   :  { %4781 = sst [smem:[#allocation41_spill]] %s4757_s28 }
   0xf   :  { %33 = vsyncpa [#allocation3], 0 }
  0x10   :  { %34 = vsyncpa [#allocation6], 0 }
  0x11   :  { %35 = vsyncpa [#allocation9], 0 }
  0x12   :  { %36 = vsyncpa [#allocation12], 0 }
  0x13   :  { %37 = vsyncpa [#allocation15], 0 }
  0x14   :  { %38 = vsyncpa [#allocation18], 0  ;;  %s4782_s9 = sld [smem:[#allocation36_spill]] }
  0x1a   :  { %s69_s30 = sshll.u32 %s4782_s9, 4  ;;  %s70_s30 = int_to_ptr.hbm [resolvable:$true] %s69_s30 }
  0x1b   :  { %39 = vsyncpa [#allocation4], 0  ;;  %s3889_s3 = smov [#allocation5]   ;;  %s4764_s10 = smov 128  }
  0x1c   :  { %s71_s6 = sshll.u32 %s3889_s3, 4  ;;  %s4765_s0 = smov 8   ;;  %s72_s6 = int_to_ptr.vmem [resolvable:$true] %s71_s6 }
  0x1d   :  { %77 = dma.hbm_to_vmem [thread:$0]  %s70_s30, 10240, %s72_s6, [#allocation6], %s4764_s10, %s4764_s10, %s4765_s0  }
  0x1e   :  { %s4783_s2 = sld [smem:[#allocation40_spill]]  ;;  %s3892_s12 = smov [#allocation8]  }
  0x1f   :  { %s101_s1 = sshll.u32 %s3892_s12, 4  ;;  %s124_s5 = sshll.u32 %s4743_s14, 4  ;;  %s102_s1 = int_to_ptr.vmem [resolvable:$true] %s101_s1  ;;  %s125_s5 = int_to_ptr.hbm [resolvable:$true] %s124_s5 }
  0x20   :  { %s4766_s9 = smov 64   ;;  %s3894_s3 = smov 4  }
  0x21   :  { %s145_s11 = sshll.u32 %s4745_s16, 4  ;;  %s3895_s29 = smov [#allocation11]   ;;  %s146_s11 = int_to_ptr.hbm [resolvable:$true] %s145_s11 }
  0x22   :  { %s3896_s12 = smov [#allocation14]   ;;  %s3897_s14 = smov 192  }
  0x23   :  { %s147_s4 = sshll.u32 %s3896_s12, 4  ;;  %s3898_s8 = smov 12   ;;  %s148_s4 = int_to_ptr.vmem [resolvable:$true] %s147_s4 }
  0x24   :  { %s99_s7 = sshll.u32 %s4783_s2, 4  ;;  %s126_s2 = sshll.u32 %s3895_s29, 4  ;;  %s100_s7 = int_to_ptr.hbm [resolvable:$true] %s99_s7  ;;  %s127_s2 = int_to_ptr.vmem [resolvable:$true] %s126_s2 }
  0x25   :  { %107 = dma.hbm_to_vmem [thread:$0]  %s100_s7, 1024, %s102_s1, [#allocation9], %s4766_s9, %s4766_s9, %s3894_s3  }
  0x26   :  { %129 = dma.hbm_to_vmem [thread:$0]  %s125_s5, 16, %s127_s2, [#allocation12]  }
  0x27   :  { %153 = dma.hbm_to_vmem [thread:$0]  %s146_s11, 12288, %s148_s4, [#allocation15], %s3897_s14, %s3897_s14, %s3898_s8  }
  0x28   :  { %s179_s28 = sshll.u32 %s4751_s22, 4  ;;  %s3899_s7 = smov [#allocation17]   ;;  %s180_s28 = int_to_ptr.hbm [resolvable:$true] %s179_s28 }
  0x29   :  { %s181_s1 = sshll.u32 %s3899_s7, 4  ;;  %s4784_s6 = sld [smem:[#allocation33_spill]]  ;;  %s182_s1 = int_to_ptr.vmem [resolvable:$true] %s181_s1 }
  0x2a   :  { %s4785_s9 = smov 8   ;;  %s4786_s5 = smov 128  }
  0x2b   :  { %187 = dma.hbm_to_vmem [thread:$0]  %s180_s28, 8192, %s182_s1, [#allocation18], %s4786_s5, %s4786_s5, %s4785_s9  }
  0x2c   :  { %s3900_s2 = smov [#allocation2]   ;;  %s4787_s14 = sld [smem:[#allocation38_spill]] }
  0x2d   :  { %s57_s12 = sshll.u32 %s3900_s2, 4  ;;  %s113_s8 = sshll.u32 %s4742_s13, 4  ;;  %s58_s12 = int_to_ptr.vmem [resolvable:$true] %s57_s12  ;;  %s114_s8 = int_to_ptr.hbm [resolvable:$true] %s113_s8 }
  0x2e   :  { %s3901_s7 = smov [#allocation7]   ;;  %s4788_s28 = smov 64  }
  0x2f   :  { %s55_s29 = sshll.u32 %s4784_s6, 4  ;;  %s86_s16 = sshll.u32 %s3901_s7, 4  ;;  %s56_s29 = int_to_ptr.hbm [resolvable:$true] %s55_s29  ;;  %s87_s16 = int_to_ptr.vmem [resolvable:$true] %s86_s16 }
  0x30   :  { %60 = dma.hbm_to_vmem [thread:$0]  %s56_s29, 16, %s58_s12, [#allocation3]  }
  0x31   :  { %s3902_s9 = smov [#allocation10]   ;;  %s135_s5 = sshll.u32 %s4744_s15, 4  ;;  %s136_s5 = int_to_ptr.hbm [resolvable:$true] %s135_s5 }
  0x32   :  { %s84_s10 = sshll.u32 %s4787_s14, 4  ;;  %s115_s1 = sshll.u32 %s3902_s9, 4  ;;  %s85_s10 = int_to_ptr.hbm [resolvable:$true] %s84_s10  ;;  %s116_s1 = int_to_ptr.vmem [resolvable:$true] %s115_s1 }
  0x33   :  { %92 = dma.hbm_to_vmem [thread:$0]  %s85_s10, 10240, %s87_s16, [#allocation6], %s4788_s28, %s4788_s28, %s3894_s3  }
  0x34   :  { %118 = dma.hbm_to_vmem [thread:$0]  %s114_s8, 16, %s116_s1, [#allocation9]  }
  0x35   :  { %s160_s13 = sshll.u32 %s4747_s18, 4  ;;  %s3903_s12 = smov [#allocation13]   ;;  %s161_s13 = int_to_ptr.hbm [resolvable:$true] %s160_s13 }
  0x36   :  { %s137_s11 = sshll.u32 %s3903_s12, 4  ;;  %s3904_s4 = smov [#allocation16]   ;;  %s138_s11 = int_to_ptr.vmem [resolvable:$true] %s137_s11 }
  0x37   :  { %140 = dma.hbm_to_vmem [thread:$0]  %s136_s5, 16, %s138_s11, [#allocation12]  }
  0x38   :  { %s162_s14 = sshll.u32 %s3904_s4, 4  ;;  %s194_s0 = sshll.u32 %s4753_s24, 4  ;;  %s163_s14 = int_to_ptr.vmem [resolvable:$true] %s162_s14  ;;  %s195_s0 = int_to_ptr.hbm [resolvable:$true] %s194_s0 }
  0x39   :  { %168 = dma.hbm_to_vmem [thread:$0]  %s161_s13, 4096, %s163_s14, [#allocation15], %s4788_s28, %s4788_s28, %s3894_s3  }
  0x3a   :  { %s3905_s15 = smov [#allocation19]  }
  0x3b   :  { %s196_s8 = sshll.u32 %s3905_s15, 4  ;;  %s197_s8 = int_to_ptr.vmem [resolvable:$true] %s196_s8 }
  0x3c   :  { %202 = dma.hbm_to_vmem [thread:$0]  %s195_s0, 8192, %s197_s8, [#allocation18], %s4788_s28, %s4788_s28, %s3894_s3  }
  0x3d   :  { %3851 = dma.done.wait [#allocation3], 16  }
  0x3e   :  { %3852 = vsyncadd [#allocation3], 4294967280 }
  0x3f   :  { %3853 = dma.done.wait [#allocation6], 20480  }
  0x40   :  { %3854 = vsyncadd [#allocation6], 4294946816 }
  0x41   :  { %3855 = dma.done.wait [#allocation9], 1040  }
  0x42   :  { %3856 = vsyncadd [#allocation9], 4294966256 }
  0x43   :  { %3857 = dma.done.wait [#allocation12], 32  }
  0x44   :  { %3858 = vsyncadd [#allocation12], 4294967264 }
  0x45   :  { %3859 = dma.done.wait [#allocation15], 16384  }
  0x46   :  { %3860 = vsyncadd [#allocation15], 4294950912 }
  0x47   :  { %3861 = dma.done.wait [#allocation18], 16384  }
  0x48   :  { %3862 = vsyncadd [#allocation18], 4294950912  ;;  %s4789_s7 = sld [smem:[#allocation29_spill]]  ;;  %vm278_vm0 = vcmask 1043456   ;;  %vm274_vm1 = vcmask 64512   ;;  %s4198_s0 = smov 0  }
  0x49   :  { %s4790_s29 = sld [smem:[#allocation30_spill]]  ;;  %v3479_v23 = vld [vmem:[#allocation2] ss:$0 sm:$0xff] }
  0x4a   :  { %s4791_s3 = sld [smem:[#allocation31_spill]] }
  0x4b   :  { %s4792_s12 = sld [smem:[#allocation32_spill]] }
  0x4c   :  { %s4793_s14 = sld [smem:[#allocation28_spill]] }
  0x4e   :  { %v257_v0 = vld [vmem:[%s4789_s7] sm:$0xff]  ;;  %v258_v1 = vld [vmem:[%s4789_s7 + $0x8] sm:$0xff]  ;;  %v259_v2 = vld [vmem:[%s4789_s7 + $0x10] sm:$0xff] }
  0x4f   :  { %v260_v3 = vld [vmem:[%s4789_s7 + $0x18] sm:$0xff]  ;;  %v4119_v4 = vpack.c.bf16 %v258_v1, %v257_v0  ;;  %v4124_v5 = vld [vmem:[%s4790_s29] sm:$0xf]  ;;  %v4136_v8 = vld [vmem:[%s4790_s29] sm:$0xf0] }
  0x50   :  { %v4129_v6 = vld [vmem:[%s4790_s29] sm:$0xf]  ;;  %v4131_v7 = vpack.c.bf16 %v260_v3, %v259_v2  ;;  %v4141_v9 = vld [vmem:[%s4790_s29] sm:$0xf0]  ;;  %v4146_v10 = vld [vmem:[%s4790_s29 + $0x8] sm:$0xf] }
  0x51   :  { %v4151_v11 = vld [vmem:[%s4790_s29 + $0x8] sm:$0xf]  ;;  %v4156_v12 = vld [vmem:[%s4790_s29 + $0x8] sm:$0xf0]  ;;  %v4166_v14 = vld [vmem:[%s4791_s3] sm:$0xf] }
  0x52   :  { %v4161_v13 = vld [vmem:[%s4790_s29 + $0x8] sm:$0xf0]  ;;  %v4171_v15 = vld [vmem:[%s4791_s3] sm:$0xf]  ;;  %v4176_v16 = vld [vmem:[%s4791_s3] sm:$0xf0] }
  0x53   :  { %v4181_v17 = vld [vmem:[%s4791_s3] sm:$0xf0]  ;;  %v269_v18 = vld [vmem:[%s4792_s12] sm:$0xf]  ;;  %v255_v21 = vld [vmem:[%s4793_s14 + $0x8] sm:$0xff] }
  0x54   :  { %v254_v19 = vld [vmem:[%s4793_s14] sm:$0xff]  ;;  %v280_v20 = vsel %vm278_vm0, %v269_v18, 0 }
  0x55   :  { %289 = vmatpush.bf16.msra.mxu0 %v280_v20  ;;  %v256_v22 = vpack.c.bf16 %v255_v21, %v254_v19 }
  0x58   :  { %2642 = vmatmul.msk.bf16.vlgmr.msra.gmra.mxu0 %vm274_vm1, %v256_v22 }
  0xd5   :  { %v291_v24 = vpop.f32.mrf.mxu0 }
  0xd6   :  { %v292_v25 = vadd.f32 %v3479_v23, %v291_v24  }
  0xdd   :  { %v293_v26 = vpop.f32.mrf.mxu0 }
  0xde   :  { %v294_v27 = vadd.f32 %v3479_v23, %v293_v26  }
  0xdf LB: > { %v340_v28 = vpack.c.bf16 %v3867_v27, %v3871_v25  ;;  %s2643_s15 = sshll.u32 %s3875_s0, 2  ;;  %s4794_s24 = sld [smem:[#allocation34_spill]]  ;;  %v2649_v29 = vor.u32 %v4141_v9, %v4129_v6  ;;  %vm351_vm2 = vcmask 130048   ;;  %v2653_v32 = vor.u32 %v4161_v13, %v4151_v11  ;;  %s3875_s0 = sphi %s4198_s0, %s301_s0   ;;  %v3871_v25 = vphi %v292_v25, %v4801_v25   ;;  %v3867_v27 = vphi %v294_v27, %v4800_v27  }
  0xe0   : > { %s4795_s3 = sld [smem:[#allocation35_spill]]  ;;  %s3267_s1 = sshll.u32 %s3875_s0, 7  ;;  %vm388_vm3 = vcmask 261120  }
  0xe1   : > { %365 = vmatpush.bf16.msra.mxu1 %v340_v28  ;;  %s4233_s30 = scalar_lea.vmem [#allocation5], %s3267_s1  ;;  %s4277_s2 = scalar_lea.vmem [#allocation7], %s3267_s1 }
  0xe2   : > { %v2722_v37 = vld [vmem:[%s4233_s30 + $0x70] sm:$0xf]  ;;  %v3283_v38 = vld [vmem:[%s4233_s30 + $0x74] sm:$0xf0]  ;;  %v3282_v39 = vld [vmem:[%s4233_s30 + $0x74] sm:$0xf] }
  0xe3   : > { %v2723_v40 = vor.u32 %v3283_v38, %v2722_v37  ;;  %v2724_v41 = vld [vmem:[%s4233_s30 + $0x78] sm:$0xf0]  ;;  %v2714_v42 = vld [vmem:[%s4233_s30 + $0x60] sm:$0xf]  ;;  %v3281_v43 = vld [vmem:[%s4233_s30 + $0x64] sm:$0xf0] }
  0xe4   : > { %2654 = vmatmul.msk.bf16.vlgmr.msra.gmra.mxu1 %vm351_vm2, %v2649_v29  ;;  %v2727_v44 = vor.u32 %v3282_v39, %v2724_v41  ;;  %v3280_v45 = vld [vmem:[%s4233_s30 + $0x64] sm:$0xf]  ;;  %v2716_v46 = vld [vmem:[%s4233_s30 + $0x68] sm:$0xf0]  ;;  %v2715_v47 = vor.u32 %v3281_v43, %v2714_v42  ;;  %v2706_v49 = vld [vmem:[%s4233_s30 + $0x50] sm:$0xf] }
  0xe5   : > { %s305_s7 = scalar_lea.vmem %s4794_s24, %s2643_s15  ;;  %516 = vmatpush.bf16.msra.mxu3 %v2723_v40  ;;  %v2719_v48 = vor.u32 %v3280_v45, %v2716_v46  ;;  %v3279_v50 = vld [vmem:[%s4233_s30 + $0x54] sm:$0xf0]  ;;  %v3278_v51 = vld [vmem:[%s4233_s30 + $0x54] sm:$0xf]  ;;  %v2708_v52 = vld [vmem:[%s4233_s30 + $0x58] sm:$0xf0] }
  0xe6   : > { %v306_v30 = vld [vmem:[%s305_s7] sm:$0xf]  ;;  %s307_s28 = scalar_lea.vmem %s4795_s3, %s3875_s0  ;;  %v2707_v53 = vor.u32 %v3279_v50, %v2706_v49  ;;  %v2711_v56 = vor.u32 %v3278_v51, %v2708_v52  ;;  %v3277_v58 = vld [vmem:[%s4233_s30 + $0x44] sm:$0xf0]  ;;  %v3276_v59 = vld [vmem:[%s4233_s30 + $0x44] sm:$0xf] }
  0xe7   : > { %v319_v31 = vsel %vm278_vm0, %v306_v30, 0  ;;  %v2698_v57 = vld [vmem:[%s4233_s30 + $0x40] sm:$0xf]  ;;  %v2700_v60 = vld [vmem:[%s4233_s30 + $0x48] sm:$0xf0]  ;;  %s4796_s12 = sld [smem:[#allocation39_spill]] }
  0xe8   : > { %328 = vmatpush.bf16.msra.mxu0 %v319_v31  ;;  %v3480_v61 = vld [vmem:[%s307_s28] ss:$0 sm:$0xff]  ;;  %v2699_v62 = vor.u32 %v3277_v58, %v2698_v57  ;;  %v2703_v63 = vor.u32 %v3276_v59, %v2700_v60  ;;  %v2690_v0 = vld [vmem:[%s4233_s30 + $0x30] sm:$0xf]  ;;  %v3275_v1 = vld [vmem:[%s4233_s30 + $0x34] sm:$0xf0] }
  0xe9   : > { %517 = vmatpush.bf16.msra.mxu3 %v2715_v47  ;;  %v3274_v3 = vld [vmem:[%s4233_s30 + $0x34] sm:$0xf]  ;;  %v2692_v18 = vld [vmem:[%s4233_s30 + $0x38] sm:$0xf0]  ;;  %v2691_v20 = vor.u32 %v3275_v1, %v2690_v0  ;;  %v3273_v40 = vld [vmem:[%s4233_s30 + $0x24] sm:$0xf0] }
  0xea   : > { %v2695_v22 = vor.u32 %v3274_v3, %v2692_v18  ;;  %v3272_v41 = vld [vmem:[%s4233_s30 + $0x24] sm:$0xf]  ;;  %v2684_v43 = vld [vmem:[%s4233_s30 + $0x28] sm:$0xf0]  ;;  %v2674_v45 = vld [vmem:[%s4233_s30 + $0x10] sm:$0xf] }
  0xeb   : > { %2644 = vmatmul.msk.bf16.vlgmr.msra.gmra.mxu0 %vm274_vm1, %v4119_v4  ;;  %v3271_v46 = vld [vmem:[%s4233_s30 + $0x14] sm:$0xf0]  ;;  %v3270_v47 = vld [vmem:[%s4233_s30 + $0x14] sm:$0xf]  ;;  %v2676_v49 = vld [vmem:[%s4233_s30 + $0x18] sm:$0xf0] }
  0xec   : > { %530 = vmatpush.bf16.msrb.mxu0 %v2727_v44  ;;  %v2687_v44 = vor.u32 %v3272_v41, %v2684_v43  ;;  %v2679_v50 = vor.u32 %v3270_v47, %v2676_v49  ;;  %v2666_v51 = vld [vmem:[%s4233_s30] sm:$0xf]  ;;  %v3269_v52 = vld [vmem:[%s4233_s30 + $0x4] sm:$0xf0]  ;;  %v3300_v57 = vld [vmem:[%s4277_s2 + $0x78] sm:$0xff]  ;;  %s2663_s4 = sshll.u32 %s3875_s0, 1 }
  0xed   : > { %518 = vmatpush.bf16.msra.mxu3 %v2707_v53  ;;  %v3268_v53 = vld [vmem:[%s4233_s30 + $0x4] sm:$0xf]  ;;  %v3292_v58 = vld [vmem:[%s4277_s2 + $0x38] sm:$0xff]  ;;  %v3299_v59 = vld [vmem:[%s4277_s2 + $0x70] sm:$0xff]  ;;  %s584_s11 = scalar_lea.vmem %s4796_s12, %s3875_s0  ;;  %s4797_s22 = sld [smem:[#allocation37_spill]] }
  0xee   : > { %685 = vmatpush.bf16.msrb.mxu1 %v3292_v58  ;;  %v3291_v60 = vld [vmem:[%s4277_s2 + $0x30] sm:$0xff]  ;;  %s301_s0 = sadd.s32 1, %s3875_s0  }
  0xef   : > { %p298_p0 = scmp.ge.s32.totalorder %s301_s0, 4  }
  0xf0   : > { %531 = vmatpush.bf16.msrb.mxu0 %v2719_v48  ;;  %v2675_v48 = vor.u32 %v3271_v46, %v2674_v45  ;;  %v3481_v45 = vld [vmem:[%s584_s11] ss:$0 sm:$0xff]  ;;  %s4802_s16 = sld [smem:[#allocation34_spill]] (%p298_p0)  ;;  %v2804_v6 = vor.u32 (%p298_p0), %v4156_v12, %v4146_v10  ;;  %v2855_v12 = vld [vmem:[#allocation5 + $0x250] sm:$0xf] (%p298_p0)  ;;  %s4363_s29 = smov (%p298_p0), 0  }
  0xf1   : > { %519 = vmatpush.bf16.msra.mxu3 %v2699_v62  ;;  %v3290_v62 = vld [vmem:[%s4277_s2 + $0x28] sm:$0xff]  ;;  %s4803_s3 = sld [smem:[#allocation35_spill]] (%p298_p0) }
  0xf2   : > { %686 = vmatpush.bf16.msrb.mxu1 %v3291_v60 }
  0xf3   : > { %s429_s15 = scalar_lea.vmem %s4797_s22, %s2663_s4 }
  0xf4   : > { %2655 = vmatmul.msk.bf16.gmra.mxu1 %vm351_vm2, %v2653_v32  ;;  %532 = vmatpush.bf16.msrb.mxu0 %v2711_v56 }
  0xf5   : > { %520 = vmatpush.bf16.msra.mxu3 %v2691_v20  ;;  %v3289_v20 = vld [vmem:[%s4277_s2 + $0x20] sm:$0xff] }
  0xf6   : > { %687 = vmatpush.bf16.msrb.mxu1 %v3290_v62  ;;  %v3314_v62 = vld [vmem:[#allocation5 + $0x264] sm:$0xf0] (%p298_p0) }
  0xf8   : > { %533 = vmatpush.bf16.msrb.mxu0 %v2703_v63  ;;  %v3297_v63 = vld [vmem:[%s4277_s2 + $0x60] sm:$0xff] }
  0xfa   : > { %688 = vmatpush.bf16.msrb.mxu1 %v3289_v20 }
  0xfb   : > { %2645 = vmatmul.msk.bf16.gmra.mxu0 %vm274_vm1, %v4131_v7 }
  0xfc   : > { %534 = vmatpush.bf16.msrb.mxu0 %v2695_v22  ;;  %v3287_v22 = vld [vmem:[%s4277_s2 + $0x10] sm:$0xff] }
 0x100   : > { %535 = vmatpush.bf16.msrb.mxu0 %v2687_v44 }
 0x104   : > { %536 = vmatpush.bf16.msrb.mxu0 %v2679_v50 }
 0x161   : > { %v367_v33 = vpop.f32.mrf.mxu1 }
 0x168   : > { %v330_v34 = vpop.f32.mrf.mxu0 }
 0x169   : > { %v369_v35 = vpop.f32.mrf.mxu1  ;;  %v331_v23 = vadd.f32 %v3480_v61, %v330_v34 }
 0x16b   : > { %v368_v31 = vadd.f32 %v367_v33, %v331_v23  ;;  %v2682_v33 = vld [vmem:[%s4233_s30 + $0x20] sm:$0xf] }
 0x16c   : > { %v2683_v42 = vor.u32 %v3273_v40, %v2682_v33  ;;  %v3293_v23 = vld [vmem:[%s4277_s2 + $0x40] sm:$0xff] }
 0x16d   : > { %v377_v34 = vmax.f32 %v368_v31, 0.0 }
 0x16e   : > { %521 = vmatpush.bf16.msra.mxu3 %v2683_v42 }
 0x170   : > { %v332_v36 = vpop.f32.mrf.mxu0 }
 0x171   : > { %v372_v54 = vpop.f32.mrf.mxu1  ;;  %v333_v19 = vadd.f32 %v3480_v61, %v332_v36 }
 0x172   : > { %522 = vmatpush.bf16.msra.mxu3 %v2675_v48 }
 0x173   : > { %v370_v29 = vadd.f32 %v369_v35, %v333_v19  ;;  %v2659_v35 = vor.u32 %v4181_v17, %v4171_v15  ;;  %v3296_v19 = vld [vmem:[%s4277_s2 + $0x58] sm:$0xff] }
 0x174   :  { %v3315_v17 = vld [vmem:[#allocation5 + $0x274] sm:$0xf] (%p298_p0) }
 0x175   : > { %v378_v37 = vmax.f32 %v370_v29, 0.0 }
 0x177   : > { %v381_v39 = vpack.c.bf16 %v378_v37, %v377_v34 }
 0x178   : > { %v335_v55 = vpop.f32.mrf.mxu0 }
 0x179   : > { %v336_v2 = vadd.f32 %v3480_v61, %v335_v55  ;;  %v374_v28 = vpop.f32.mrf.mxu1  ;;  %v2668_v55 = vld [vmem:[%s4233_s30 + $0x8] sm:$0xf0]  ;;  %s4804_s30 = sld [smem:[#allocation37_spill]] (%p298_p0) }
 0x17a   : > { %v2671_v56 = vor.u32 %v3268_v53, %v2668_v55 }
 0x17b   : > { %v373_v26 = vadd.f32 %v372_v54, %v336_v2  ;;  %v2667_v54 = vor.u32 %v3269_v52, %v2666_v51 }
 0x17c   : > { %537 = vmatpush.bf16.msrb.mxu0 %v2671_v56  ;;  %v2793_v56 = vld [vmem:[%s4802_s16 + $0x10] sm:$0xf] (%p298_p0) }
 0x17d   : > { %v379_v32 = vmax.f32 %v373_v26, 0.0  ;;  %523 = vmatpush.bf16.msra.mxu3 %v2667_v54  ;;  %v3285_v26 = vld [vmem:[%s4277_s2] sm:$0xff]  ;;  %v729_v58 = vsel (%p298_p0), %vm278_vm0, %v2793_v56, 0  ;;  %v3306_v56 = vld [vmem:[#allocation5 + $0x224] sm:$0xf0] (%p298_p0) }
 0x180   : > { %v337_v21 = vpop.f32.mrf.mxu0  ;;  %738 = vmatpush.bf16.msra.mxu0 (%p298_p0), %v729_v58 }
 0x181   : > { %v338_v24 = vadd.f32 %v3480_v61, %v337_v21  ;;  %v3298_v61 = vld [vmem:[%s4277_s2 + $0x68] sm:$0xff]  ;;  %v3295_v21 = vld [vmem:[%s4277_s2 + $0x50] sm:$0xff] }
 0x183   : > { %v375_v30 = vadd.f32 %v374_v28, %v338_v24  ;;  %v3286_v24 = vld [vmem:[%s4277_s2 + $0x8] sm:$0xff]  ;;  %v430_v28 = vld [vmem:[%s429_s15] sm:$0x3] }
 0x184   : > { %v432_v37 = vperm.slane %v430_v28, 0 }
 0x185   : > { %v380_v36 = vmax.f32 %v375_v30, 0.0  ;;  %v433_v30 = vperm.slane %v430_v28, 1 }
 0x187   : > { %v382_v38 = vpack.c.bf16 %v380_v36, %v379_v32 }
 0x189   : > { %398 = vmatpush.bf16.msra.mxu2 %v382_v38 }
 0x18d   : > { %399 = vmatpush.bf16.msra.mxu2 %v381_v39 }
 0x190   : > { %2660 = vmatmul.msk.bf16.vlgmr.msra.gmra.mxu2 %vm388_vm3, %v2659_v35 }
 0x191   : > { %699 = vmatpush.bf16.msrb.mxu2 %v3300_v57 }
 0x195   : > { %700 = vmatpush.bf16.msrb.mxu2 %v3299_v59  ;;  %v2800_v59 = vor.u32 (%p298_p0), %v4136_v8, %v4124_v5  ;;  %v2871_v5 = vld [vmem:[#allocation5 + $0x270] sm:$0xf] (%p298_p0)  ;;  %v3316_v8 = vld [vmem:[#allocation5 + $0x274] sm:$0xf0] (%p298_p0) }
 0x196   :  { %v2872_v60 = vor.u32 (%p298_p0), %v3316_v8, %v2871_v5  ;;  %v2825_v5 = vld [vmem:[#allocation5 + $0x218] sm:$0xf0] (%p298_p0) }
 0x199   : > { %701 = vmatpush.bf16.msrb.mxu2 %v3298_v61  ;;  %v2873_v61 = vld [vmem:[#allocation5 + $0x278] sm:$0xf0] (%p298_p0) }
 0x19d   : > { %702 = vmatpush.bf16.msrb.mxu2 %v3297_v63  ;;  %v2876_v63 = vor.u32 (%p298_p0), %v3315_v17, %v2873_v61  ;;  %v3301_v17 = vld [vmem:[#allocation5 + $0x204] sm:$0xf] (%p298_p0)  ;;  %v2817_v61 = vld [vmem:[#allocation5 + $0x208] sm:$0xf0] (%p298_p0) }
 0x1a1   : > { %703 = vmatpush.bf16.msrb.mxu2 %v3296_v19 }
 0x1a5   : > { %704 = vmatpush.bf16.msrb.mxu2 %v3295_v21 }
 0x213   : > { %v401_v0 = vpop.f32.mrf.mxu2 }
 0x214   : > { %v406_v2 = vadd.f32 %v3871_v25, %v401_v0  ;;  %v3288_v25 = vld [vmem:[%s4277_s2 + $0x18] sm:$0xff]  ;;  %v3313_v0 = vld [vmem:[#allocation5 + $0x264] sm:$0xf] (%p298_p0) }
 0x215   : > { %689 = vmatpush.bf16.msrb.mxu1 %v3288_v25 }
 0x219   : > { %690 = vmatpush.bf16.msrb.mxu1 %v3287_v22  ;;  %v3310_v22 = vld [vmem:[#allocation5 + $0x244] sm:$0xf0] (%p298_p0) }
 0x21b   : > { %v403_v1 = vpop.f32.mrf.mxu2 }
 0x21c   : > { %v407_v3 = vadd.f32 %v3867_v27, %v403_v1  ;;  %v3294_v27 = vld [vmem:[%s4277_s2 + $0x48] sm:$0xff]  ;;  %s4805_s2 = sld [smem:[#allocation39_spill]] (%p298_p0) }
 0x21d   : > { %705 = vmatpush.bf16.msrb.mxu2 %v3294_v27  ;;  %691 = vmatpush.bf16.msrb.mxu1 %v3286_v24  ;;  %v2865_v1 = vld [vmem:[#allocation5 + $0x268] sm:$0xf0] (%p298_p0) }
 0x21e   : > { %v408_v18 = vpack.c.bf16 %v407_v3, %v406_v2  ;;  %v3312_v2 = vld [vmem:[#allocation5 + $0x254] sm:$0xf0] (%p298_p0)  ;;  %v3311_v3 = vld [vmem:[#allocation5 + $0x254] sm:$0xf] (%p298_p0)  ;;  %v2849_v24 = vld [vmem:[#allocation5 + $0x248] sm:$0xf0] (%p298_p0) }
 0x21f   :  { %v2856_v19 = vor.u32 (%p298_p0), %v3312_v2, %v2855_v12  ;;  %v3329_v12 = vld [vmem:[#allocation7 + $0x260] sm:$0xff] (%p298_p0) }
 0x220   : > { %524 = vmatmul.bf16.vlgmr.msra.gmra.mxu3 %v408_v18  ;;  %538 = vmatmul.bf16.vlgmr.msrb.gmra.mxu0 %v408_v18  ;;  %v2857_v18 = vld [vmem:[#allocation5 + $0x258] sm:$0xf0] (%p298_p0) }
 0x221   : > { %706 = vmatpush.bf16.msrb.mxu2 %v3293_v23  ;;  %692 = vmatpush.bf16.msrb.mxu1 %v3285_v26  ;;  %v3309_v23 = vld [vmem:[#allocation5 + $0x244] sm:$0xf] (%p298_p0)  ;;  %v3482_v26 = vld [vmem:[%s4803_s3 + $0x4] ss:$0 sm:$0xff] (%p298_p0) }
 0x222   :  { %923 = vmatpush.bf16.msra.mxu3 (%p298_p0), %v2872_v60  ;;  %937 = vmatpush.bf16.msrb.mxu0 (%p298_p0), %v2876_v63  ;;  %v3324_v63 = vld [vmem:[#allocation7 + $0x238] sm:$0xff] (%p298_p0) }
 0x230   :  { %2795 = vmatmul.msk.bf16.vlgmr.msra.gmra.mxu0 (%p298_p0), %vm274_vm1, %v4119_v4  ;;  %v2863_v4 = vld [vmem:[#allocation5 + $0x260] sm:$0xf] (%p298_p0) }
 0x231   :  { %v2864_v10 = vor.u32 (%p298_p0), %v3314_v62, %v2863_v4  ;;  %v2820_v4 = vor.u32 (%p298_p0), %v3301_v17, %v2817_v61  ;;  %v3332_v62 = vld [vmem:[#allocation7 + $0x278] sm:$0xff] (%p298_p0) }
 0x233   :  { %924 = vmatpush.bf16.msra.mxu3 (%p298_p0), %v2864_v10  ;;  %v3330_v10 = vld [vmem:[#allocation7 + $0x268] sm:$0xff] (%p298_p0) }
 0x237   :  { %925 = vmatpush.bf16.msra.mxu3 (%p298_p0), %v2856_v19 }
 0x240   :  { %2796 = vmatmul.msk.bf16.gmra.mxu0 (%p298_p0), %vm274_vm1, %v4131_v7  ;;  %v2868_v7 = vor.u32 (%p298_p0), %v3313_v0, %v2865_v1  ;;  %v3331_v0 = vld [vmem:[#allocation7 + $0x270] sm:$0xff] (%p298_p0) }
 0x241   :  { %v3323_v1 = vld [vmem:[#allocation7 + $0x230] sm:$0xff] (%p298_p0) }
 0x242   :  { %938 = vmatpush.bf16.msrb.mxu0 (%p298_p0), %v2868_v7  ;;  %v3322_v7 = vld [vmem:[#allocation7 + $0x228] sm:$0xff] (%p298_p0) }
 0x29d   : > { %v539_v29 = vpop.f32.mrf.mxu0 }
 0x29e   : > { %v540_v32 = vadd.f32 %v539_v29, %v433_v30  ;;  %v2852_v29 = vor.u32 (%p298_p0), %v3309_v23, %v2849_v24  ;;  %v3326_v23 = vld [vmem:[#allocation7 + $0x248] sm:$0xff] (%p298_p0)  ;;  %v3319_v24 = vld [vmem:[#allocation7 + $0x210] sm:$0xff] (%p298_p0) }
 0x2a0   : > { %v545_v34 = vmax.f32 %v540_v32, 0.0 }
 0x2a3   : > { %v525_v31 = vpop.f32.mrf.mxu3 }
 0x2a4   : > { %v526_v35 = vadd.f32 %v525_v31, %v432_v37  ;;  %v3308_v31 = vld [vmem:[#allocation5 + $0x234] sm:$0xf0] (%p298_p0) }
 0x2a5   : > { %v541_v36 = vpop.f32.mrf.mxu0 }
 0x2a6   : > { %v542_v38 = vadd.f32 %v541_v36, %v433_v30  ;;  %v544_v42 = vmax.f32 %v526_v35, 0.0  ;;  %v2839_v30 = vld [vmem:[#allocation5 + $0x230] sm:$0xf] (%p298_p0)  ;;  %v3307_v36 = vld [vmem:[#allocation5 + $0x234] sm:$0xf] (%p298_p0) }
 0x2a8   : > { %v547_v39 = vmax.f32 %v542_v38, 0.0 }
 0x2aa   : > { %v549_v33 = vpack.c.bf16 %v547_v39, %v545_v34  ;;  %v2840_v34 = vor.u32 (%p298_p0), %v3308_v31, %v2839_v30  ;;  %v3338_v30 = vld [vmem:[#allocation8 + $0x28] sm:$0xff] (%p298_p0)  ;;  %v3337_v31 = vld [vmem:[#allocation8 + $0x20] sm:$0xff] (%p298_p0) }
 0x2ab   : > { %v527_v40 = vpop.f32.mrf.mxu3 }
 0x2ac   : > { %v528_v41 = vadd.f32 %v527_v40, %v432_v37  ;;  %707 = vmatmul.bf16.vlgmr.msrb.gmra.mxu2 %v549_v33  ;;  %v2841_v37 = vld [vmem:[#allocation5 + $0x238] sm:$0xf0] (%p298_p0) }
 0x2ad   :  { %v740_v9 = vpop.f32.mrf.mxu0 (%p298_p0)  ;;  %v2844_v35 = vor.u32 (%p298_p0), %v3307_v36, %v2841_v37 }
 0x2ae   : > { %v546_v43 = vmax.f32 %v528_v41, 0.0  ;;  %v741_v33 = vadd.f32 (%p298_p0), %v3482_v26, %v740_v9  ;;  %v2823_v9 = vld [vmem:[#allocation5 + $0x210] sm:$0xf] (%p298_p0) }
 0x2b0   : > { %v548_v44 = vpack.c.bf16 %v546_v43, %v544_v42 }
 0x2b2   : > { %693 = vmatmul.bf16.vlgmr.msrb.gmra.mxu1 %v548_v44 }
 0x2b5   :  { %v742_v13 = vpop.f32.mrf.mxu0 (%p298_p0) }
 0x2b6   :  { %v743_v38 = vadd.f32 (%p298_p0), %v3482_v26, %v742_v13  ;;  %v3303_v13 = vld [vmem:[#allocation5 + $0x214] sm:$0xf] (%p298_p0) }
 0x2b7   :  { %v2828_v8 = vor.u32 (%p298_p0), %v3303_v13, %v2825_v5  ;;  %v3484_v5 = vld [vmem:[#allocation10] ss:$0 sm:$0xff] (%p298_p0) }
 0x2bd   :  { %v745_v20 = vpop.f32.mrf.mxu0 (%p298_p0) }
 0x2be   :  { %v746_v32 = vadd.f32 (%p298_p0), %v3482_v26, %v745_v20 }
 0x2c5   :  { %v747_v39 = vpop.f32.mrf.mxu0 (%p298_p0) }
 0x2c6   :  { %v748_v41 = vadd.f32 (%p298_p0), %v3482_v26, %v747_v39  ;;  %v3325_v26 = vld [vmem:[#allocation7 + $0x240] sm:$0xff] (%p298_p0) }
 0x32f   : > { %v694_v46 = vpop.f32.mrf.mxu1  ;;  %v708_v47 = vpop.f32.mrf.mxu2 }
 0x330   : > { %v695_v48 = vadd.f32 %v3481_v45, %v694_v46 }
 0x332   : > { %v709_v49 = vadd.f32 %v708_v47, %v695_v48 }
 0x334   : > { %v4310_v25 = vmax.f32 %v709_v49, 0.0  }
 0x336   : > { %v4798_v50 = vmov %v4310_v25 }
 0x337   : > { %v696_v51 = vpop.f32.mrf.mxu1  ;;  %v710_v53 = vpop.f32.mrf.mxu2  ;;  %v4801_v25 = vmov %v4798_v50 }
 0x338   : > { %v697_v52 = vadd.f32 %v3481_v45, %v696_v51  ;;  %v2860_v25 = vor.u32 (%p298_p0), %v3311_v3, %v2857_v18 }
 0x33a   : > { %v711_v54 = vadd.f32 %v710_v53, %v697_v52  ;;  %939 = vmatpush.bf16.msrb.mxu0 (%p298_p0), %v2860_v25  ;;  %v2810_v53 = vor.u32 (%p298_p0), %v4176_v16, %v4166_v14  ;;  %v2815_v14 = vld [vmem:[#allocation5 + $0x200] sm:$0xf] (%p298_p0)  ;;  %v3302_v16 = vld [vmem:[#allocation5 + $0x204] sm:$0xf0] (%p298_p0) }
 0x33b   :  { %300 = sbr.rel (!%p298_p0) target bundleno = 223 (0xdf), region = 214  ;;  %v2816_v60 = vor.u32 (%p298_p0), %v3302_v16, %v2815_v14  ;;  %v3321_v25 = vld [vmem:[#allocation7 + $0x220] sm:$0xff] (%p298_p0) }
 0x33c   : > { %v4312_v27 = vmax.f32 %v711_v54, 0.0   ;;  %v2831_v54 = vld [vmem:[#allocation5 + $0x220] sm:$0xf] (%p298_p0) }
 0x33d   :  { %v2832_v58 = vor.u32 (%p298_p0), %v3306_v56, %v2831_v54 }
 0x33e   : > { %v4799_v55 = vmov %v4312_v27  ;;  %940 = vmatpush.bf16.msrb.mxu0 (%p298_p0), %v2852_v29  ;;  %v3339_v29 = vld [vmem:[#allocation8 + $0x30] sm:$0xff] (%p298_p0) }
 0x33f   : > { %v4800_v27 = vmov %v4799_v55  ;;  %v750_v57 = vpack.c.bf16 (%p298_p0), %v4799_v55, %v4798_v50 }
 0x340   :  { %v2847_v27 = vld [vmem:[#allocation5 + $0x240] sm:$0xf] }
 0x341   :  { %775 = vmatpush.bf16.msra.mxu1 %v750_v57  ;;  %v2848_v28 = vor.u32 %v3310_v22, %v2847_v27  ;;  %v3305_v57 = vld [vmem:[#allocation5 + $0x224] sm:$0xf]  ;;  %v3327_v27 = vld [vmem:[#allocation7 + $0x250] sm:$0xff]  ;;  %v3320_v22 = vld [vmem:[#allocation7 + $0x218] sm:$0xff] }
 0x342   :  { %941 = vmatpush.bf16.msrb.mxu0 %v2844_v35 }
 0x343   :  { %926 = vmatpush.bf16.msra.mxu3 %v2848_v28  ;;  %v3340_v28 = vld [vmem:[#allocation8 + $0x38] sm:$0xff] }
 0x344   :  { %2805 = vmatmul.msk.bf16.vlgmr.msra.gmra.mxu1 %vm351_vm2, %v2800_v59  ;;  %v2833_v59 = vld [vmem:[#allocation5 + $0x228] sm:$0xf0] }
 0x345   :  { %1091 = vmatpush.bf16.msrb.mxu1 %v3324_v63 }
 0x347   :  { %927 = vmatpush.bf16.msra.mxu3 %v2840_v34 }
 0x349   :  { %1092 = vmatpush.bf16.msrb.mxu1 %v3323_v1 }
 0x34b   :  { %928 = vmatpush.bf16.msra.mxu3 %v2832_v58 }
 0x34d   :  { %1093 = vmatpush.bf16.msrb.mxu1 %v3322_v7 }
 0x351   :  { %1094 = vmatpush.bf16.msrb.mxu1 %v3321_v25 }
 0x354   :  { %2806 = vmatmul.msk.bf16.gmra.mxu1 %vm351_vm2, %v2804_v6  ;;  %v2836_v6 = vor.u32 %v3305_v57, %v2833_v59  ;;  %v3483_v57 = vld [vmem:[%s4805_s2 + $0x4] ss:$0 sm:$0xff] }
 0x355   :  { %1095 = vmatpush.bf16.msrb.mxu1 %v3320_v22 }
 0x356   :  { %942 = vmatpush.bf16.msrb.mxu0 %v2836_v6 }
 0x359   :  { %1096 = vmatpush.bf16.msrb.mxu1 %v3319_v24 }
 0x35a   :  { %943 = vmatpush.bf16.msrb.mxu0 %v2828_v8 }
 0x35e   :  { %944 = vmatpush.bf16.msrb.mxu0 %v2820_v4 }
 0x3c1   :  { %v777_v11 = vpop.f32.mrf.mxu1 }
 0x3c2   :  { %v778_v45 = vadd.f32 %v777_v11, %v741_v33  ;;  %v3304_v11 = vld [vmem:[#allocation5 + $0x214] sm:$0xf0] }
 0x3c4   :  { %v787_v51 = vmax.f32 %v778_v45, 0.0 }
 0x3c9   :  { %v779_v15 = vpop.f32.mrf.mxu1 }
 0x3ca   :  { %v780_v43 = vadd.f32 %v779_v15, %v743_v38  ;;  %v2824_v15 = vor.u32 %v3304_v11, %v2823_v9 }
 0x3cc   :  { %v788_v48 = vmax.f32 %v780_v43, 0.0  ;;  %929 = vmatpush.bf16.msra.mxu3 %v2824_v15 }
 0x3ce   :  { %v791_v52 = vpack.c.bf16 %v788_v48, %v787_v51  ;;  %v3335_v51 = vld [vmem:[#allocation8 + $0x10] sm:$0xff] }
 0x3d0   :  { %930 = vmatpush.bf16.msra.mxu3 %v2816_v60  ;;  %v3906_v60 = vmov 128.0  }
 0x3d1   :  { %v782_v21 = vpop.f32.mrf.mxu1  ;;  %3487 = vrcp.f32 %v3906_v60 }
 0x3d2   :  { %v783_v40 = vadd.f32 %v782_v21, %v746_v32  ;;  %v3328_v21 = vld [vmem:[#allocation7 + $0x258] sm:$0xff]  ;;  %v2812_v32 = vld [vmem:[%s4804_s30 + $0x8] sm:$0x3] }
 0x3d3   :  { %v840_v37 = vperm.slane %v2812_v32, 1  ;;  %v839_v35 = vperm.slane %v2812_v32, 0 }
 0x3d4   :  { %v789_v46 = vmax.f32 %v783_v40, 0.0  ;;  %1188 = vmatpush.bf16.msrb.mxu3 %v3340_v28 }
 0x3d7   :  { %v3488_v61 = vpop.eup %3487 }
 0x3d8   :  { %1189 = vmatpush.bf16.msrb.mxu3 %v3339_v29  ;;  %v1209_v4 = vmul.f32 128.0, %v3488_v61  ;;  %vm1213_vm4 = vweird.f32 %v3488_v61 }
 0x3d9   :  { %v784_v42 = vpop.f32.mrf.mxu1 }
 0x3da   :  { %v785_v44 = vadd.f32 %v784_v42, %v748_v41 }
 0x3dc   :  { %v790_v47 = vmax.f32 %v785_v44, 0.0  ;;  %1190 = vmatpush.bf16.msrb.mxu3 %v3338_v30 }
 0x3de   :  { %v792_v49 = vpack.c.bf16 %v790_v47, %v789_v46 }
 0x3e0   :  { %808 = vmatpush.bf16.msra.mxu2 %v792_v49  ;;  %1191 = vmatpush.bf16.msrb.mxu3 %v3337_v31  ;;  %v3336_v49 = vld [vmem:[#allocation8 + $0x18] sm:$0xff] }
 0x3e4   :  { %809 = vmatpush.bf16.msra.mxu2 %v791_v52  ;;  %1192 = vmatpush.bf16.msrb.mxu3 %v3336_v49  ;;  %v3334_v52 = vld [vmem:[#allocation8 + $0x8] sm:$0xff] }
 0x3e7   :  { %2811 = vmatmul.msk.bf16.vlgmr.msra.gmra.mxu2 %vm388_vm3, %v2810_v53  ;;  %v3333_v53 = vld [vmem:[#allocation8] sm:$0xff] }
 0x3e8   :  { %1105 = vmatpush.bf16.msrb.mxu2 %v3332_v62  ;;  %1193 = vmatpush.bf16.msrb.mxu3 %v3335_v51  ;;  %v1210_v62 = vsub.f32 1.0, %v1209_v4 }
 0x3ea   :  { %v1211_v63 = vmul.f32 %v3488_v61, %v1210_v62 }
 0x3ec   :  { %1106 = vmatpush.bf16.msrb.mxu2 %v3331_v0  ;;  %1194 = vmatpush.bf16.msrb.mxu3 %v3334_v52  ;;  %v1212_v0 = vadd.f32 %v3488_v61, %v1211_v63 }
 0x3ee   :  { %v4353_v1 = vsel %vm1213_vm4, %v3488_v61, %v1212_v0 }
 0x3f0   :  { %1107 = vmatpush.bf16.msrb.mxu2 %v3330_v10  ;;  %1195 = vmatpush.bf16.msrb.mxu3 %v3333_v53 }
 0x3f4   :  { %1108 = vmatpush.bf16.msrb.mxu2 %v3329_v12 }
 0x3f8   :  { %1109 = vmatpush.bf16.msrb.mxu2 %v3328_v21 }
 0x3fc   :  { %1110 = vmatpush.bf16.msrb.mxu2 %v3327_v27 }
 0x400   :  { %1111 = vmatpush.bf16.msrb.mxu2 %v3326_v23 }
 0x404   :  { %1112 = vmatpush.bf16.msrb.mxu2 %v3325_v26 }
 0x46a   :  { %v811_v2 = vpop.f32.mrf.mxu2 }
 0x46b   :  { %v816_v18 = vadd.f32 %v811_v2, %v4798_v50  ;;  %v3318_v50 = vld [vmem:[#allocation7 + $0x208] sm:$0xff] }
 0x46c   :  { %1097 = vmatpush.bf16.msrb.mxu1 %v3318_v50 }
 0x472   :  { %v813_v3 = vpop.f32.mrf.mxu2 }
 0x473   :  { %v817_v19 = vadd.f32 %v813_v3, %v4799_v55  ;;  %v3317_v55 = vld [vmem:[#allocation7 + $0x200] sm:$0xff] }
 0x474   :  { %1098 = vmatpush.bf16.msrb.mxu1 %v3317_v55 }
 0x475   :  { %v818_v20 = vpack.c.bf16 %v817_v19, %v816_v18 }
 0x477   :  { %931 = vmatmul.bf16.vlgmr.msra.gmra.mxu3 %v818_v20  ;;  %945 = vmatmul.bf16.vlgmr.msrb.gmra.mxu0 %v818_v20 }
 0x4f4   :  { %v946_v36 = vpop.f32.mrf.mxu0 }
 0x4f5   :  { %v947_v34 = vadd.f32 %v946_v36, %v840_v37  ;;  %v3485_v36 = vld [vmem:[#allocation11] ss:$0 sm:$0xff] }
 0x4f7   :  { %v952_v40 = vmax.f32 %v947_v34, 0.0  ;;  %v3486_v34 = vld [vmem:[#allocation13] ss:$0 sm:$0xff] }
 0x4fa   :  { %v932_v38 = vpop.f32.mrf.mxu3 }
 0x4fb   :  { %v933_v42 = vadd.f32 %v932_v38, %v839_v35 }
 0x4fc   :  { %v948_v39 = vpop.f32.mrf.mxu0 }
 0x4fd   :  { %v949_v33 = vadd.f32 %v948_v39, %v840_v37  ;;  %v951_v46 = vmax.f32 %v933_v42, 0.0 }
 0x4ff   :  { %v954_v41 = vmax.f32 %v949_v33, 0.0 }
 0x501   :  { %v956_v43 = vpack.c.bf16 %v954_v41, %v952_v40 }
 0x502   :  { %v934_v44 = vpop.f32.mrf.mxu3 }
 0x503   :  { %v935_v45 = vadd.f32 %v934_v44, %v839_v35  ;;  %1113 = vmatmul.bf16.vlgmr.msrb.gmra.mxu2 %v956_v43 }
 0x505   :  { %v953_v47 = vmax.f32 %v935_v45, 0.0 }
 0x507   :  { %v955_v48 = vpack.c.bf16 %v953_v47, %v951_v46 }
 0x509   :  { %1099 = vmatmul.bf16.vlgmr.msrb.gmra.mxu1 %v955_v48 }
 0x586   :  { %v1100_v54 = vpop.f32.mrf.mxu1  ;;  %v1114_v56 = vpop.f32.mrf.mxu2 }
 0x587   :  { %v1101_v58 = vadd.f32 %v3483_v57, %v1100_v54 }
 0x589   :  { %v1115_v11 = vadd.f32 %v1114_v56, %v1101_v58 }
 0x58e   :  { %v1102_v59 = vpop.f32.mrf.mxu1  ;;  %v1116_v9 = vpop.f32.mrf.mxu2 }
 0x58f   :  { %v1103_v6 = vadd.f32 %v3483_v57, %v1102_v59 }
 0x591   :  { %v1117_v13 = vadd.f32 %v1116_v9, %v1103_v6 }
 0x593   :  { %v1119_v15 = vpack.c.bf16 %v1117_v13, %v1115_v11 }
 0x595   :  { %1196 = vmatmul.bf16.vlgmr.msrb.gmra.mxu3 %v1119_v15 }
 0x618   :  { %v1197_v8 = vpop.f32.mrf.mxu3 }
 0x619   :  { %v1198_v14 = vadd.f32 %v3484_v5, %v1197_v8 }
 0x61b   :  { %1204 = vadd.xlane.f32.xlu0 %v1198_v14 }
 0x620   :  { %v1199_v16 = vpop.f32.mrf.mxu3 }
 0x621   :  { %v1200_v17 = vadd.f32 %v3484_v5, %v1199_v16 }
 0x623   :  { %1206 = vadd.xlane.f32.xlu0 %v1200_v17 }
 0x68e   :  { %v1205_v10 = vpop.xlane.xlu0 %1204 }
 0x68f   :  { %v1215_v7 = vmul.f32 %v4353_v1, %v1205_v10 }
 0x691   :  { %v1217_v12 = vsub.f32 %v1198_v14, %v1215_v7 }
 0x693   :  { %v1219_v2 = vmul.f32 %v1217_v12, %v1217_v12 }
 0x695   :  { %1221 = vadd.xlane.f32.xlu1 %v1219_v2 }
 0x696   :  { %v1207_v3 = vpop.xlane.xlu0 %1206 }
 0x697   :  { %v1216_v18 = vmul.f32 %v4353_v1, %v1207_v3 }
 0x699   :  { %v1218_v19 = vsub.f32 %v1200_v17, %v1216_v18 }
 0x69b   :  { %v1220_v20 = vmul.f32 %v1218_v19, %v1218_v19 }
 0x69d   :  { %1223 = vadd.xlane.f32.xlu1 %v1220_v20 }
 0x708   :  { %v1222_v21 = vpop.xlane.xlu1 %1221 }
 0x709   :  { %v1225_v25 = vmul.f32 %v1222_v21, %v4353_v1 }
 0x70b   :  { %v1227_v27 = vadd.f32 1e-05, %v1225_v25 }
 0x70d   :  { %3489 = vrsqrt.f32 %v1227_v27  ;;  %vm1235_vm6 = vweird.f32 %v1227_v27 }
 0x710   :  { %v1224_v22 = vpop.xlane.xlu1 %1223 }
 0x711   :  { %v1226_v23 = vmul.f32 %v1224_v22, %v4353_v1 }
 0x713   :  { %v3490_v24 = vpop.eup %3489  ;;  %v1228_v26 = vadd.f32 1e-05, %v1226_v23 }
 0x714   :  { %v1230_v50 = vmul.f32 %v3490_v24, %v1227_v27  ;;  %vm1236_vm5 = vweird.f32 %v3490_v24 }
 0x715   :  { %3491 = vrsqrt.f32 %v1228_v26  ;;  %vm1237_vm7 = vmor %vm1235_vm6, %vm1236_vm5  ;;  %vm1245_vm9 = vweird.f32 %v1228_v26 }
 0x716   :  { %v1231_v55 = vmul.f32 %v3490_v24, %v1230_v50 }
 0x718   :  { %v1232_v28 = vmul.f32 0.5, %v1231_v55 }
 0x71a   :  { %v1233_v29 = vsub.f32 1.5, %v1232_v28 }
 0x71b   :  { %v3492_v30 = vpop.eup %3491 }
 0x71c   :  { %v1234_v31 = vmul.f32 %v3490_v24, %v1233_v29  ;;  %v1240_v32 = vmul.f32 %v3492_v30, %v1228_v26  ;;  %vm1246_vm8 = vweird.f32 %v3492_v30 }
 0x71d   :  { %vm1247_vm10 = vmor %vm1245_vm9, %vm1246_vm8 }
 0x71e   :  { %v1238_v37 = vsel %vm1237_vm7, %v3490_v24, %v1234_v31  ;;  %v1241_v38 = vmul.f32 %v3492_v30, %v1240_v32 }
 0x71f   :  { %v1249_v39 = vmul.f32 %v1238_v37, %v1217_v12 }
 0x720   :  { %v1242_v35 = vmul.f32 0.5, %v1241_v38 }
 0x721   :  { %v1254_v33 = vmul.f32 %v3485_v36, %v1249_v39 }
 0x722   :  { %v1243_v40 = vsub.f32 1.5, %v1242_v35 }
 0x723   :  { %v1259_v41 = vadd.f32 %v3486_v34, %v1254_v33  }
 0x724   :  { %v1244_v42 = vmul.f32 %v3492_v30, %v1243_v40 }
 0x726   :  { %v1248_v43 = vsel %vm1247_vm10, %v3492_v30, %v1244_v42 }
 0x727   :  { %v1250_v44 = vmul.f32 %v1248_v43, %v1218_v19 }
 0x729   :  { %v1255_v45 = vmul.f32 %v3485_v36, %v1250_v44 }
 0x72b   :  { %v1260_v46 = vadd.f32 %v3486_v34, %v1255_v45  }
 0x72c LB: > { %s3341_s13 = smul.u32 192, %s3887_s29  ;;  %s3907_s22 = smov 64   ;;  %s3887_s29 = sphi %s4363_s29, %s1266_s29   ;;  %v3883_v41 = vphi %v1259_v41, %v4807_v41   ;;  %v3879_v46 = vphi %v1260_v46, %v4806_v46  }
 0x72d   : > { %s1324_s11 = smul.u32 3, %s3887_s29  ;;  %s3908_s15 = smov 96  }
 0x72e   : > { %s4375_s12 = scalar_lea.vmem [#allocation14], %s3341_s13  ;;  %s3366_s8 = sshll.u32 %s3887_s29, 6 }
 0x72f   : > { %v3063_v47 = vld [vmem:[%s4375_s12 + $0xa8] sm:$0xf]  ;;  %v3364_v48 = vld [vmem:[%s4375_s12 + $0xb0] sm:$0xf0]  ;;  %v3363_v49 = vld [vmem:[%s4375_s12 + $0xac] sm:$0xf]  ;;  %s1325_s10 = scalar_lea.vmem %s4746_s17, %s1324_s11  ;;  %s2142_s0 = scalar_lea.vmem %s4748_s19, %s3887_s29 }
 0x730   : > { %v3064_v51 = vor.u32 %v3364_v48, %v3063_v47  ;;  %v3065_v52 = vld [vmem:[%s4375_s12 + $0xb4] sm:$0xf0]  ;;  %v3051_v53 = vld [vmem:[%s4375_s12 + $0x90] sm:$0xf]  ;;  %v3361_v54 = vld [vmem:[%s4375_s12 + $0x98] sm:$0xf0]  ;;  %s2151_s28 = scalar_lea.vmem %s4749_s20, %s3887_s29  ;;  %s2153_s6 = scalar_lea.vmem %s4750_s21, %s3887_s29 }
 0x731   : > { %v3068_v56 = vor.u32 %v3363_v49, %v3065_v52  ;;  %v3360_v57 = vld [vmem:[%s4375_s12 + $0x94] sm:$0xf]  ;;  %v3053_v58 = vld [vmem:[%s4375_s12 + $0x9c] sm:$0xf0]  ;;  %v3052_v59 = vor.u32 %v3361_v54, %v3051_v53  ;;  %v3039_v9 = vld [vmem:[%s4375_s12 + $0x78] sm:$0xf]  ;;  %v1323_v52 = vpack.c.bf16 %v3879_v46, %v3883_v41 }
 0x732   : > { %1462 = vmatpush.bf16.msra.mxu0 %v3064_v51  ;;  %v3056_v6 = vor.u32 %v3360_v57, %v3053_v58  ;;  %v3358_v11 = vld [vmem:[%s4375_s12 + $0x80] sm:$0xf0]  ;;  %v3357_v13 = vld [vmem:[%s4375_s12 + $0x7c] sm:$0xf]  ;;  %v3041_v15 = vld [vmem:[%s4375_s12 + $0x84] sm:$0xf0] }
 0x733   : > { %1476 = vmatpush.bf16.msra.mxu1 %v3068_v56  ;;  %v3040_v5 = vor.u32 %v3358_v11, %v3039_v9  ;;  %v3044_v8 = vor.u32 %v3357_v13, %v3041_v15  ;;  %v3027_v14 = vld [vmem:[%s4375_s12 + $0x60] sm:$0xf]  ;;  %v3355_v16 = vld [vmem:[%s4375_s12 + $0x68] sm:$0xf0]  ;;  %v3354_v17 = vld [vmem:[%s4375_s12 + $0x64] sm:$0xf] }
 0x734   : > { %v3029_v60 = vld [vmem:[%s4375_s12 + $0x6c] sm:$0xf0]  ;;  %v3028_v4 = vor.u32 %v3355_v16, %v3027_v14  ;;  %v3365_v62 = vld [vmem:[%s4375_s12 + $0xb8] sm:$0xf0]  ;;  %v3059_v63 = vld [vmem:[%s4375_s12 + $0x98] sm:$0xf] }
 0x735   : > { %v3071_v61 = vld [vmem:[%s4375_s12 + $0xb0] sm:$0xf]  ;;  %v3362_v0 = vld [vmem:[%s4375_s12 + $0xa0] sm:$0xf0]  ;;  %v3032_v10 = vor.u32 %v3354_v17, %v3029_v60  ;;  %v3015_v7 = vld [vmem:[%s4375_s12 + $0x48] sm:$0xf] }
 0x736   : > { %1463 = vmatpush.bf16.msra.mxu0 %v3052_v59  ;;  %v3352_v12 = vld [vmem:[%s4375_s12 + $0x50] sm:$0xf0]  ;;  %v3072_v2 = vor.u32 %v3365_v62, %v3071_v61  ;;  %v3351_v3 = vld [vmem:[%s4375_s12 + $0x4c] sm:$0xf]  ;;  %v3017_v18 = vld [vmem:[%s4375_s12 + $0x54] sm:$0xf0]  ;;  %v3060_v19 = vor.u32 %v3362_v0, %v3059_v63 }
 0x737   : > { %1477 = vmatpush.bf16.msra.mxu1 %v3056_v6  ;;  %v3016_v20 = vor.u32 %v3352_v12, %v3015_v7  ;;  %v3047_v21 = vld [vmem:[%s4375_s12 + $0x80] sm:$0xf]  ;;  %v3359_v25 = vld [vmem:[%s4375_s12 + $0x88] sm:$0xf0]  ;;  %v3020_v27 = vor.u32 %v3351_v3, %v3017_v18  ;;  %v3003_v22 = vld [vmem:[%s4375_s12 + $0x30] sm:$0xf] }
 0x738   : > { %1490 = vmatpush.bf16.msra.mxu2 %v3072_v2  ;;  %v3349_v23 = vld [vmem:[%s4375_s12 + $0x38] sm:$0xf0]  ;;  %v3348_v24 = vld [vmem:[%s4375_s12 + $0x34] sm:$0xf]  ;;  %v3005_v26 = vld [vmem:[%s4375_s12 + $0x3c] sm:$0xf0]  ;;  %v3048_v50 = vor.u32 %v3359_v25, %v3047_v21 }
 0x739   : > { %v3004_v55 = vor.u32 %v3349_v23, %v3003_v22  ;;  %v3035_v28 = vld [vmem:[%s4375_s12 + $0x68] sm:$0xf]  ;;  %v3356_v29 = vld [vmem:[%s4375_s12 + $0x70] sm:$0xf0]  ;;  %v3008_v30 = vor.u32 %v3348_v24, %v3005_v26  ;;  %v2991_v31 = vld [vmem:[%s4375_s12 + $0x18] sm:$0xf] }
 0x73a   : > { %1464 = vmatpush.bf16.msra.mxu0 %v3040_v5  ;;  %v3346_v32 = vld [vmem:[%s4375_s12 + $0x20] sm:$0xf0]  ;;  %v3345_v36 = vld [vmem:[%s4375_s12 + $0x1c] sm:$0xf]  ;;  %v2993_v37 = vld [vmem:[%s4375_s12 + $0x24] sm:$0xf0]  ;;  %v3036_v38 = vor.u32 %v3356_v29, %v3035_v28 }
 0x73b   : > { %1478 = vmatpush.bf16.msra.mxu1 %v3044_v8  ;;  %v2992_v34 = vor.u32 %v3346_v32, %v2991_v31  ;;  %v3023_v39 = vld [vmem:[%s4375_s12 + $0x50] sm:$0xf]  ;;  %v3353_v35 = vld [vmem:[%s4375_s12 + $0x58] sm:$0xf0]  ;;  %v2996_v33 = vor.u32 %v3345_v36, %v2993_v37  ;;  %v2979_v40 = vld [vmem:[%s4375_s12] sm:$0xf] }
 0x73c   : > { %1491 = vmatpush.bf16.msra.mxu2 %v3060_v19  ;;  %v3343_v42 = vld [vmem:[%s4375_s12 + $0x8] sm:$0xf0]  ;;  %v3342_v43 = vld [vmem:[%s4375_s12 + $0x4] sm:$0xf]  ;;  %v2981_v44 = vld [vmem:[%s4375_s12 + $0xc] sm:$0xf0]  ;;  %v3024_v45 = vor.u32 %v3353_v35, %v3023_v39 }
 0x73d   : > { %v2980_v47 = vor.u32 %v3343_v42, %v2979_v40  ;;  %v3011_v48 = vld [vmem:[%s4375_s12 + $0x38] sm:$0xf]  ;;  %v3350_v49 = vld [vmem:[%s4375_s12 + $0x40] sm:$0xf0]  ;;  %v2984_v51 = vor.u32 %v3342_v43, %v2981_v44  ;;  %v2999_v54 = vld [vmem:[%s4375_s12 + $0x20] sm:$0xf] }
 0x73e   : > { %1465 = vmatpush.bf16.msra.mxu0 %v3028_v4  ;;  %v3012_v53 = vor.u32 %v3350_v49, %v3011_v48  ;;  %v3347_v56 = vld [vmem:[%s4375_s12 + $0x28] sm:$0xf0]  ;;  %v2987_v58 = vld [vmem:[%s4375_s12 + $0x8] sm:$0xf]  ;;  %v3344_v59 = vld [vmem:[%s4375_s12 + $0x10] sm:$0xf0] }
 0x73f   : > { %1479 = vmatpush.bf16.msra.mxu1 %v3032_v10  ;;  %v3000_v57 = vor.u32 %v3347_v56, %v2999_v54  ;;  %v2988_v6 = vor.u32 %v3344_v59, %v2987_v58  ;;  %v4431_v9 = vld [vmem:[%s1325_s10] sm:$0x7]  ;;  %s4468_s18 = scalar_lea.vmem [#allocation16], %s3366_s8  ;;  %s3909_s24 = smov 32  }
 0x740   : > { %1492 = vmatpush.bf16.msra.mxu2 %v3048_v50  ;;  %v1328_v11 = vperm.slane %v4431_v9, 0  ;;  %v1329_v13 = vperm.slane %v4431_v9, 1  ;;  %v1330_v4 = vperm.slane %v4431_v9, 2  ;;  %v4471_v28 = vld [vmem:[%s4468_s18 + $0x8] sm:$0xff]  ;;  %v4477_v31 = vld [vmem:[%s4468_s18] sm:$0xff]  ;;  %s3375_s5 = sshll.u32 %s3887_s29, 7 }
 0x741   : > { %s4608_s2 = scalar_lea.vmem [#allocation17], %s3375_s5  ;;  %s4650_s13 = scalar_lea.vmem [#allocation19], %s3375_s5 }
 0x742   : > { %1466 = vmatpush.bf16.msra.mxu0 %v3016_v20  ;;  %s3131_s8 = sshll.u32 %s3887_s29, 1 }
 0x743   : > { %1480 = vmatpush.bf16.msra.mxu1 %v3020_v27  ;;  %s2226_s7 = scalar_lea.vmem %s4752_s23, %s3131_s8 }
 0x744   : > { %1493 = vmatpush.bf16.msra.mxu2 %v3036_v38 }
 0x746   : > { %1467 = vmatpush.bf16.msra.mxu0 %v3004_v55 }
 0x747   : > { %1481 = vmatpush.bf16.msra.mxu1 %v3008_v30 }
 0x748   : > { %1494 = vmatpush.bf16.msra.mxu2 %v3024_v45 }
 0x74a   : > { %1468 = vmatpush.bf16.msra.mxu0 %v2992_v34 }
 0x74b   : > { %1482 = vmatpush.bf16.msra.mxu1 %v2996_v33 }
 0x74c   : > { %1495 = vmatpush.bf16.msra.mxu2 %v3012_v53 }
 0x74e   : > { %1469 = vmatpush.bf16.msra.mxu0 %v2980_v47 }
 0x74f   : > { %1483 = vmatpush.bf16.msra.mxu1 %v2984_v51 }
 0x750   : > { %1496 = vmatpush.bf16.msra.mxu2 %v3000_v57 }
 0x751   : > { %1470 = vmatmul.bf16.vlgmr.msra.gmra.mxu0 %v1323_v52 }
 0x752   : > { %1484 = vmatmul.bf16.vlgmr.msra.gmra.mxu1 %v1323_v52 }
 0x754   : > { %1497 = vmatpush.bf16.msra.mxu2 %v2988_v6 }
 0x757   : > { %1498 = vmatmul.bf16.vlgmr.msra.gmra.mxu2 %v1323_v52 }
 0x758   : > { %1668 = vmatpush.bf16.msrb.mxu2 %v4471_v28 }
 0x75c   : > { %1669 = vmatpush.bf16.msrb.mxu2 %v4477_v31 }
 0x7ce   : > { %v1471_v15 = vpop.f32.mrf.mxu0 }
 0x7cf   : > { %v1485_v5 = vpop.f32.mrf.mxu1  ;;  %v1472_v8 = vadd.f32 %v1471_v15, %v1328_v11 }
 0x7d0   : > { %v1486_v14 = vadd.f32 %v1485_v5, %v1329_v13 }
 0x7d1   : > { %v1504_v17 = vmul.f32 0.17677669, %v1472_v8 }
 0x7d2   : > { %v4439_v16 = vpack.c.bf16 %v1486_v14, %v1486_v14 }
 0x7d3   : > { %v4447_v61 = vpack.c.bf16 %v1504_v17, %v1504_v17  ;;  %v3369_v17 = vld [vmem:[%s4468_s18 + $0x10] sm:$0xff] }
 0x7d4   : > { %1677 = vrot.lane.b32.xlu2 %v4439_v16, %s3907_s22  ;;  %1563 = vrot.lane.b32.xlu1 %v4439_v16, %s3908_s15  ;;  %v1512_v60 = vsel %vm388_vm3, %v4439_v16, 0 }
 0x7d5   : > { %1521 = vmatpush.bf16.xpose.msra.mxu3 %v1512_v60  ;;  %v3372_v60 = vld [vmem:[%s4468_s18 + $0x28] sm:$0xff] }
 0x7da   : > { %v1499_v62 = vpop.f32.mrf.mxu2 }
 0x7db   : > { %v1500_v63 = vadd.f32 %v1499_v62, %v1330_v4 }
 0x7dc   : > { %1675 = vrot.lane.b32.xlu2 %v4447_v61, %s3907_s22  ;;  %1560 = vrot.lane.b32.xlu1 %v4447_v61, %s3908_s15 }
 0x7dd   : > { %3073 = vmatmul.msk.bf16.vlgmr.msra.gmra.mxu3 %vm388_vm3, %v4447_v61  ;;  %v4458_v0 = vpack.c.bf16 %v1500_v63, %v1500_v63 }
 0x7df   : > { %v1543_v10 = vsel %vm278_vm0, %v4458_v0, 0 }
 0x7e0   : > { %1552 = vmatpush.bf16.msrb.mxu3 %v1543_v10 }
 0x7e2   : > { %v1501_v42 = vpop.f32.mrf.mxu2 }
 0x7e3   : > { %v1502_v6 = vadd.f32 %v1501_v42, %v1330_v4 }
 0x7e5   : > { %v4496_v15 = vpack.c.bf16 %v1502_v6, %v1502_v6 }
 0x7e7   : > { %v1886_v14 = vsel %vm278_vm0, %v4496_v15, 0 }
 0x82e   : > { %v1678_v26 = vpop.permute.xlu2 %1677 }
 0x82f   : > { %v1683_v55 = vsel %vm388_vm3, %v1678_v26, 0 }
 0x836   : > { %v1676_v30 = vpop.permute.xlu2 %1675 }
 0x846   : > { %v1564_v7 = vpop.permute.xlu1 %1563 }
 0x847   : > { %v1569_v12 = vsel %vm388_vm3, %v1564_v7, 0 }
 0x848   : > { %1578 = vmatpush.bf16.xpose.msra.mxu3 %v1569_v12 }
 0x84e   : > { %v1561_v29 = vpop.permute.xlu1 %1560 }
 0x860   : > { %v1523_v2 = vpop.f32.mrf.mxu3 }
 0x861   : > { %v1527_v3 = vsel %vm274_vm1, %v1523_v2, -inf }
 0x862   : > { %1528 = vmax.xlane.f32.xlu0 %v1527_v3 }
 0x868   : > { %v1525_v18 = vpop.f32.mrf.mxu3 }
 0x8d5   : > { %v1529_v19 = vpop.xlane.xlu0 %1528 }
 0x8d6   : > { %v1530_v20 = vsub.f32 %v1523_v2, %v1529_v19 }
 0x8d8   : > { %v1531_v21 = vmul.f32 1.442695, %v1530_v20  ;;  %v3371_v20 = vld [vmem:[%s4468_s18 + $0x20] sm:$0xff] }
 0x8da   : > { %3499 = vpow2.f32 %v1531_v21  ;;  %v1473_v21 = vpop.f32.mrf.mxu0 }
 0x8e0   : > { %v3500_v25 = vpop.eup %3499 }
 0x8e1   : > { %v1533_v27 = vsel %vm274_vm1, %v3500_v25, 0.0 }
 0x8e2   : > { %1534 = vadd.xlane.f32.xlu0 %v1533_v27 }
 0x955   : > { %v1535_v22 = vpop.xlane.xlu0 %1534 }
 0x956   : > { %3501 = vrcp.f32 %v1535_v22 }
 0x95c   : > { %v3502_v23 = vpop.eup %3501 }
 0x95d   : > { %v1537_v24 = vmul.f32 %v3502_v23, %v3500_v25  ;;  %v1487_v25 = vpop.f32.mrf.mxu1 }
 0x95e   : > { %v1488_v27 = vadd.f32 %v1487_v25, %v1329_v13 }
 0x95f   : > { %v1538_v50 = vpack.c.bf16 %v1537_v24, %v1537_v24 }
 0x960   : > { %v1849_v22 = vpack.c.bf16 %v1488_v27, %v1488_v27 }
 0x961   : > { %3074 = vmatmul.msk.bf16.vlgmr.msrb.gmra.mxu3 %vm274_vm1, %v1538_v50 }
 0x962   : > { %1692 = vmatpush.bf16.xpose.msrb.mxu3 %v1683_v55  ;;  %v1855_v26 = vsel %vm388_vm3, %v1849_v22, 0 }
 0x971   : > { %3075 = vmatmul.msk.bf16.vlgmr.msra.gmra.mxu3 %vm388_vm3, %v1561_v29 }
 0x981   : > { %3095 = vmatmul.msk.bf16.vlgmr.msrb.gmra.mxu3 %vm388_vm3, %v1676_v30 }
 0x9e4   : > { %v1554_v32 = vpop.f32.mrf.mxu3 }
 0x9e5   : > { %v1558_v36 = vpack.c.bf16 %v1554_v32, %v1554_v32  ;;  %v1474_v32 = vadd.f32 %v1473_v21, %v1328_v11 }
 0x9e7   : > { %3094 = vmatmul.msk.bf16.vlgmr.msrb.gmra.mxu2 %vm388_vm3, %v1558_v36  ;;  %v1847_v36 = vmul.f32 0.17677669, %v1474_v32 }
 0x9ec   : > { %v1556_v37 = vpop.f32.mrf.mxu3 }
 0x9ed   : > { %v1848_v37 = vpack.c.bf16 %v1847_v36, %v1847_v36 }
 0x9f4   : > { %v1580_v38 = vpop.f32.mrf.mxu3 }
 0x9f5   : > { %v1584_v34 = vsel %vm274_vm1, %v1580_v38, -inf }
 0x9f6   : > { %1585 = vmax.xlane.f32.xlu0 %v1584_v34 }
 0x9fc   : > { %v1582_v39 = vpop.f32.mrf.mxu3 }
 0xa04   : > { %v1694_v35 = vpop.f32.mrf.mxu3 }
 0xa05   : > { %v1698_v33 = vsel %vm274_vm1, %v1694_v35, -inf }
 0xa06   : > { %1699 = vmax.xlane.f32.xlu1 %v1698_v33 }
 0xa0a   : > { %1597 = vrot.lane.b32.xlu0 %v4458_v0, %s3908_s15 }
 0xa0c   : > { %v1696_v40 = vpop.f32.mrf.mxu3 }
 0xa1f   : > { %1763 = vrot.lane.b32.xlu1 %v4439_v16, %s3909_s24  ;;  %v3370_v16 = vld [vmem:[%s4468_s18 + $0x18] sm:$0xff] }
 0xa20   : > { %1640 = vmatpush.bf16.msrb.mxu1 %v3370_v16 }
 0xa24   : > { %1641 = vmatpush.bf16.msrb.mxu1 %v3369_v17 }
 0xa28   : > { %1753 = vmatpush.bf16.msra.mxu1 %v3372_v60 }
 0xa2c   : > { %1754 = vmatpush.bf16.msra.mxu1 %v3371_v20 }
 0xa69   : > { %v1586_v43 = vpop.xlane.xlu0 %1585 }
 0xa6a   : > { %v1587_v44 = vsub.f32 %v1580_v38, %v1586_v43  ;;  %v4487_v45 = vpop.f32.mrf.mxu2 }
 0xa6c   : > { %v1588_v47 = vmul.f32 1.442695, %v1587_v44 }
 0xa6e   : > { %3503 = vpow2.f32 %v1588_v47 }
 0xa72   : > { %v1673_v48 = vpop.f32.mrf.mxu2 }
 0xa74   : > { %v3504_v49 = vpop.eup %3503 }
 0xa75   : > { %v1590_v51 = vsel %vm274_vm1, %v3504_v49, 0.0 }
 0xa76   : > { %1591 = vadd.xlane.f32.xlu2 %v1590_v51 }
 0xa79   : > { %v1700_v52 = vpop.xlane.xlu1 %1699 }
 0xa7a   : > { %v1701_v53 = vsub.f32 %v1694_v35, %v1700_v52 }
 0xa7c   : > { %v1702_v54 = vmul.f32 1.442695, %v1701_v53  ;;  %v1598_v56 = vpop.permute.xlu0 %1597 }
 0xa7d   : > { %v1603_v57 = vsel %vm278_vm0, %v1598_v56, 0 }
 0xa7e   : > { %3505 = vpow2.f32 %v1702_v54  ;;  %1612 = vmatpush.bf16.msrb.mxu0 %v1603_v57 }
 0xa84   : > { %v3506_v58 = vpop.eup %3505 }
 0xa85   : > { %v1704_v59 = vsel %vm274_vm1, %v3506_v58, 0.0 }
 0xa86   : > { %1705 = vadd.xlane.f32.xlu0 %v1704_v59 }
 0xa8e   : > { %1710 = vrot.lane.b32.xlu2 %v4458_v0, %s3907_s22 }
 0xa91   : > { %v1764_v5 = vpop.permute.xlu1 %1763 }
 0xa92   : > { %v1769_v8 = vsel %vm388_vm3, %v1764_v5, 0 }
 0xa93   : > { %1778 = vmatpush.bf16.xpose.msra.mxu2 %v1769_v8 }
 0xa96   : > { %1761 = vrot.lane.b32.xlu2 %v4447_v61, %s3909_s24 }
 0xa9b   : > { %1895 = vmatpush.bf16.msrb.mxu2 %v1886_v14 }
 0xae9   : > { %v1592_v4 = vpop.xlane.xlu2 %1591 }
 0xaea   : > { %3507 = vrcp.f32 %v1592_v4 }
 0xaf0   : > { %v3508_v62 = vpop.eup %3507 }
 0xaf1   : > { %v1711_v63 = vpop.permute.xlu2 %1710  ;;  %v1594_v10 = vmul.f32 %v3508_v62, %v3504_v49 }
 0xaf2   : > { %v1716_v7 = vsel %vm278_vm0, %v1711_v63, 0 }
 0xaf3   : > { %1725 = vmatpush.bf16.msra.mxu0 %v1716_v7  ;;  %v1595_v12 = vpack.c.bf16 %v1594_v10, %v1594_v10 }
 0xaf5   : > { %3076 = vmatmul.msk.bf16.vlgmr.msrb.gmra.mxu0 %vm274_vm1, %v1595_v12 }
 0xaf9   : > { %v1762_v2 = vpop.permute.xlu2 %1761  ;;  %v1706_v61 = vpop.xlane.xlu0 %1705 }
 0xafa   : > { %3509 = vrcp.f32 %v1706_v61  ;;  %3106 = vmatmul.msk.bf16.vlgmr.msra.gmra.mxu2 %vm388_vm3, %v1762_v2  ;;  %v4545_v61 = vld [vmem:[%s4468_s18 + $0x38] sm:$0xff] }
 0xafb   : > { %1987 = vmatpush.bf16.msra.mxu2 %v4471_v28  ;;  %1839 = vmatpush.bf16.msrb.mxu0 %v4545_v61 }
 0xaff   : > { %1988 = vmatpush.bf16.msra.mxu2 %v4477_v31 }
 0xb00   : > { %v3510_v3 = vpop.eup %3509 }
 0xb01   : > { %v1708_v18 = vmul.f32 %v3510_v3, %v3506_v58  ;;  %v4549_v3 = vld [vmem:[%s4468_s18 + $0x30] sm:$0xff] }
 0xb02   : > { %1840 = vmatpush.bf16.msrb.mxu0 %v4549_v3 }
 0xb03   : > { %v1709_v19 = vpack.c.bf16 %v1708_v18, %v1708_v18 }
 0xb05   : > { %3096 = vmatmul.msk.bf16.vlgmr.msra.gmra.mxu0 %vm274_vm1, %v1709_v19 }
 0xb72   : > { %v1614_v23 = vpop.f32.mrf.mxu0 }
 0xb73   : > { %v1618_v24 = vpack.c.bf16 %v1614_v23, %v1614_v23 }
 0xb75   : > { %3085 = vmatmul.msk.bf16.vlgmr.msrb.gmra.mxu1 %vm388_vm3, %v1618_v24 }
 0xb76   : > { %1864 = vmatpush.bf16.xpose.msrb.mxu1 %v1855_v26 }
 0xb7a   : > { %v1616_v50 = vpop.f32.mrf.mxu0 }
 0xb7d   : > { %v1780_v55 = vpop.f32.mrf.mxu2 }
 0xb7e   : > { %v1784_v28 = vsel %vm274_vm1, %v1780_v55, -inf }
 0xb7f   : > { %1785 = vmax.xlane.f32.xlu2 %v1784_v28 }
 0xb82   : > { %v1727_v29 = vpop.f32.mrf.mxu0 }
 0xb83   : > { %v1731_v30 = vpack.c.bf16 %v1727_v29, %v1727_v29 }
 0xb85   : > { %3105 = vmatmul.msk.bf16.vlgmr.msra.gmra.mxu1 %vm388_vm3, %v1731_v30  ;;  %v1782_v31 = vpop.f32.mrf.mxu2  ;;  %v4565_v30 = vld [vmem:[%s2142_s0] ss:$0 sm:$0xff] }
 0xb86   : > { %1971 = vmatpush.bf16.msra.mxu1 %v3370_v16 }
 0xb8a   : > { %v1729_v13 = vpop.f32.mrf.mxu0  ;;  %1972 = vmatpush.bf16.msra.mxu1 %v3369_v17 }
 0xb95   : > { %3117 = vmatmul.msk.bf16.vlgmr.msrb.gmra.mxu1 %vm388_vm3, %v1848_v37 }
 0xb96   : > { %2060 = vmatpush.bf16.msrb.mxu1 %v3372_v60 }
 0xb97   : > { %1996 = vrot.lane.b32.xlu2 %v1849_v22, %s3907_s22 }
 0xb9a   : > { %2061 = vmatpush.bf16.msrb.mxu1 %v3371_v20 }
 0xbf2   : > { %v1643_v38 = vpop.f32.mrf.mxu1  ;;  %v1786_v43 = vpop.xlane.xlu2 %1785 }
 0xbf3   : > { %v1672_v39 = vadd.f32 %v4487_v45, %v1643_v38  ;;  %v1787_v48 = vsub.f32 %v1780_v55, %v1786_v43 }
 0xbf5   : > { %v1788_v51 = vmul.f32 1.442695, %v1787_v48 }
 0xbfa   : > { %v1645_v34 = vpop.f32.mrf.mxu1  ;;  %v1997_v17 = vpop.permute.xlu2 %1996 }
 0xbfb   : > { %v2002_v62 = vsel %vm388_vm3, %v1997_v17, 0 }
 0xc02   : > { %v1756_v35 = vpop.f32.mrf.mxu1 }
 0xc03   : > { %v4524_v33 = vadd.f32 %v1756_v35, %v1672_v39 }
 0xc0a   : > { %v1758_v40 = vpop.f32.mrf.mxu1 }
 0xc12   : > { %v1866_v42 = vpop.f32.mrf.mxu1 }
 0xc13   : > { %v1870_v9 = vsel %vm274_vm1, %v1866_v42, -inf }
 0xc14   : > { %1871 = vmax.xlane.f32.xlu1 %v1870_v9 }
 0xc1a   : > { %v1868_v11 = vpop.f32.mrf.mxu1 }
 0xc2d   : > { %1903 = vrot.lane.b32.xlu1 %v1848_v37, %s3908_s15 }
 0xc87   : > { %v1872_v44 = vpop.xlane.xlu1 %1871 }
 0xc88   : > { %v1873_v47 = vsub.f32 %v1866_v42, %v1872_v44 }
 0xc8a   : > { %v1874_v49 = vmul.f32 1.442695, %v1873_v47 }
 0xc8c   : > { %3511 = vpow2.f32 %v1874_v49 }
 0xc8d   : > { %3513 = vpow2.f32 %v1788_v51 }
 0xc92   : > { %v3512_v52 = vpop.eup %3511 }
 0xc93   : > { %v1876_v45 = vsel %vm274_vm1, %v3512_v52, 0.0  ;;  %v3514_v53 = vpop.eup %3513 }
 0xc94   : > { %1877 = vadd.xlane.f32.xlu0 %v1876_v45  ;;  %v1790_v54 = vsel %vm274_vm1, %v3514_v53, 0.0 }
 0xc9c   : > { %1791 = vadd.xlane.f32.xlu0 %v1790_v54 }
 0xc9f   : > { %v1904_v7 = vpop.permute.xlu1 %1903 }
 0xcb0   : > { %1796 = vrot.lane.b32.xlu0 %v4458_v0, %s3909_s24 }
 0xcb8   : > { %1906 = vrot.lane.b32.xlu0 %v1849_v22, %s3908_s15 }
 0xcc0   : > { %2070 = vrot.lane.b32.xlu0 %v1849_v22, %s3909_s24 }
 0xcc8   : > { %2068 = vrot.lane.b32.xlu0 %v1848_v37, %s3909_s24 }
 0xcd0   : > { %1994 = vrot.lane.b32.xlu0 %v1848_v37, %s3907_s22 }
 0xd07   : > { %v1878_v56 = vpop.xlane.xlu0 %1877 }
 0xd08   : > { %3515 = vrcp.f32 %v1878_v56 }
 0xd0e   : > { %v3516_v57 = vpop.eup %3515 }
 0xd0f   : > { %v1880_v58 = vmul.f32 %v3516_v57, %v3512_v52  ;;  %v1792_v6 = vpop.xlane.xlu0 %1791 }
 0xd10   : > { %3517 = vrcp.f32 %v1792_v6 }
 0xd11   : > { %v1881_v59 = vpack.c.bf16 %v1880_v58, %v1880_v58 }
 0xd13   : > { %3118 = vmatmul.msk.bf16.vlgmr.msrb.gmra.mxu2 %vm274_vm1, %v1881_v59 }
 0xd16   : > { %v3518_v5 = vpop.eup %3517 }
 0xd17   : > { %v1794_v8 = vmul.f32 %v3518_v5, %v3514_v53 }
 0xd19   : > { %v1795_v16 = vpack.c.bf16 %v1794_v8, %v1794_v8 }
 0xd22   : > { %v1797_v0 = vpop.permute.xlu0 %1796 }
 0xd23   : > { %v1802_v14 = vsel %vm278_vm0, %v1797_v0, 0 }
 0xd24   : > { %1811 = vmatpush.bf16.msra.mxu3 %v1802_v14 }
 0xd27   : > { %3107 = vmatmul.msk.bf16.vlgmr.msra.gmra.mxu3 %vm274_vm1, %v1795_v16 }
 0xd2a   : > { %v1907_v60 = vpop.permute.xlu0 %1906 }
 0xd2b   : > { %v1912_v4 = vsel %vm388_vm3, %v1907_v60, 0 }
 0xd2c   : > { %1921 = vmatpush.bf16.xpose.msrb.mxu3 %v1912_v4 }
 0xd32   : > { %v2071_v63 = vpop.permute.xlu0 %2070 }
 0xd33   : > { %v2076_v10 = vsel %vm388_vm3, %v2071_v63, 0 }
 0xd34   : > { %2011 = vmatpush.bf16.xpose.msra.mxu3 %v2002_v62  ;;  %2085 = vmatpush.bf16.xpose.msrb.mxu2 %v2076_v10 }
 0xd37   : > { %3119 = vmatmul.msk.bf16.vlgmr.msrb.gmra.mxu3 %vm388_vm3, %v1904_v7 }
 0xd3a   : > { %v2069_v12 = vpop.permute.xlu0 %2068 }
 0xd42   : > { %v1995_v2 = vpop.permute.xlu0 %1994 }
 0xd47   : > { %3123 = vmatmul.msk.bf16.vlgmr.msra.gmra.mxu3 %vm388_vm3, %v1995_v2 }
 0xd96   : > { %v1897_v18 = vpop.f32.mrf.mxu2 }
 0xd97   : > { %v1901_v19 = vpack.c.bf16 %v1897_v18, %v1897_v18 }
 0xd99   : > { %3122 = vmatmul.msk.bf16.vlgmr.msra.gmra.mxu2 %vm388_vm3, %v1901_v19 }
 0xd9e   : > { %v1899_v20 = vpop.f32.mrf.mxu2 }
 0xda9   : > { %3126 = vmatmul.msk.bf16.vlgmr.msrb.gmra.mxu2 %vm388_vm3, %v2069_v12 }
 0xdaa   : > { %v1813_v21 = vpop.f32.mrf.mxu3 }
 0xdab   : > { %v1817_v25 = vpack.c.bf16 %v1813_v21, %v1813_v21 }
 0xdad   : > { %3116 = vmatmul.msk.bf16.vlgmr.msrb.gmra.mxu0 %vm388_vm3, %v1817_v25 }
 0xdb2   : > { %v1815_v27 = vpop.f32.mrf.mxu3 }
 0xdba   : > { %v1923_v22 = vpop.f32.mrf.mxu3 }
 0xdbb   : > { %v1927_v23 = vsel %vm274_vm1, %v1923_v22, -inf }
 0xdbc   : > { %1928 = vmax.xlane.f32.xlu1 %v1927_v23 }
 0xdc2   : > { %v1925_v24 = vpop.f32.mrf.mxu3 }
 0xdca   : > { %v2013_v26 = vpop.f32.mrf.mxu3 }
 0xdcb   : > { %v2017_v50 = vsel %vm274_vm1, %v2013_v26, -inf }
 0xdcc   : > { %2018 = vmax.xlane.f32.xlu2 %v2017_v50 }
 0xdd2   : > { %v2015_v55 = vpop.f32.mrf.mxu3 }
 0xde4   : > { %1940 = vrot.lane.b32.xlu2 %v4496_v15, %s3908_s15  ;;  %s2381_s15 = scalar_lea.vmem %s4754_s25, %s3887_s29 }
 0xe1c   : > { %v4563_v28 = vpop.f32.mrf.mxu2 }
 0xe24   : > { %v1992_v29 = vpop.f32.mrf.mxu2 }
 0xe2a   : > { %v1842_v31 = vpop.f32.mrf.mxu0 }
 0xe2b   : > { %v1846_v13 = vadd.f32 %v1842_v31, %v4524_v33 }
 0xe2c   : > { %v2087_v32 = vpop.f32.mrf.mxu2 }
 0xe2d   : > { %v2147_v36 = vadd.f32 %v4565_v30, %v1846_v13  ;;  %v2091_v37 = vsel %vm274_vm1, %v2087_v32, -inf }
 0xe2e   : > { %2092 = vmax.xlane.f32.xlu0 %v2091_v37 }
 0xe2f   : > { %v1929_v38 = vpop.xlane.xlu1 %1928  ;;  %v2149_v34 = vadd.f32 %v3883_v41, %v2147_v36 }
 0xe30   : > { %v1930_v39 = vsub.f32 %v1923_v22, %v1929_v38  ;;  %v3391_v38 = vld [vmem:[%s4608_s2 + $0x74] sm:$0xf0] }
 0xe31   : > { %2155 = vadd.xlane.f32.xlu2 %v2149_v34 }
 0xe32   : > { %v1931_v35 = vmul.f32 1.442695, %v1930_v39  ;;  %v1844_v40 = vpop.f32.mrf.mxu0  ;;  %v3192_v39 = vld [vmem:[%s4608_s2 + $0x78] sm:$0xf0] }
 0xe34   : > { %3519 = vpow2.f32 %v1931_v35  ;;  %v2089_v42 = vpop.f32.mrf.mxu2 }
 0xe3a   : > { %v3520_v9 = vpop.eup %3519 }
 0xe3b   : > { %v1933_v11 = vsel %vm274_vm1, %v3520_v9, 0.0 }
 0xe3c   : > { %1934 = vadd.xlane.f32.xlu1 %v1933_v11  ;;  %v3182_v11 = vld [vmem:[%s4608_s2 + $0x60] sm:$0xf] }
 0xe3f   : > { %v2019_v33 = vpop.xlane.xlu2 %2018 }
 0xe40   : > { %v2020_v43 = vsub.f32 %v2013_v26, %v2019_v33  ;;  %v3389_v33 = vld [vmem:[%s4608_s2 + $0x64] sm:$0xf0] }
 0xe42   : > { %v2021_v44 = vmul.f32 1.442695, %v2020_v43  ;;  %v3388_v43 = vld [vmem:[%s4608_s2 + $0x64] sm:$0xf] }
 0xe44   : > { %3521 = vpow2.f32 %v2021_v44  ;;  %v3183_v44 = vor.u32 %v3389_v33, %v3182_v11 }
 0xe47   : > { %v1941_v47 = vpop.permute.xlu2 %1940 }
 0xe48   : > { %v1946_v48 = vsel %vm278_vm0, %v1941_v47, 0  ;;  %v3184_v47 = vld [vmem:[%s4608_s2 + $0x68] sm:$0xf0] }
 0xe49   : > { %1955 = vmatpush.bf16.msra.mxu0 %v1946_v48  ;;  %v3187_v48 = vor.u32 %v3388_v43, %v3184_v47 }
 0xe4a   : > { %v3522_v49 = vpop.eup %3521 }
 0xe4b   : > { %v2023_v41 = vsel %vm274_vm1, %v3522_v49, 0.0 }
 0xe4c   : > { %2024 = vadd.xlane.f32.xlu1 %v2023_v41  ;;  %v3387_v41 = vld [vmem:[%s4608_s2 + $0x54] sm:$0xf0] }
 0xe65   : > { %2029 = vrot.lane.b32.xlu1 %v4496_v15, %s3907_s22 }
 0xea1   : > { %v2093_v51 = vpop.xlane.xlu0 %2092 }
 0xea2   : > { %v2094_v52 = vsub.f32 %v2087_v32, %v2093_v51  ;;  %v3386_v51 = vld [vmem:[%s4608_s2 + $0x54] sm:$0xf] }
 0xea4   : > { %v2095_v45 = vmul.f32 1.442695, %v2094_v52  ;;  %v2156_v53 = vpop.xlane.xlu2 %2155 }
 0xea5   : > { %v2159_v54 = vmul.f32 %v2156_v53, %v4353_v1 }
 0xea6   : > { %3523 = vpow2.f32 %v2095_v45  ;;  %v3176_v45 = vld [vmem:[%s4608_s2 + $0x58] sm:$0xf0] }
 0xea7   : > { %v4577_v56 = vsub.f32 %v2149_v34, %v2159_v54  ;;  %v3390_v34 = vld [vmem:[%s4608_s2 + $0x74] sm:$0xf]  ;;  %v3179_v54 = vor.u32 %v3386_v51, %v3176_v45 }
 0xea9   : > { %v2163_v57 = vmul.f32 %v4577_v56, %v4577_v56 }
 0xeab   : > { %2165 = vadd.xlane.f32.xlu1 %v2163_v57  ;;  %v3166_v57 = vld [vmem:[%s4608_s2 + $0x40] sm:$0xf] }
 0xeac   : > { %v3524_v58 = vpop.eup %3523 }
 0xead   : > { %v2097_v59 = vsel %vm274_vm1, %v3524_v58, 0.0 }
 0xeae   : > { %2098 = vadd.xlane.f32.xlu0 %v2097_v59  ;;  %v3384_v59 = vld [vmem:[%s4608_s2 + $0x44] sm:$0xf] }
 0xeaf   : > { %v1935_v6 = vpop.xlane.xlu1 %1934 }
 0xeb0   : > { %3525 = vrcp.f32 %v1935_v6 }
 0xeb6   : > { %v3526_v5 = vpop.eup %3525 }
 0xeb7   : > { %v1937_v8 = vmul.f32 %v3526_v5, %v3520_v9 }
 0xeb9   : > { %v1938_v0 = vpack.c.bf16 %v1937_v8, %v1937_v8  ;;  %v3168_v8 = vld [vmem:[%s4608_s2 + $0x48] sm:$0xf0] }
 0xebb   : > { %3120 = vmatmul.msk.bf16.vlgmr.msra.gmra.mxu0 %vm274_vm1, %v1938_v0  ;;  %v3171_v0 = vor.u32 %v3384_v59, %v3168_v8  ;;  %v3404_v8 = vld [vmem:[%s4650_s13 + $0x58] sm:$0xff] }
 0xebf   : > { %v2025_v14 = vpop.xlane.xlu1 %2024 }
 0xec0   : > { %3527 = vrcp.f32 %v2025_v14  ;;  %v3158_v14 = vld [vmem:[%s4608_s2 + $0x30] sm:$0xf] }
 0xec2   : > { %2103 = vrot.lane.b32.xlu0 %v4496_v15, %s3909_s24 }
 0xec6   : > { %v3528_v16 = vpop.eup %3527 }
 0xec7   : > { %v2027_v17 = vmul.f32 %v3528_v16, %v3522_v49  ;;  %v3174_v49 = vld [vmem:[%s4608_s2 + $0x50] sm:$0xf]  ;;  %v3383_v16 = vld [vmem:[%s4608_s2 + $0x34] sm:$0xf0] }
 0xec8   : > { %v3175_v52 = vor.u32 %v3387_v41, %v3174_v49  ;;  %v3494_v41 = vld [vmem:[%s2151_s28] ss:$0 sm:$0xff]  ;;  %s2512_s28 = scalar_lea.vmem %s4755_s26, %s3887_s29 }
 0xec9   : > { %v2028_v62 = vpack.c.bf16 %v2027_v17, %v2027_v17  ;;  %v3382_v17 = vld [vmem:[%s4608_s2 + $0x34] sm:$0xf] }
 0xed7   : > { %v2030_v60 = vpop.permute.xlu1 %2029 }
 0xed8   : > { %v2035_v4 = vsel %vm278_vm0, %v2030_v60, 0 }
 0xed9   : > { %2044 = vmatpush.bf16.msrb.mxu0 %v2035_v4  ;;  %v3159_v4 = vor.u32 %v3383_v16, %v3158_v14  ;;  %v3403_v14 = vld [vmem:[%s4650_s13 + $0x50] sm:$0xff]  ;;  %v3393_v16 = vld [vmem:[%s4650_s13] sm:$0xff] }
 0xedc   : > { %3124 = vmatmul.msk.bf16.vlgmr.msrb.gmra.mxu0 %vm274_vm1, %v2028_v62  ;;  %v3160_v62 = vld [vmem:[%s4608_s2 + $0x38] sm:$0xf0] }
 0xedd   : > { %2134 = vmatpush.bf16.msra.mxu0 %v4545_v61 }
 0xee1   : > { %2135 = vmatpush.bf16.msra.mxu0 %v4549_v3 }
 0xf1e   : > { %v2166_v53 = vpop.xlane.xlu1 %2165 }
 0xf1f   : > { %v2169_v6 = vmul.f32 %v2166_v53, %v4353_v1 }
 0xf21   : > { %v2099_v63 = vpop.xlane.xlu0 %2098  ;;  %v2171_v60 = vadd.f32 1e-05, %v2169_v6  ;;  %v3405_v6 = vld [vmem:[%s4650_s13 + $0x60] sm:$0xff] }
 0xf22   : > { %3529 = vrcp.f32 %v2099_v63  ;;  %v3163_v63 = vor.u32 %v3382_v17, %v3160_v62  ;;  %v3402_v17 = vld [vmem:[%s4650_s13 + $0x48] sm:$0xff] }
 0xf23   : > { %3531 = vrsqrt.f32 %v2171_v60  ;;  %vm2179_vm12 = vweird.f32 %v2171_v60 }
 0xf28   : > { %v3530_v10 = vpop.eup %3529 }
 0xf29   : > { %v2101_v7 = vmul.f32 %v3530_v10, %v3524_v58  ;;  %v3385_v58 = vld [vmem:[%s4608_s2 + $0x44] sm:$0xf0]  ;;  %v3150_v10 = vld [vmem:[%s4608_s2 + $0x20] sm:$0xf] }
 0xf2a   : > { %v3167_v5 = vor.u32 %v3385_v58, %v3166_v57 }
 0xf2b   : > { %v2102_v2 = vpack.c.bf16 %v2101_v7, %v2101_v7  ;;  %v3381_v7 = vld [vmem:[%s4608_s2 + $0x24] sm:$0xf0] }
 0xf34   : > { %v2104_v15 = vpop.permute.xlu0 %2103 }
 0xf35   : > { %v2109_v12 = vsel %vm278_vm0, %v2104_v15, 0  ;;  %v3380_v15 = vld [vmem:[%s4608_s2 + $0x24] sm:$0xf] }
 0xf36   : > { %2118 = vmatpush.bf16.msrb.mxu3 %v2109_v12  ;;  %v3151_v12 = vor.u32 %v3381_v7, %v3150_v10 }
 0xf38   : > { %v1957_v18 = vpop.f32.mrf.mxu0 }
 0xf39   : > { %v1961_v19 = vpack.c.bf16 %v1957_v18, %v1957_v18  ;;  %3127 = vmatmul.msk.bf16.vlgmr.msrb.gmra.mxu3 %vm274_vm1, %v2102_v2  ;;  %v3152_v2 = vld [vmem:[%s4608_s2 + $0x28] sm:$0xf0] }
 0xf3a   : > { %v3155_v18 = vor.u32 %v3380_v15, %v3152_v2 }
 0xf3b   : > { %3121 = vmatmul.msk.bf16.vlgmr.msra.gmra.mxu1 %vm388_vm3, %v1961_v19  ;;  %v3142_v19 = vld [vmem:[%s4608_s2 + $0x10] sm:$0xf] }
 0xf40   : > { %v1959_v61 = vpop.f32.mrf.mxu0 }
 0xf41   : > { %v3379_v61 = vld [vmem:[%s4608_s2 + $0x14] sm:$0xf0] }
 0xf59   : > { %v2046_v20 = vpop.f32.mrf.mxu0 }
 0xf5a   : > { %v2050_v21 = vpack.c.bf16 %v2046_v20, %v2046_v20  ;;  %v3378_v20 = vld [vmem:[%s4608_s2 + $0x14] sm:$0xf] }
 0xf5c   : > { %3125 = vmatmul.msk.bf16.vlgmr.msrb.gmra.mxu1 %vm388_vm3, %v2050_v21  ;;  %v3143_v21 = vor.u32 %v3379_v61, %v3142_v19 }
 0xf61   : > { %v2048_v3 = vpop.f32.mrf.mxu0 }
 0xf62   : > { %v3144_v3 = vld [vmem:[%s4608_s2 + $0x18] sm:$0xf0] }
 0xfb8   : > { %v1974_v25 = vpop.f32.mrf.mxu1 }
 0xfb9   : > { %v1991_v26 = vadd.f32 %v4563_v28, %v1974_v25  ;;  %v3190_v28 = vld [vmem:[%s4608_s2 + $0x70] sm:$0xf]  ;;  %v3134_v25 = vld [vmem:[%s4608_s2] sm:$0xf] }
 0xfbc   : > { %v2120_v27 = vpop.f32.mrf.mxu3 }
 0xfbd   : > { %v2124_v22 = vpack.c.bf16 %v2120_v27, %v2120_v27  ;;  %v3377_v27 = vld [vmem:[%s4608_s2 + $0x4] sm:$0xf0] }
 0xfbf   : > { %3128 = vmatmul.msk.bf16.vlgmr.msra.gmra.mxu0 %vm388_vm3, %v2124_v22  ;;  %v3147_v22 = vor.u32 %v3378_v20, %v3144_v3 }
 0xfc0   : > { %v1976_v23 = vpop.f32.mrf.mxu1 }
 0xfc1   : > { %v3376_v23 = vld [vmem:[%s4608_s2 + $0x4] sm:$0xf] }
 0xfc4   : > { %v2122_v24 = vpop.f32.mrf.mxu3 }
 0xfc5   : > { %v3136_v24 = vld [vmem:[%s4608_s2 + $0x8] sm:$0xf0] }
 0xfd9   : > { %v2063_v50 = vpop.f32.mrf.mxu1 }
 0xfda   : > { %v2067_v55 = vadd.f32 %v2063_v50, %v1991_v26  ;;  %v3532_v26 = vpop.eup %3531  ;;  %v3135_v50 = vor.u32 %v3377_v27, %v3134_v25 }
 0xfdb   : > { %vm2180_vm11 = vweird.f32 %v3532_v26 }
 0xfdc   : > { %vm2181_vm13 = vmor %vm2179_vm12, %vm2180_vm11 }
 0xfe1   : > { %v2065_v29 = vpop.f32.mrf.mxu1 }
 0xfe2   : > { %v2174_v29 = vmul.f32 %v3532_v26, %v2171_v60  ;;  %v3401_v60 = vld [vmem:[%s4650_s13 + $0x40] sm:$0xff] }
0x103c   : > { %v2137_v31 = vpop.f32.mrf.mxu0 }
0x103d   : > { %v2141_v13 = vadd.f32 %v2137_v31, %v2067_v55  ;;  %v3139_v55 = vor.u32 %v3376_v23, %v3136_v24  ;;  %v3400_v31 = vld [vmem:[%s4650_s13 + $0x38] sm:$0xff]  ;;  %v3496_v23 = vld [vmem:[%s2381_s15] ss:$0 sm:$0xff] }
0x103e   : > { %2482 = vmatpush.bf16.msra.mxu3 %v3400_v31 }
0x103f   : > { %v2148_v32 = vadd.f32 %v4565_v30, %v2141_v13  ;;  %v3191_v30 = vor.u32 %v3391_v38, %v3190_v28  ;;  %v3408_v13 = vld [vmem:[%s4650_s13 + $0x78] sm:$0xff]  ;;  %v3399_v28 = vld [vmem:[%s4650_s13 + $0x30] sm:$0xff] }
0x1040   : > { %2496 = vmatpush.bf16.msrb.mxu0 %v3408_v13  ;;  %v3407_v38 = vld [vmem:[%s4650_s13 + $0x70] sm:$0xff] }
0x1041   : > { %v2150_v36 = vadd.f32 %v3879_v46, %v2148_v32  ;;  %v3195_v46 = vor.u32 %v3390_v34, %v3192_v39  ;;  %2313 = vmatpush.bf16.msra.mxu1 %v3191_v30  ;;  %v2175_v32 = vmul.f32 %v3532_v26, %v2174_v29  ;;  %v3398_v39 = vld [vmem:[%s4650_s13 + $0x28] sm:$0xff] }
0x1042   : > { %2483 = vmatpush.bf16.msra.mxu3 %v3399_v28 }
0x1043   : > { %2157 = vadd.xlane.f32.xlu0 %v2150_v36  ;;  %2327 = vmatpush.bf16.msra.mxu2 %v3195_v46  ;;  %v2176_v30 = vmul.f32 0.5, %v2175_v32  ;;  %v3406_v46 = vld [vmem:[%s4650_s13 + $0x68] sm:$0xff] }
0x1044   : > { %v2139_v37 = vpop.f32.mrf.mxu0  ;;  %2497 = vmatpush.bf16.msrb.mxu0 %v3407_v38 }
0x1045   : > { %2314 = vmatpush.bf16.msra.mxu1 %v3183_v44 }
0x1046   : > { %2484 = vmatpush.bf16.msra.mxu3 %v3398_v39 }
0x1047   : > { %2328 = vmatpush.bf16.msra.mxu2 %v3187_v48 }
0x1048   : > { %2498 = vmatpush.bf16.msrb.mxu0 %v3406_v46 }
0x1049   : > { %2315 = vmatpush.bf16.msra.mxu1 %v3175_v52 }
0x104b   : > { %2329 = vmatpush.bf16.msra.mxu2 %v3179_v54 }
0x104c   : > { %2499 = vmatpush.bf16.msrb.mxu0 %v3405_v6 }
0x104d   : > { %2316 = vmatpush.bf16.msra.mxu1 %v3167_v5  ;;  %v3395_v5 = vld [vmem:[%s4650_s13 + $0x10] sm:$0xff] }
0x104f   : > { %2330 = vmatpush.bf16.msra.mxu2 %v3171_v0  ;;  %v3394_v0 = vld [vmem:[%s4650_s13 + $0x8] sm:$0xff] }
0x1050   : > { %2500 = vmatpush.bf16.msrb.mxu0 %v3404_v8 }
0x1051   : > { %2317 = vmatpush.bf16.msra.mxu1 %v3159_v4  ;;  %v2227_v4 = vld [vmem:[%s2226_s7] sm:$0x3] }
0x1053   : > { %2331 = vmatpush.bf16.msra.mxu2 %v3163_v63  ;;  %v2229_v63 = vperm.slane %v2227_v4, 0 }
0x1054   : > { %2501 = vmatpush.bf16.msrb.mxu0 %v3403_v14 }
0x1055   : > { %2318 = vmatpush.bf16.msra.mxu1 %v3151_v12  ;;  %v2230_v12 = vperm.slane %v2227_v4, 1 }
0x1057   : > { %2332 = vmatpush.bf16.msra.mxu2 %v3155_v18 }
0x1058   : > { %2502 = vmatpush.bf16.msrb.mxu0 %v3402_v17 }
0x1059   : > { %2319 = vmatpush.bf16.msra.mxu1 %v3143_v21 }
0x105b   : > { %2333 = vmatpush.bf16.msra.mxu2 %v3147_v22 }
0x105c   : > { %2503 = vmatpush.bf16.msrb.mxu0 %v3401_v60 }
0x105d   : > { %2320 = vmatpush.bf16.msra.mxu1 %v3135_v50 }
0x105f   : > { %2334 = vmatpush.bf16.msra.mxu2 %v3139_v55 }
0x10b6   : > { %v2158_v35 = vpop.xlane.xlu0 %2157 }
0x10b7   : > { %v2160_v40 = vmul.f32 %v2158_v35, %v4353_v1  ;;  %v2177_v35 = vsub.f32 1.5, %v2176_v30 }
0x10b9   : > { %v4615_v42 = vsub.f32 %v2150_v36, %v2160_v40  ;;  %v3397_v40 = vld [vmem:[%s4650_s13 + $0x20] sm:$0xff]  ;;  %v2178_v11 = vmul.f32 %v3532_v26, %v2177_v35 }
0x10ba   : > { %2485 = vmatpush.bf16.msra.mxu3 %v3397_v40 }
0x10bb   : > { %v2164_v9 = vmul.f32 %v4615_v42, %v4615_v42  ;;  %v2182_v44 = vsel %vm2181_vm13, %v3532_v26, %v2178_v11 }
0x10bc   : > { %v2193_v49 = vmul.f32 %v2182_v44, %v4577_v56  ;;  %v3495_v56 = vld [vmem:[%s2153_s6] ss:$0 sm:$0xff]  ;;  %s2514_s6 = scalar_lea.vmem %s4756_s27, %s3887_s29  ;;  %s1266_s29 = sadd.s32 1, %s3887_s29  }
0x10bd   : > { %2167 = vadd.xlane.f32.xlu2 %v2164_v9  ;;  %p1263_p1 = scmp.ge.s32.totalorder %s1266_s29, 4  }
0x10be   : > { %v2198_v53 = vmul.f32 %v3494_v41, %v2193_v49  ;;  %s4808_s14 = sld [smem:[#allocation41_spill]] (%p1263_p1)  ;;  %s3910_s22 = smov (%p1263_p1), [#allocation20]  }
0x10bf   :  { %s2572_s15 = sshll.u32 (%p1263_p1), %s3910_s22, 4  ;;  %s4809_s8 = smov (%p1263_p1), 8   ;;  %s2573_s15 = int_to_ptr.vmem [resolvable:$true] %s2572_s15 }
0x10c0   : > { %v2203_v57 = vadd.f32 %v3495_v56, %v2198_v53  ;;  %s4810_s18 = smov (%p1263_p1), 128  }
0x10c4   :  { %s2574_s10 = sshll.u32 (%p1263_p1), %s4808_s14, 4  ;;  %s2575_s10 = int_to_ptr.hbm [resolvable:$true] %s2574_s10 }
0x1130   : > { %v2168_v36 = vpop.xlane.xlu2 %2167 }
0x1131   : > { %v2170_v37 = vmul.f32 %v2168_v36, %v4353_v1 }
0x1133   : > { %v2172_v34 = vadd.f32 1e-05, %v2170_v37 }
0x1135   : > { %3533 = vrsqrt.f32 %v2172_v34  ;;  %vm2189_vm15 = vweird.f32 %v2172_v34 }
0x113b   : > { %v3534_v9 = vpop.eup %3533 }
0x113c   : > { %v2184_v33 = vmul.f32 %v3534_v9, %v2172_v34  ;;  %vm2190_vm14 = vweird.f32 %v3534_v9 }
0x113d   : > { %vm2191_vm2 = vmor %vm2189_vm15, %vm2190_vm14 }
0x113e   : > { %v2185_v43 = vmul.f32 %v3534_v9, %v2184_v33 }
0x1140   : > { %v2186_v47 = vmul.f32 0.5, %v2185_v43 }
0x1142   : > { %v2187_v48 = vsub.f32 1.5, %v2186_v47 }
0x1144   : > { %v2188_v51 = vmul.f32 %v3534_v9, %v2187_v48 }
0x1146   : > { %v2192_v52 = vsel %vm2191_vm2, %v3534_v9, %v2188_v51 }
0x1147   : > { %v2194_v45 = vmul.f32 %v2192_v52, %v4615_v42  ;;  %v3396_v42 = vld [vmem:[%s4650_s13 + $0x18] sm:$0xff] }
0x1148   : > { %2486 = vmatpush.bf16.msra.mxu3 %v3396_v42 }
0x1149   : > { %v2199_v54 = vmul.f32 %v3494_v41, %v2194_v45 }
0x114b   : > { %v2204_v58 = vadd.f32 %v3495_v56, %v2199_v54  ;;  %v3497_v54 = vld [vmem:[%s2512_s28] ss:$0 sm:$0xff] }
0x114c   : > { %2487 = vmatpush.bf16.msra.mxu3 %v3395_v5 }
0x114d   : > { %v2205_v59 = vpack.c.bf16 %v2204_v58, %v2203_v57 }
0x114f   : > { %2321 = vmatmul.bf16.vlgmr.msra.gmra.mxu1 %v2205_v59  ;;  %2335 = vmatmul.bf16.vlgmr.msra.gmra.mxu2 %v2205_v59  ;;  %v3498_v59 = vld [vmem:[%s2514_s6] ss:$0 sm:$0xff] }
0x1150   : > { %2488 = vmatpush.bf16.msra.mxu3 %v3394_v0 }
0x1154   : > { %2489 = vmatpush.bf16.msra.mxu3 %v3393_v16 }
0x11cc   : > { %v2322_v62 = vpop.f32.mrf.mxu1 }
0x11cd   : > { %v2323_v7 = vadd.f32 %v2322_v62, %v2229_v63 }
0x11cf   : > { %v2341_v18 = vmax.f32 %v2323_v7, 0.0 }
0x11d2   : > { %v2336_v10 = vpop.f32.mrf.mxu2 }
0x11d3   : > { %v2337_v61 = vadd.f32 %v2336_v10, %v2230_v12 }
0x11d4   : > { %v2324_v15 = vpop.f32.mrf.mxu1 }
0x11d5   : > { %v2325_v2 = vadd.f32 %v2324_v15, %v2229_v63  ;;  %v2342_v25 = vmax.f32 %v2337_v61, 0.0 }
0x11d7   : > { %v2343_v19 = vmax.f32 %v2325_v2, 0.0 }
0x11d9   : > { %v2345_v20 = vpack.c.bf16 %v2343_v19, %v2341_v18 }
0x11da   : > { %v2338_v21 = vpop.f32.mrf.mxu2 }
0x11db   : > { %v2339_v3 = vadd.f32 %v2338_v21, %v2230_v12  ;;  %2490 = vmatmul.bf16.vlgmr.msra.gmra.mxu3 %v2345_v20 }
0x11dd   : > { %v2344_v27 = vmax.f32 %v2339_v3, 0.0 }
0x11df   : > { %v2346_v22 = vpack.c.bf16 %v2344_v27, %v2342_v25 }
0x11e1   : > { %2504 = vmatmul.bf16.vlgmr.msrb.gmra.mxu0 %v2346_v22 }
0x125e   : > { %v2491_v24 = vpop.f32.mrf.mxu3  ;;  %v2505_v26 = vpop.f32.mrf.mxu0 }
0x125f   : > { %v2492_v50 = vadd.f32 %v3496_v23, %v2491_v24 }
0x1261   : > { %v2506_v55 = vadd.f32 %v2505_v26, %v2492_v50 }
0x1263   : > { %v2510_v29 = vadd.f32 %v2506_v55, %v2203_v57 }
0x1265   : > { %2516 = vadd.xlane.f32.xlu0 %v2510_v29 }
0x1266   : > { %v2493_v31 = vpop.f32.mrf.mxu3  ;;  %v2507_v32 = vpop.f32.mrf.mxu0 }
0x1267   : > { %v2494_v13 = vadd.f32 %v3496_v23, %v2493_v31 }
0x1269   : > { %v2508_v36 = vadd.f32 %v2507_v32, %v2494_v13 }
0x126b   : > { %v2511_v37 = vadd.f32 %v2508_v36, %v2204_v58 }
0x126d   : > { %2518 = vadd.xlane.f32.xlu2 %v2511_v37 }
0x12d8   : > { %v2517_v28 = vpop.xlane.xlu0 %2516 }
0x12d9   : > { %v2520_v38 = vmul.f32 %v2517_v28, %v4353_v1 }
0x12db   : > { %v2522_v34 = vsub.f32 %v2510_v29, %v2520_v38 }
0x12dd   : > { %v2524_v30 = vmul.f32 %v2522_v34, %v2522_v34 }
0x12df   : > { %2526 = vadd.xlane.f32.xlu0 %v2524_v30 }
0x12e0   : > { %v2519_v39 = vpop.xlane.xlu2 %2518 }
0x12e1   : > { %v2521_v46 = vmul.f32 %v2519_v39, %v4353_v1 }
0x12e3   : > { %v2523_v35 = vsub.f32 %v2511_v37, %v2521_v46 }
0x12e5   : > { %v2525_v40 = vmul.f32 %v2523_v35, %v2523_v35 }
0x12e7   : > { %2528 = vadd.xlane.f32.xlu1 %v2525_v40 }
0x1352   : > { %v2527_v9 = vpop.xlane.xlu0 %2526 }
0x1353   : > { %v2530_v11 = vmul.f32 %v2527_v9, %v4353_v1 }
0x1355   : > { %v2532_v33 = vadd.f32 1e-05, %v2530_v11 }
0x1357   : > { %3535 = vrsqrt.f32 %v2532_v33  ;;  %vm2540_vm5 = vweird.f32 %v2532_v33 }
0x135a   : > { %v2529_v43 = vpop.xlane.xlu1 %2528 }
0x135b   : > { %v2531_v44 = vmul.f32 %v2529_v43, %v4353_v1 }
0x135d   : > { %v3536_v47 = vpop.eup %3535  ;;  %v2533_v48 = vadd.f32 1e-05, %v2531_v44 }
0x135e   : > { %v2535_v49 = vmul.f32 %v3536_v47, %v2532_v33  ;;  %vm2541_vm4 = vweird.f32 %v3536_v47 }
0x135f   : > { %3537 = vrsqrt.f32 %v2533_v48  ;;  %vm2542_vm6 = vmor %vm2540_vm5, %vm2541_vm4  ;;  %vm2550_vm8 = vweird.f32 %v2533_v48 }
0x1360   : > { %v2536_v41 = vmul.f32 %v3536_v47, %v2535_v49 }
0x1362   : > { %v2537_v51 = vmul.f32 0.5, %v2536_v41 }
0x1364   : > { %v2538_v52 = vsub.f32 1.5, %v2537_v51 }
0x1365   : > { %v3538_v45 = vpop.eup %3537 }
0x1366   : > { %v2539_v53 = vmul.f32 %v3536_v47, %v2538_v52  ;;  %v2545_v56 = vmul.f32 %v3538_v45, %v2533_v48  ;;  %vm2551_vm7 = vweird.f32 %v3538_v45 }
0x1367   : > { %vm2552_vm9 = vmor %vm2550_vm8, %vm2551_vm7 }
0x1368   : > { %v2543_v57 = vsel %vm2542_vm6, %v3536_v47, %v2539_v53  ;;  %v2546_v58 = vmul.f32 %v3538_v45, %v2545_v56 }
0x1369   : > { %v2554_v42 = vmul.f32 %v2543_v57, %v2522_v34 }
0x136a   : > { %v2547_v6 = vmul.f32 0.5, %v2546_v58 }
0x136b   : > { %v2559_v5 = vmul.f32 %v3497_v54, %v2554_v42 }
0x136c   : > { %v2548_v8 = vsub.f32 1.5, %v2547_v6 }
0x136d   : > { %v2564_v0 = vadd.f32 %v3498_v59, %v2559_v5  }
0x136e   : > { %v2549_v14 = vmul.f32 %v3538_v45, %v2548_v8 }
0x136f   : > { %v4807_v41 = vmov %v2564_v0  ;;  %2566 = vst [vmem:[#allocation20] sm:$0xff] (%p1263_p1), %v2564_v0 }
0x1370   : > { %v2553_v16 = vsel %vm2552_vm9, %v3538_v45, %v2549_v14 }
0x1371   : > { %v2555_v17 = vmul.f32 %v2553_v16, %v2523_v35 }
0x1373   : > { %v2560_v60 = vmul.f32 %v3497_v54, %v2555_v17  ;;  %1265 = sbr.rel (!%p1263_p1) target bundleno = 1836 (0x72c), region = 225 }
0x1375   : > { %v2565_v4 = vadd.f32 %v3498_v59, %v2560_v60  }
0x1377   : > { %v4806_v46 = vmov %v2565_v4  ;;  %2567 = vst [vmem:[#allocation20 + $0x8] sm:$0xff] (%p1263_p1), %v2565_v4 }
0x1378   :  { %2580 = dma.vmem_to_hbm [thread:$0]  %s2573_s15, 256, %s2575_s10, [#allocation4], %s4810_s18, %s4810_s18, %s4809_s8  }
0x1379   :  { %3863 = dma.done.wait [#allocation4], 256  }
0x137a   :  { %3864 = vsyncadd [#allocation4], 4294967040 }
0x137b   :  { %2585 = vsyncpa [#allocation3], 1 }
0x137c   :  { %2586 = vsyncpa [#allocation6], 1 }
0x137d   :  { %2587 = vsyncpa [#allocation9], 1 }
0x137e   :  { %2588 = vsyncpa [#allocation12], 1 }
0x137f   :  { %2589 = vsyncpa [#allocation15], 1 }
0x1380   :  { %2590 = vsyncpa [#allocation18], 1 }
0x1381   :  { %2591 = vsyncpa [#allocation4], 1 }

</bundles_post_ra>
